<compile_context>
chip_gen: v7x
topology: tpu7x:2x2x1
jax: 0.10.0
libtpu: 0.0.40
codegen_flags: <defaults>
</compile_context>

<pallas_src>
import functools

import jax
import jax.numpy as jnp
from jax.experimental import pallas as pl
from jax.experimental.pallas import tpu as pltpu


def _round_up(x, m):
    return (x + m - 1) // m * m


def _vmem_budget_bytes():
    # ~80% of per-core VMEM; fall back to the smallest generation (v7x, 64 MiB
    # per TensorCore) if the query is unavailable.
    try:
        cap = int(pltpu.get_tpu_info().vmem_capacity_bytes)
    except Exception:
        cap = 64 << 20
    return int(cap * 0.8)


_VMEM_BUDGET = _vmem_budget_bytes()


# --------------------------------------------------------------------------
# Kernels
# --------------------------------------------------------------------------
def _ffn_resident_kernel(x_ref, w1_ref, b1_ref, w2_ref, b2_ref, o_ref):
    # Grid: (row-tile i,).  W1/W2/b1/b2 have constant index maps -> DMA'd once.
    h = jnp.dot(x_ref[...], w1_ref[...], preferred_element_type=jnp.float32)
    h = jnp.maximum(h + b1_ref[...], 0.0)
    out = jnp.dot(h.astype(w2_ref.dtype), w2_ref[...],
                  preferred_element_type=jnp.float32)
    o_ref[...] = (out + b2_ref[...]).astype(o_ref.dtype)


def _ffn_streamed_kernel_f32out(x_ref, w1_ref, b1_ref, w2_ref, b2_ref, o_ref):
    # Grid: (row-tile i, hidden-tile h).  Output dtype is f32, so partial
    # products accumulate directly into the resident output block.
    h_idx = pl.program_id(1)

    @pl.when(h_idx == 0)
    def _init():
        o_ref[...] = jnp.zeros_like(o_ref)

    h = jnp.dot(x_ref[...], w1_ref[...], preferred_element_type=jnp.float32)
    h = jnp.maximum(h + b1_ref[...], 0.0)
    o_ref[...] += jnp.dot(h.astype(w2_ref.dtype), w2_ref[...],
                          preferred_element_type=jnp.float32)

    @pl.when(h_idx == pl.num_programs(1) - 1)
    def _finalize():
        o_ref[...] += b2_ref[...]


def _ffn_streamed_kernel_acc(x_ref, w1_ref, b1_ref, w2_ref, b2_ref, o_ref,
                             acc_ref):
    # Same as above but with an f32 scratch accumulator (non-f32 output dtype).
    h_idx = pl.program_id(1)

    @pl.when(h_idx == 0)
    def _init():
        acc_ref[...] = jnp.zeros_like(acc_ref)

    h = jnp.dot(x_ref[...], w1_ref[...], preferred_element_type=jnp.float32)
    h = jnp.maximum(h + b1_ref[...], 0.0)
    acc_ref[...] += jnp.dot(h.astype(w2_ref.dtype), w2_ref[...],
                            preferred_element_type=jnp.float32)

    @pl.when(h_idx == pl.num_programs(1) - 1)
    def _finalize():
        o_ref[...] = (acc_ref[...] + b2_ref[...]).astype(o_ref.dtype)


# --------------------------------------------------------------------------
# VMEM footprint estimates (conservative: inputs counted double-buffered)
# --------------------------------------------------------------------------
def _resident_fits(tm, d_in_p, h_p, d_out_p, out_bytes, budget):
    x_buf = 2 * tm * d_in_p * 2                      # bf16 x, double buffered
    w_buf = 2 * (d_in_p * h_p + h_p * d_out_p) * 2   # bf16 weights (x2, safe)
    b_buf = 2 * (h_p + d_out_p) * 4
    h_buf = tm * h_p * (4 + 2)                       # f32 hidden + bf16 recast
    o_buf = 2 * tm * d_out_p * out_bytes
    return x_buf + w_buf + b_buf + h_buf + o_buf <= budget


def _streamed_fits(tm, th, d_in_p, d_out_p, out_bytes, use_acc, budget):
    x_buf = 2 * tm * d_in_p * 2
    w_buf = 2 * (d_in_p * th + th * d_out_p) * 2
    b_buf = 2 * (th + d_out_p) * 4
    h_buf = tm * th * (4 + 2)
    o_buf = 2 * tm * d_out_p * out_bytes
    a_buf = tm * d_out_p * 4 if use_acc else 0
    return x_buf + w_buf + b_buf + h_buf + o_buf + a_buf <= budget


# --------------------------------------------------------------------------
# Host-side wrappers
# --------------------------------------------------------------------------
def prepare_ffn_params(w1, b1, w2, b2, compute_dtype=jnp.bfloat16):
    """Pad feature dims to multiples of 128 and cast weights to the MXU operand
    dtype ONCE (hoisted out of the per-call path)."""
    D_in, H = w1.shape
    D_out = w2.shape[1]
    d_in_p = _round_up(D_in, 128)
    h_p = _round_up(H, 128)
    d_out_p = _round_up(D_out, 128)
    w1_p = jnp.pad(w1, ((0, d_in_p - D_in), (0, h_p - H))).astype(compute_dtype)
    w2_p = jnp.pad(w2, ((0, h_p - H), (0, d_out_p - D_out))).astype(compute_dtype)
    b1_p = jnp.pad(b1, (0, h_p - H)).astype(jnp.float32).reshape(1, h_p)
    b2_p = jnp.pad(b2, (0, d_out_p - D_out)).astype(jnp.float32).reshape(1, d_out_p)
    return {"w1": w1_p, "b1": b1_p, "w2": w2_p, "b2": b2_p, "d_out": D_out}


@functools.partial(jax.jit, static_argnames=("d_out",))
def ffn_apply(x, w1_p, b1_p, w2_p, b2_p, *, d_out):
    """x: [B, S, D_in] (unpadded).  Weights already padded/cast by
    prepare_ffn_params.  Computes relu(x @ W1 + b1) @ W2 + b2."""
    B, S, D_in = x.shape
    d_in_p, h_p = w1_p.shape
    d_out_p = w2_p.shape[1]
    M = B * S
    out_dtype = x.dtype
    out_bytes = out_dtype.itemsize
    compute_dtype = w1_p.dtype

    # Rows padded to a multiple of 16 (bf16 packs 16 sublanes per native tile).
    m_p = _round_up(max(M, 16), 16)
    x2d = jnp.pad(x.reshape(M, D_in),
                  ((0, m_p - M), (0, d_in_p - D_in))).astype(compute_dtype)

    # ---- weights-resident fast path --------------------------------------
    tm_res = None
    for cand in (512, 256, 128, 64, 32, 16):
        tm = min(cand, m_p)
        if _resident_fits(tm, d_in_p, h_p, d_out_p, out_bytes, _VMEM_BUDGET):
            tm_res = tm
            break

    if tm_res is not None:
        # Give v7x's second TensorCore work when there would be a single tile.
        if m_p // tm_res == 1 and m_p >= 32:
            tm_res = _round_up((m_p + 1) // 2, 16)
        m_pad = _round_up(m_p, tm_res)
        if m_pad != m_p:
            x2d = jnp.pad(x2d, ((0, m_pad - m_p), (0, 0)))
        grid = (m_pad // tm_res,)

        out2d = pl.pallas_call(
            _ffn_resident_kernel,
            out_shape=jax.ShapeDtypeStruct((m_pad, d_out_p), out_dtype),
            grid_spec=pltpu.PrefetchScalarGridSpec(
                num_scalar_prefetch=0,
                grid=grid,
                in_specs=[
                    pl.BlockSpec((tm_res, d_in_p), lambda i: (i, 0)),
                    pl.BlockSpec((d_in_p, h_p), lambda i: (0, 0)),   # resident
                    pl.BlockSpec((1, h_p), lambda i: (0, 0)),
                    pl.BlockSpec((h_p, d_out_p), lambda i: (0, 0)),  # resident
                    pl.BlockSpec((1, d_out_p), lambda i: (0, 0)),
                ],
                out_specs=pl.BlockSpec((tm_res, d_out_p), lambda i: (i, 0)),
            ),
            compiler_params=pltpu.CompilerParams(
                dimension_semantics=("parallel",),
                vmem_limit_bytes=_VMEM_BUDGET,
            ),
        )(x2d, w1_p, b1_p, w2_p, b2_p)
        return out2d[:M, :d_out].reshape(B, S, d_out)

    # ---- streamed-weights fallback (weights do not fit VMEM) --------------
    # Maximize the row tile first (weight-traffic reuse ~ tm), then the hidden
    # tile.  Wide D_out is handled implicitly: the budget check caps tm when
    # the acc/out tiles (tm x d_out_p) get large.
    use_acc = out_dtype != jnp.float32
    th_cands = [c for c in (1024, 512, 256, 128) if c <= h_p and h_p % c == 0]
    if not th_cands:
        th_cands = [h_p]
    tm_e, th_e = 16, th_cands[-1]
    found = False
    for cand_tm in (512, 256, 128, 64, 32, 16):
        tm = min(cand_tm, m_p)
        for th in th_cands:
            if _streamed_fits(tm, th, d_in_p, d_out_p, out_bytes, use_acc,
                              _VMEM_BUDGET):
                tm_e, th_e = tm, th
                found = True
                break
        if found:
            break

    m_pad = _round_up(m_p, tm_e)
    if m_pad != m_p:
        x2d = jnp.pad(x2d, ((0, m_pad - m_p), (0, 0)))
    grid = (m_pad // tm_e, h_p // th_e)

    kernel = _ffn_streamed_kernel_acc if use_acc else _ffn_streamed_kernel_f32out
    scratch = [pltpu.VMEM((tm_e, d_out_p), jnp.float32)] if use_acc else []

    out2d = pl.pallas_call(
        kernel,
        out_shape=jax.ShapeDtypeStruct((m_pad, d_out_p), out_dtype),
        grid_spec=pltpu.PrefetchScalarGridSpec(
            num_scalar_prefetch=0,
            grid=grid,
            in_specs=[
                pl.BlockSpec((tm_e, d_in_p), lambda i, h: (i, 0)),
                pl.BlockSpec((d_in_p, th_e), lambda i, h: (0, h)),
                pl.BlockSpec((1, th_e), lambda i, h: (0, h)),
                pl.BlockSpec((th_e, d_out_p), lambda i, h: (h, 0)),
                pl.BlockSpec((1, d_out_p), lambda i, h: (0, 0)),
            ],
            out_specs=pl.BlockSpec((tm_e, d_out_p), lambda i, h: (i, 0)),
            scratch_shapes=scratch,
        ),
        compiler_params=pltpu.CompilerParams(
            dimension_semantics=("parallel", "arbitrary"),
            vmem_limit_bytes=_VMEM_BUDGET,
        ),
    )(x2d, w1_p, b1_p, w2_p, b2_p)
    return out2d[:M, :d_out].reshape(B, S, d_out)


def position_wise_ffn(x, w1, b1, w2, b2):
    """Convenience wrapper: pads/casts weights per call.  For repeated calls,
    prefer prepare_ffn_params(...) once + ffn_apply(...)."""
    p = prepare_ffn_params(w1, b1, w2, b2)
    return ffn_apply(x, p["w1"], p["b1"], p["w2"], p["b2"], d_out=p["d_out"])


def xavier_uniform(key, fan_in, fan_out, dtype=jnp.float32):
    bound = (6.0 / (fan_in + fan_out)) ** 0.5
    return jax.random.uniform(key, (fan_in, fan_out), dtype,
                              minval=-bound, maxval=bound)


if __name__ == "__main__":
    # Module defaults for the feature dims (512 -> 2048 -> 512), small batch/seq.
    B, S = 2, 8
    D_IN, HID, D_OUT = 512, 2048, 512

    key = jax.random.PRNGKey(0)
    kx, kw1, kw2 = jax.random.split(key, 3)

    x = jax.random.normal(kx, (B, S, D_IN), jnp.float32)
    w1 = xavier_uniform(kw1, D_IN, HID)
    b1 = jnp.zeros((HID,), jnp.float32)
    w2 = xavier_uniform(kw2, HID, D_OUT)
    b2 = jnp.zeros((D_OUT,), jnp.float32)

    # Weight pad + bf16 cast hoisted out of the per-call path.
    params = prepare_ffn_params(w1, b1, w2, b2)
    out = ffn_apply(x, params["w1"], params["b1"], params["w2"], params["b2"],
                    d_out=params["d_out"])
    out = jax.block_until_ready(out)

    # Pure-f32 reference (same math as the PyTorch module).  Kernel uses bf16
    # MXU operands with f32 accumulation, so tolerance is relaxed accordingly.
    ref = jnp.maximum(x @ w1 + b1, 0.0) @ w2 + b2
    assert out.shape == (B, S, D_OUT)
    max_err = float(jnp.max(jnp.abs(out - ref)))
    assert jnp.allclose(out, ref, atol=5e-2, rtol=5e-2), max_err

    print("KERNEL_OK")
</pallas_src>

<mosaic_0001>
module attributes {stable_mosaic.version = 11 : i64} {
  func.func @_ffn_resident_kernel(%arg0: i32, %arg1: memref<16x512xbf16, #tpu.memory_space<vmem>>, %arg2: memref<512x2048xbf16, #tpu.memory_space<vmem>>, %arg3: memref<1x2048xf32, #tpu.memory_space<vmem>>, %arg4: memref<2048x512xbf16, #tpu.memory_space<vmem>>, %arg5: memref<1x512xf32, #tpu.memory_space<vmem>>, %arg6: memref<16x512xf32, #tpu.memory_space<vmem>>) attributes {dimension_semantics = [#tpu.dimension_semantics<parallel>], iteration_bounds = array<i64: 1>, scalar_prefetch = 0 : i64, scratch_operands = 0 : i64, tpu.core_type = #tpu.core_type<tc>, window_params = [{transform_indices = @transform_0, window_bounds = array<i64: 16, 512>}, {pipeline_mode = #tpu.pipeline_mode<synchronous>, transform_indices = @transform_1, window_bounds = array<i64: 512, 2048>}, {pipeline_mode = #tpu.pipeline_mode<synchronous>, transform_indices = @transform_2, window_bounds = array<i64: 1, 2048>}, {pipeline_mode = #tpu.pipeline_mode<synchronous>, transform_indices = @transform_3, window_bounds = array<i64: 2048, 512>}, {pipeline_mode = #tpu.pipeline_mode<synchronous>, transform_indices = @transform_4, window_bounds = array<i64: 1, 512>}, {transform_indices = @transform_5, window_bounds = array<i64: 16, 512>}]} {
    %c0 = arith.constant 0 : index
    %c0_0 = arith.constant 0 : index
    %0 = vector.load %arg1[%c0, %c0_0] : memref<16x512xbf16, #tpu.memory_space<vmem>>, vector<16x512xbf16>
    %c0_1 = arith.constant 0 : index
    %c0_2 = arith.constant 0 : index
    %1 = vector.load %arg2[%c0_1, %c0_2] : memref<512x2048xbf16, #tpu.memory_space<vmem>>, vector<512x2048xbf16>
    %cst = arith.constant dense<0.000000e+00> : vector<16x2048xf32>
    %2 = tpu.matmul %0, %1, %cst {dimension_numbers = #tpu.dot_dimension_numbers<[1], [0], [0], [1], [0, 0, 1, 1], [], []>} : vector<16x512xbf16>, vector<512x2048xbf16>, vector<16x2048xf32> -> vector<16x2048xf32>
    %c0_3 = arith.constant 0 : index
    %c0_4 = arith.constant 0 : index
    %3 = vector.load %arg3[%c0_3, %c0_4] : memref<1x2048xf32, #tpu.memory_space<vmem>>, vector<1x2048xf32>
    %4 = vector.broadcast %3 : vector<1x2048xf32> to vector<16x2048xf32>
    %5 = arith.addf %2, %4 : vector<16x2048xf32>
    %cst_5 = arith.constant 0.000000e+00 : f32
    %6 = vector.broadcast %cst_5 : f32 to vector<16x2048xf32>
    %7 = arith.maximumf %5, %6 : vector<16x2048xf32>
    %8 = arith.truncf %7 : vector<16x2048xf32> to vector<16x2048xbf16>
    %c0_6 = arith.constant 0 : index
    %c0_7 = arith.constant 0 : index
    %9 = vector.load %arg4[%c0_6, %c0_7] : memref<2048x512xbf16, #tpu.memory_space<vmem>>, vector<2048x512xbf16>
    %cst_8 = arith.constant dense<0.000000e+00> : vector<16x512xf32>
    %10 = tpu.matmul %8, %9, %cst_8 {dimension_numbers = #tpu.dot_dimension_numbers<[1], [0], [0], [1], [0, 0, 1, 1], [], []>} : vector<16x2048xbf16>, vector<2048x512xbf16>, vector<16x512xf32> -> vector<16x512xf32>
    %c0_9 = arith.constant 0 : index
    %c0_10 = arith.constant 0 : index
    %11 = vector.load %arg5[%c0_9, %c0_10] : memref<1x512xf32, #tpu.memory_space<vmem>>, vector<1x512xf32>
    %12 = vector.broadcast %11 : vector<1x512xf32> to vector<16x512xf32>
    %13 = arith.addf %10, %12 : vector<16x512xf32>
    %c0_11 = arith.constant 0 : index
    %c0_12 = arith.constant 0 : index
    %14 = vector.load %arg6[%c0_11, %c0_12] : memref<16x512xf32, #tpu.memory_space<vmem>>, vector<16x512xf32>
    tpu.vector_store %arg6[%c0_11, %c0_12], %13 {strides = array<i32>} : memref<16x512xf32, #tpu.memory_space<vmem>>, vector<16x512xf32>,
    return
  }
  func.func @transform_0(%arg0: i32) -> (i32, i32) {
    %c0_i32 = arith.constant 0 : i32
    %c0_i32_0 = arith.constant 0 : i32
    return %arg0, %c0_i32 : i32, i32
  }
  func.func @transform_1(%arg0: i32) -> (i32, i32) {
    %c0_i32 = arith.constant 0 : i32
    %c0_i32_0 = arith.constant 0 : i32
    %c0_i32_1 = arith.constant 0 : i32
    return %c0_i32, %c0_i32_0 : i32, i32
  }
  func.func @transform_2(%arg0: i32) -> (i32, i32) {
    %c0_i32 = arith.constant 0 : i32
    %c0_i32_0 = arith.constant 0 : i32
    %c0_i32_1 = arith.constant 0 : i32
    return %c0_i32, %c0_i32_0 : i32, i32
  }
  func.func @transform_3(%arg0: i32) -> (i32, i32) {
    %c0_i32 = arith.constant 0 : i32
    %c0_i32_0 = arith.constant 0 : i32
    %c0_i32_1 = arith.constant 0 : i32
    return %c0_i32, %c0_i32_0 : i32, i32
  }
  func.func @transform_4(%arg0: i32) -> (i32, i32) {
    %c0_i32 = arith.constant 0 : i32
    %c0_i32_0 = arith.constant 0 : i32
    %c0_i32_1 = arith.constant 0 : i32
    return %c0_i32, %c0_i32_0 : i32, i32
  }
  func.func @transform_5(%arg0: i32) -> (i32, i32) {
    %c0_i32 = arith.constant 0 : i32
    %c0_i32_0 = arith.constant 0 : i32
    return %arg0, %c0_i32 : i32, i32
  }
}

</mosaic_0001>

<bundles_post_ra>
// kernel: ffn_apply.1
= control target key start
LH: loop header
LB: loop body
LE: loop exit
PB: predicated region body
PF: predicated region fallthrough
CT: control target
= control target key end

     0   :  { %10 = vsyncpa [#allocation3], 0  ;;  %s10162_s0 = inlined_call_operand.vmem [shape: bf16[16,512], index: 0, kind: input, shape index: {}]   ;;  %s10163_s1 = inlined_call_operand.hbm [shape: bf16[512,2048], index: 1, kind: input, shape index: {}]   ;;  %s10164_s2 = inlined_call_operand.hbm [shape: f32[1,2048], index: 2, kind: input, shape index: {}]   ;;  %s10165_s3 = inlined_call_operand.hbm [shape: bf16[2048,512], index: 3, kind: input, shape index: {}]   ;;  %s10166_s4 = inlined_call_operand.hbm [shape: f32[1,512], index: 4, kind: input, shape index: {}]   ;;  %s10167_s5 = inlined_call_operand.hbm [shape: f32[16,512], index: 5, kind: output, shape index: {}]  }
   0x1   :  { %11 = vsyncpa [#allocation6], 0 }
   0x2   :  { %12 = vsyncpa [#allocation9], 0 }
   0x3   :  { %13 = vsyncpa [#allocation4], 0  ;;  %s9864_s18 = smov [#allocation5]   ;;  %s9865_s20 = smov [#allocation2]  }
   0x4   :  { %s34_s19 = sshll.u32 %s9864_s18, 4  ;;  %s21_s21 = sshll.u32 %s9865_s20, 4  ;;  %s35_s19 = int_to_ptr.vmem [resolvable:$true] %s34_s19  ;;  %s9905_s21 = int_to_ptr.vmem [resolvable:$true] %s21_s21 }
   0x5   :  { %s9746_s24 = scalar_lea.hbm %s10164_s2, 256 }
   0x6   :  { %p9747_p0 = scmp.ne.s32.totalorder %s10164_s2, %s9746_s24  ;;  %p9750_p1 = scmp.lt.u32.totalorder %s9746_s24, %s10164_s2 }
   0x8   :  { %p9752_p2 = pnand %p9750_p1, %p9747_p0 }
   0xa   :  { %9755 = shalt.err (!%p9752_p2)
}
   0xb   :  { %s9756_s29 = scalar_lea.vmem %s35_s19, 256  ;;  %p9761_p4 = scmp.lt.s32.totalorder %s35_s19, %s35_s19 }
   0xc   :  { %p9757_p3 = scmp.ne.s32.totalorder %s35_s19, %s9756_s29  ;;  %p9762_p5 = scmp.lt.s32.totalorder %s9756_s29, %s9756_s29 }
   0xe   :  { %p9763_p6 = por %p9762_p5, %p9761_p4 }
  0x10   :  { %p9764_p7 = pnand %p9763_p6, %p9757_p3 }
  0x12   :  { %9767 = shalt.err (!%p9764_p7)
}
  0x13   :  { %37 = dma.hbm_to_vmem [thread:$0]  %s10164_s2, 256, %s35_s19, [#allocation6]  }
  0x14   :  { %s9768_s9 = scalar_lea.hbm %s10163_s1, 65536 }
  0x15   :  { %p9769_p8 = scmp.ne.s32.totalorder %s10163_s1, %s9768_s9  ;;  %p9772_p9 = scmp.lt.u32.totalorder %s9768_s9, %s10163_s1 }
  0x17   :  { %p9774_p10 = pnand %p9772_p9, %p9769_p8 }
  0x19   :  { %9777 = shalt.err (!%p9774_p10)
}
  0x1a   :  { %s9778_s14 = scalar_lea.vmem %s9905_s21, 65536  ;;  %p9783_p12 = scmp.lt.s32.totalorder %s9905_s21, %s9905_s21 }
  0x1b   :  { %p9779_p11 = scmp.ne.s32.totalorder %s9905_s21, %s9778_s14  ;;  %p9784_p13 = scmp.lt.s32.totalorder %s9778_s14, %s9778_s14 }
  0x1d   :  { %p9785_p0 = por %p9784_p13, %p9783_p12 }
  0x1f   :  { %p9786_p1 = pnand %p9785_p0, %p9779_p11 }
  0x21   :  { %9789 = shalt.err (!%p9786_p1)
}
  0x22   :  { %s9866_s2 = smov 1024   ;;  %s9867_s15 = smov 64  }
  0x23   :  { %27 = dma.hbm_to_vmem [thread:$0]  %s10163_s1, 65536, %s9905_s21, [#allocation3], %s9866_s2, %s9866_s2, %s9867_s15  }
  0x24   :  { %s9868_s18 = smov [#allocation7]   ;;  %s9790_s23 = scalar_lea.hbm %s10165_s3, 65536 }
  0x25   :  { %s43_s19 = sshll.u32 %s9868_s18, 4  ;;  %p9791_p2 = scmp.ne.s32.totalorder %s10165_s3, %s9790_s23  ;;  %s44_s19 = int_to_ptr.vmem [resolvable:$true] %s43_s19 }
  0x26   :  { %p9794_p3 = scmp.lt.u32.totalorder %s9790_s23, %s10165_s3 }
  0x28   :  { %p9796_p4 = pnand %p9794_p3, %p9791_p2 }
  0x2a   :  { %9799 = shalt.err (!%p9796_p4)
}
  0x2b   :  { %s9800_s28 = scalar_lea.vmem %s44_s19, 65536  ;;  %p9805_p6 = scmp.lt.s32.totalorder %s44_s19, %s44_s19 }
  0x2c   :  { %p9801_p5 = scmp.ne.s32.totalorder %s44_s19, %s9800_s28  ;;  %p9806_p7 = scmp.lt.s32.totalorder %s9800_s28, %s9800_s28 }
  0x2e   :  { %p9807_p8 = por %p9806_p7, %p9805_p6 }
  0x30   :  { %p9808_p9 = pnand %p9807_p8, %p9801_p5 }
  0x32   :  { %9811 = shalt.err (!%p9808_p9)
}
  0x33   :  { %s9869_s1 = smov 256   ;;  %s9870_s21 = smov 16  }
  0x34   :  { %49 = dma.hbm_to_vmem [thread:$0]  %s10165_s3, 65536, %s44_s19, [#allocation6], %s9869_s1, %s9869_s1, %s9870_s21  }
  0x35   :  { %s9871_s6 = smov [#allocation8]   ;;  %s9812_s10 = scalar_lea.hbm %s10166_s4, 64 }
  0x36   :  { %s56_s7 = sshll.u32 %s9871_s6, 4  ;;  %p9813_p10 = scmp.ne.s32.totalorder %s10166_s4, %s9812_s10  ;;  %s57_s7 = int_to_ptr.vmem [resolvable:$true] %s56_s7 }
  0x37   :  { %p9816_p11 = scmp.lt.u32.totalorder %s9812_s10, %s10166_s4 }
  0x39   :  { %p9818_p12 = pnand %p9816_p11, %p9813_p10 }
  0x3b   :  { %9821 = shalt.err (!%p9818_p12)
}
  0x3c   :  { %s9822_s2 = scalar_lea.vmem %s57_s7, 64  ;;  %p9827_p0 = scmp.lt.s32.totalorder %s57_s7, %s57_s7 }
  0x3d   :  { %p9823_p13 = scmp.ne.s32.totalorder %s57_s7, %s9822_s2  ;;  %p9828_p1 = scmp.lt.s32.totalorder %s9822_s2, %s9822_s2 }
  0x3f   :  { %p9829_p2 = por %p9828_p1, %p9827_p0 }
  0x41   :  { %p9830_p3 = pnand %p9829_p2, %p9823_p13 }
  0x43   :  { %9833 = shalt.err (!%p9830_p3)
}
  0x44   :  { %59 = dma.hbm_to_vmem [thread:$0]  %s10166_s4, 64, %s57_s7, [#allocation9]  }
  0x45   :  { %9856 = dma.done.wait [#allocation3], 65536  }
  0x46   :  { %9857 = vsyncadd [#allocation3], 4294901760 }
  0x47   :  { %9858 = dma.done.wait [#allocation6], 65792  }
  0x48   :  { %9859 = vsyncadd [#allocation6], 4294901504 }
  0x49   :  { %9860 = dma.done.wait [#allocation9], 64  }
  0x4a   :  { %9861 = vsyncadd [#allocation9], 4294967232  ;;  %v76_v0 = vld [vmem:[#allocation2] sm:$0xff]  ;;  %v77_v2 = vld [vmem:[#allocation2 + $0x8] sm:$0xff] }
  0x4b   :  { %v84_v1 = vld [vmem:[#allocation2 + $0x40] sm:$0xff]  ;;  %v85_v4 = vld [vmem:[#allocation2 + $0x48] sm:$0xff] }
  0x4c   :  { %v7802_v3 = vcombine.high %v76_v0, %v84_v1  ;;  %v7801_v5 = vcombine.low %v76_v0, %v84_v1  ;;  %v92_v6 = vld [vmem:[#allocation2 + $0x80] sm:$0xff]  ;;  %v7804_v8 = vcombine.high %v77_v2, %v85_v4  ;;  %v7803_v9 = vcombine.low %v77_v2, %v85_v4  ;;  %v93_v11 = vld [vmem:[#allocation2 + $0x88] sm:$0xff] }
  0x4d   :  { %v100_v7 = vld [vmem:[#allocation2 + $0xc0] sm:$0xff]  ;;  %v101_v12 = vld [vmem:[#allocation2 + $0xc8] sm:$0xff] }
  0x4e   :  { %v7818_v10 = vcombine.high %v92_v6, %v100_v7  ;;  %v108_v13 = vld [vmem:[#allocation2 + $0x100] sm:$0xff]  ;;  %3252 = vmatprep.subr.bf16.mxu0 %v7802_v3  ;;  %v7820_v14 = vcombine.high %v93_v11, %v101_v12  ;;  %v109_v16 = vld [vmem:[#allocation2 + $0x108] sm:$0xff]  ;;  %3338 = vmatprep.subr.bf16.mxu1 %v7804_v8  ;;  %v7817_v18 = vcombine.low %v92_v6, %v100_v7 }
  0x4f   :  { %v116_v15 = vld [vmem:[#allocation2 + $0x140] sm:$0xff]  ;;  %v117_v17 = vld [vmem:[#allocation2 + $0x148] sm:$0xff]  ;;  %3253 = vmatpush1.bf16.msra.mxu0 %v7801_v5  ;;  %3339 = vmatpush1.bf16.msra.mxu1 %v7803_v9  ;;  %v7819_v19 = vcombine.low %v93_v11, %v101_v12 }
  0x50   :  { %3254 = vmatprep.subr.bf16.mxu0 %v7818_v10  ;;  %v7834_v20 = vcombine.high %v108_v13, %v116_v15  ;;  %3340 = vmatprep.subr.bf16.mxu1 %v7820_v14  ;;  %v7836_v21 = vcombine.high %v109_v16, %v117_v17  ;;  %v124_v22 = vld [vmem:[#allocation2 + $0x180] sm:$0xff]  ;;  %v125_v24 = vld [vmem:[#allocation2 + $0x188] sm:$0xff]  ;;  %v7833_v26 = vcombine.low %v108_v13, %v116_v15 }
  0x51   :  { %v132_v23 = vld [vmem:[#allocation2 + $0x1c0] sm:$0xff]  ;;  %v133_v25 = vld [vmem:[#allocation2 + $0x1c8] sm:$0xff]  ;;  %v7835_v27 = vcombine.low %v109_v16, %v117_v17 }
  0x52   :  { %v7850_v28 = vcombine.high %v124_v22, %v132_v23  ;;  %v7852_v29 = vcombine.high %v125_v24, %v133_v25  ;;  %v140_v30 = vld [vmem:[#allocation2 + $0x200] sm:$0xff]  ;;  %v141_v32 = vld [vmem:[#allocation2 + $0x208] sm:$0xff]  ;;  %v7849_v34 = vcombine.low %v124_v22, %v132_v23  ;;  %v7851_v35 = vcombine.low %v125_v24, %v133_v25 }
  0x53   :  { %3255 = vmatpush1.bf16.msra.mxu0 %v7817_v18  ;;  %3341 = vmatpush1.bf16.msra.mxu1 %v7819_v19  ;;  %v148_v31 = vld [vmem:[#allocation2 + $0x240] sm:$0xff]  ;;  %v149_v33 = vld [vmem:[#allocation2 + $0x248] sm:$0xff] }
  0x54   :  { %3256 = vmatprep.subr.bf16.mxu0 %v7834_v20  ;;  %3342 = vmatprep.subr.bf16.mxu1 %v7836_v21  ;;  %v7866_v36 = vcombine.high %v140_v30, %v148_v31  ;;  %v7868_v37 = vcombine.high %v141_v32, %v149_v33  ;;  %v156_v38 = vld [vmem:[#allocation2 + $0x280] sm:$0xff]  ;;  %v157_v40 = vld [vmem:[#allocation2 + $0x288] sm:$0xff]  ;;  %v7865_v42 = vcombine.low %v140_v30, %v148_v31 }
  0x55   :  { %v164_v39 = vld [vmem:[#allocation2 + $0x2c0] sm:$0xff]  ;;  %v165_v41 = vld [vmem:[#allocation2 + $0x2c8] sm:$0xff]  ;;  %v7867_v43 = vcombine.low %v141_v32, %v149_v33 }
  0x56   :  { %v7882_v44 = vcombine.high %v156_v38, %v164_v39  ;;  %v7884_v45 = vcombine.high %v157_v40, %v165_v41  ;;  %v172_v46 = vld [vmem:[#allocation2 + $0x300] sm:$0xff]  ;;  %v173_v48 = vld [vmem:[#allocation2 + $0x308] sm:$0xff]  ;;  %v7881_v50 = vcombine.low %v156_v38, %v164_v39  ;;  %v7883_v51 = vcombine.low %v157_v40, %v165_v41 }
  0x57   :  { %3257 = vmatpush1.bf16.msra.mxu0 %v7833_v26  ;;  %3343 = vmatpush1.bf16.msra.mxu1 %v7835_v27  ;;  %v180_v47 = vld [vmem:[#allocation2 + $0x340] sm:$0xff]  ;;  %v181_v49 = vld [vmem:[#allocation2 + $0x348] sm:$0xff] }
  0x58   :  { %3258 = vmatprep.subr.bf16.mxu0 %v7850_v28  ;;  %3344 = vmatprep.subr.bf16.mxu1 %v7852_v29  ;;  %v7898_v52 = vcombine.high %v172_v46, %v180_v47  ;;  %v7900_v53 = vcombine.high %v173_v48, %v181_v49  ;;  %v188_v54 = vld [vmem:[#allocation2 + $0x380] sm:$0xff]  ;;  %v189_v57 = vld [vmem:[#allocation2 + $0x388] sm:$0xff]  ;;  %v7897_v59 = vcombine.low %v172_v46, %v180_v47 }
  0x59   :  { %v196_v55 = vld [vmem:[#allocation2 + $0x3c0] sm:$0xff]  ;;  %v197_v58 = vld [vmem:[#allocation2 + $0x3c8] sm:$0xff]  ;;  %v7899_v60 = vcombine.low %v173_v48, %v181_v49 }
  0x5a   :  { %v9963_v56 = vld [vmem:[%s10162_s0 + $0x4] ss:$16 sps:$4 sm:$0xff]   ;;  %v7914_v61 = vcombine.high %v188_v54, %v196_v55  ;;  %v7916_v62 = vcombine.high %v189_v57, %v197_v58  ;;  %v205_v1 = vld [vmem:[#allocation2 + $0x408] sm:$0xff]  ;;  %v7913_v3 = vcombine.low %v188_v54, %v196_v55  ;;  %v7915_v4 = vcombine.low %v189_v57, %v197_v58 }
  0x5b   :  { %3259 = vmatpush1.bf16.msra.mxu0 %v7849_v34  ;;  %3345 = vmatpush1.bf16.msra.mxu1 %v7851_v35  ;;  %v204_v63 = vld [vmem:[#allocation2 + $0x400] sm:$0xff]  ;;  %v213_v2 = vld [vmem:[#allocation2 + $0x448] sm:$0xff] }
  0x5c   :  { %3260 = vmatprep.subr.bf16.mxu0 %v7866_v36  ;;  %3346 = vmatprep.subr.bf16.mxu1 %v7868_v37  ;;  %v212_v0 = vld [vmem:[#allocation2 + $0x440] sm:$0xff]  ;;  %v7932_v6 = vcombine.high %v205_v1, %v213_v2  ;;  %v221_v9 = vld [vmem:[#allocation2 + $0x488] sm:$0xff]  ;;  %v7931_v12 = vcombine.low %v205_v1, %v213_v2 }
  0x5d   :  { %3284 = vmatprep.mubr.bf16.mxu0 %v9963_v56  ;;  %3370 = vmatprep.mubr.bf16.mxu1 %v9963_v56  ;;  %v7930_v5 = vcombine.high %v204_v63, %v212_v0  ;;  %v220_v7 = vld [vmem:[#allocation2 + $0x480] sm:$0xff]  ;;  %v229_v10 = vld [vmem:[#allocation2 + $0x4c8] sm:$0xff]  ;;  %v7929_v11 = vcombine.low %v204_v63, %v212_v0 }
  0x5e   :  { %v228_v8 = vld [vmem:[#allocation2 + $0x4c0] sm:$0xff]  ;;  %v7948_v14 = vcombine.high %v221_v9, %v229_v10  ;;  %v237_v17 = vld [vmem:[#allocation2 + $0x508] sm:$0xff]  ;;  %v7947_v20 = vcombine.low %v221_v9, %v229_v10 }
  0x5f   :  { %3261 = vmatpush1.bf16.msra.mxu0 %v7865_v42  ;;  %3347 = vmatpush1.bf16.msra.mxu1 %v7867_v43  ;;  %v7946_v13 = vcombine.high %v220_v7, %v228_v8  ;;  %v236_v15 = vld [vmem:[#allocation2 + $0x500] sm:$0xff]  ;;  %v245_v18 = vld [vmem:[#allocation2 + $0x548] sm:$0xff]  ;;  %v7945_v19 = vcombine.low %v220_v7, %v228_v8 }
  0x60   :  { %3262 = vmatprep.subr.bf16.mxu0 %v7882_v44  ;;  %3348 = vmatprep.subr.bf16.mxu1 %v7884_v45  ;;  %v244_v16 = vld [vmem:[#allocation2 + $0x540] sm:$0xff]  ;;  %v7964_v22 = vcombine.high %v237_v17, %v245_v18  ;;  %v253_v25 = vld [vmem:[#allocation2 + $0x588] sm:$0xff]  ;;  %v7963_v28 = vcombine.low %v237_v17, %v245_v18 }
  0x61   :  { %v7962_v21 = vcombine.high %v236_v15, %v244_v16  ;;  %v252_v23 = vld [vmem:[#allocation2 + $0x580] sm:$0xff]  ;;  %v261_v26 = vld [vmem:[#allocation2 + $0x5c8] sm:$0xff]  ;;  %v7961_v27 = vcombine.low %v236_v15, %v244_v16 }
  0x62   :  { %v260_v24 = vld [vmem:[#allocation2 + $0x5c0] sm:$0xff]  ;;  %v7980_v30 = vcombine.high %v253_v25, %v261_v26  ;;  %v269_v33 = vld [vmem:[#allocation2 + $0x608] sm:$0xff]  ;;  %v7979_v36 = vcombine.low %v253_v25, %v261_v26 }
  0x63   :  { %3263 = vmatpush1.bf16.msra.mxu0 %v7881_v50  ;;  %3349 = vmatpush1.bf16.msra.mxu1 %v7883_v51  ;;  %v7978_v29 = vcombine.high %v252_v23, %v260_v24  ;;  %v268_v31 = vld [vmem:[#allocation2 + $0x600] sm:$0xff]  ;;  %v277_v34 = vld [vmem:[#allocation2 + $0x648] sm:$0xff]  ;;  %v7977_v35 = vcombine.low %v252_v23, %v260_v24 }
  0x64   :  { %3264 = vmatprep.subr.bf16.mxu0 %v7898_v52  ;;  %3350 = vmatprep.subr.bf16.mxu1 %v7900_v53  ;;  %v276_v32 = vld [vmem:[#allocation2 + $0x640] sm:$0xff]  ;;  %v7996_v38 = vcombine.high %v269_v33, %v277_v34  ;;  %v285_v41 = vld [vmem:[#allocation2 + $0x688] sm:$0xff]  ;;  %v7995_v44 = vcombine.low %v269_v33, %v277_v34 }
  0x65   :  { %v7994_v37 = vcombine.high %v268_v31, %v276_v32  ;;  %v284_v39 = vld [vmem:[#allocation2 + $0x680] sm:$0xff]  ;;  %v293_v42 = vld [vmem:[#allocation2 + $0x6c8] sm:$0xff]  ;;  %v7993_v43 = vcombine.low %v268_v31, %v276_v32 }
  0x66   :  { %v292_v40 = vld [vmem:[#allocation2 + $0x6c0] sm:$0xff]  ;;  %v8012_v46 = vcombine.high %v285_v41, %v293_v42  ;;  %v301_v49 = vld [vmem:[#allocation2 + $0x708] sm:$0xff]  ;;  %v8011_v52 = vcombine.low %v285_v41, %v293_v42 }
  0x67   :  { %3265 = vmatpush1.bf16.msra.mxu0 %v7897_v59  ;;  %3351 = vmatpush1.bf16.msra.mxu1 %v7899_v60  ;;  %v8010_v45 = vcombine.high %v284_v39, %v292_v40  ;;  %v300_v47 = vld [vmem:[#allocation2 + $0x700] sm:$0xff]  ;;  %v309_v50 = vld [vmem:[#allocation2 + $0x748] sm:$0xff]  ;;  %v8009_v51 = vcombine.low %v284_v39, %v292_v40 }
  0x68   :  { %3266 = vmatprep.subr.bf16.mxu0 %v7914_v61  ;;  %3352 = vmatprep.subr.bf16.mxu1 %v7916_v62  ;;  %v308_v48 = vld [vmem:[#allocation2 + $0x740] sm:$0xff]  ;;  %v8028_v54 = vcombine.high %v301_v49, %v309_v50  ;;  %v317_v58 = vld [vmem:[#allocation2 + $0x788] sm:$0xff]  ;;  %v8027_v61 = vcombine.low %v301_v49, %v309_v50 }
  0x69   :  { %v8026_v53 = vcombine.high %v300_v47, %v308_v48  ;;  %v316_v55 = vld [vmem:[#allocation2 + $0x780] sm:$0xff]  ;;  %v325_v59 = vld [vmem:[#allocation2 + $0x7c8] sm:$0xff]  ;;  %v8025_v60 = vcombine.low %v300_v47, %v308_v48 }
  0x6a   :  { %v324_v57 = vld [vmem:[#allocation2 + $0x7c0] sm:$0xff]  ;;  %v8044_v63 = vcombine.high %v317_v58, %v325_v59  ;;  %v333_v2 = vld [vmem:[#allocation2 + $0x808] sm:$0xff] }
  0x6b   :  { %3267 = vmatpush1.bf16.msra.mxu0 %v7913_v3  ;;  %3353 = vmatpush1.bf16.msra.mxu1 %v7915_v4  ;;  %v8042_v62 = vcombine.high %v316_v55, %v324_v57  ;;  %v332_v0 = vld [vmem:[#allocation2 + $0x800] sm:$0xff]  ;;  %v341_v3 = vld [vmem:[#allocation2 + $0x848] sm:$0xff]  ;;  %v8041_v4 = vcombine.low %v316_v55, %v324_v57 }
  0x6c   :  { %3268 = vmatprep.subr.bf16.mxu0 %v7930_v5  ;;  %3354 = vmatprep.subr.bf16.mxu1 %v7932_v6  ;;  %v340_v1 = vld [vmem:[#allocation2 + $0x840] sm:$0xff]  ;;  %v8043_v5 = vcombine.low %v317_v58, %v325_v59  ;;  %v8060_v7 = vcombine.high %v333_v2, %v341_v3 }
  0x6d   :  { %v8058_v6 = vcombine.high %v332_v0, %v340_v1  ;;  %v348_v8 = vld [vmem:[#allocation2 + $0x880] sm:$0xff] }
  0x6e   :  { %v356_v9 = vld [vmem:[#allocation2 + $0x8c0] sm:$0xff] }
  0x6f   :  { %3269 = vmatpush1.bf16.msra.mxu0 %v7929_v11  ;;  %3355 = vmatpush1.bf16.msra.mxu1 %v7931_v12  ;;  %v8966_v10 = vld [vmem:[%s10162_s0] ss:$16 sps:$4 sm:$0xff]   ;;  %v349_v11 = vld [vmem:[#allocation2 + $0x888] sm:$0xff]  ;;  %v8074_v15 = vcombine.high %v348_v8, %v356_v9 }
  0x70   :  { %3270 = vmatprep.subr.bf16.mxu0 %v7946_v13  ;;  %3356 = vmatprep.subr.bf16.mxu1 %v7948_v14  ;;  %v357_v12 = vld [vmem:[#allocation2 + $0x8c8] sm:$0xff]  ;;  %v8057_v13 = vcombine.low %v332_v0, %v340_v1  ;;  %v8059_v14 = vcombine.low %v333_v2, %v341_v3  ;;  %v364_v17 = vld [vmem:[#allocation2 + $0x900] sm:$0xff] }
  0x71   :  { %v8076_v16 = vcombine.high %v349_v11, %v357_v12  ;;  %v372_v18 = vld [vmem:[#allocation2 + $0x940] sm:$0xff]  ;;  %v8075_v23 = vcombine.low %v349_v11, %v357_v12  ;;  %v477_v12 = vld [vmem:[#allocation2 + $0xc88] sm:$0xff] }
  0x72   :  { %v8090_v24 = vcombine.high %v364_v17, %v372_v18  ;;  %v380_v25 = vld [vmem:[#allocation2 + $0x980] sm:$0xff] }
  0x73   :  { %3271 = vmatpush1.bf16.msra.mxu0 %v7945_v19  ;;  %3357 = vmatpush1.bf16.msra.mxu1 %v7947_v20  ;;  %v8967_v19 = vld [vmem:[%s10162_s0 + $0xc] ss:$16 sps:$4 sm:$0xff]   ;;  %v388_v26 = vld [vmem:[#allocation2 + $0x9c0] sm:$0xff] }
  0x74   :  { %3272 = vmatprep.subr.bf16.mxu0 %v7962_v21  ;;  %3358 = vmatprep.subr.bf16.mxu1 %v7964_v22  ;;  %v365_v20 = vld [vmem:[#allocation2 + $0x908] sm:$0xff]  ;;  %v8073_v22 = vcombine.low %v348_v8, %v356_v9  ;;  %v8106_v32 = vcombine.high %v380_v25, %v388_v26  ;;  %v396_v33 = vld [vmem:[#allocation2 + $0xa00] sm:$0xff] }
  0x75   :  { %v373_v21 = vld [vmem:[#allocation2 + $0x948] sm:$0xff]  ;;  %v404_v34 = vld [vmem:[#allocation2 + $0xa40] sm:$0xff] }
  0x76   :  { %v8091_v31 = vcombine.low %v365_v20, %v373_v21  ;;  %v8122_v40 = vcombine.high %v396_v33, %v404_v34  ;;  %v412_v41 = vld [vmem:[#allocation2 + $0xa80] sm:$0xff] }
  0x77   :  { %3273 = vmatpush1.bf16.msra.mxu0 %v7961_v27  ;;  %3359 = vmatpush1.bf16.msra.mxu1 %v7963_v28  ;;  %v381_v27 = vld [vmem:[#allocation2 + $0x988] sm:$0xff]  ;;  %v8092_v28 = vcombine.high %v365_v20, %v373_v21  ;;  %v420_v42 = vld [vmem:[#allocation2 + $0xac0] sm:$0xff] }
  0x78   :  { %3274 = vmatprep.subr.bf16.mxu0 %v7978_v29  ;;  %3360 = vmatprep.subr.bf16.mxu1 %v7980_v30  ;;  %v389_v29 = vld [vmem:[#allocation2 + $0x9c8] sm:$0xff]  ;;  %v8089_v30 = vcombine.low %v364_v17, %v372_v18  ;;  %v8138_v48 = vcombine.high %v412_v41, %v420_v42  ;;  %v428_v49 = vld [vmem:[#allocation2 + $0xb00] sm:$0xff] }
  0x79   :  { %v8107_v39 = vcombine.low %v381_v27, %v389_v29  ;;  %v436_v50 = vld [vmem:[#allocation2 + $0xb40] sm:$0xff]  ;;  %v493_v20 = vld [vmem:[#allocation2 + $0xd08] sm:$0xff] }
  0x7a   :  { %v8154_v57 = vcombine.high %v428_v49, %v436_v50  ;;  %v444_v58 = vld [vmem:[#allocation2 + $0xb80] sm:$0xff] }
  0x7b   :  { %3275 = vmatpush1.bf16.msra.mxu0 %v7977_v35  ;;  %3361 = vmatpush1.bf16.msra.mxu1 %v7979_v36  ;;  %v397_v35 = vld [vmem:[#allocation2 + $0xa08] sm:$0xff]  ;;  %v8108_v36 = vcombine.high %v381_v27, %v389_v29  ;;  %v452_v59 = vld [vmem:[#allocation2 + $0xbc0] sm:$0xff] }
  0x7c   :  { %3276 = vmatprep.subr.bf16.mxu0 %v7994_v37  ;;  %3362 = vmatprep.subr.bf16.mxu1 %v7996_v38  ;;  %v405_v37 = vld [vmem:[#allocation2 + $0xa48] sm:$0xff]  ;;  %v8105_v38 = vcombine.low %v380_v25, %v388_v26  ;;  %v8170_v1 = vcombine.high %v444_v58, %v452_v59  ;;  %v460_v2 = vld [vmem:[#allocation2 + $0xc00] sm:$0xff] }
  0x7d   :  { %v8123_v47 = vcombine.low %v397_v35, %v405_v37  ;;  %v468_v3 = vld [vmem:[#allocation2 + $0xc40] sm:$0xff] }
  0x7e   :  { %v8186_v9 = vcombine.high %v460_v2, %v468_v3  ;;  %v484_v11 = vld [vmem:[#allocation2 + $0xcc0] sm:$0xff] }
  0x7f   :  { %3277 = vmatpush1.bf16.msra.mxu0 %v7993_v43  ;;  %3363 = vmatpush1.bf16.msra.mxu1 %v7995_v44  ;;  %v413_v43 = vld [vmem:[#allocation2 + $0xa88] sm:$0xff]  ;;  %v8124_v44 = vcombine.high %v397_v35, %v405_v37  ;;  %v492_v18 = vld [vmem:[#allocation2 + $0xd00] sm:$0xff] }
  0x80   :  { %3278 = vmatprep.subr.bf16.mxu0 %v8010_v45  ;;  %3364 = vmatprep.subr.bf16.mxu1 %v8012_v46  ;;  %v421_v45 = vld [vmem:[#allocation2 + $0xac8] sm:$0xff]  ;;  %v8121_v46 = vcombine.low %v396_v33, %v404_v34  ;;  %v508_v26 = vld [vmem:[#allocation2 + $0xd80] sm:$0xff] }
  0x81   :  { %v8139_v55 = vcombine.low %v413_v43, %v421_v45  ;;  %v516_v27 = vld [vmem:[#allocation2 + $0xdc0] sm:$0xff] }
  0x82   :  { %v8234_v33 = vcombine.high %v508_v26, %v516_v27  ;;  %v524_v34 = vld [vmem:[#allocation2 + $0xe00] sm:$0xff] }
  0x83   :  { %3279 = vmatpush1.bf16.msra.mxu0 %v8009_v51  ;;  %3365 = vmatpush1.bf16.msra.mxu1 %v8011_v52  ;;  %v429_v51 = vld [vmem:[#allocation2 + $0xb08] sm:$0xff]  ;;  %v8140_v52 = vcombine.high %v413_v43, %v421_v45  ;;  %v532_v35 = vld [vmem:[#allocation2 + $0xe40] sm:$0xff] }
  0x84   :  { %3280 = vmatprep.subr.bf16.mxu0 %v8026_v53  ;;  %3366 = vmatprep.subr.bf16.mxu1 %v8028_v54  ;;  %v437_v53 = vld [vmem:[#allocation2 + $0xb48] sm:$0xff]  ;;  %v8137_v54 = vcombine.low %v412_v41, %v420_v42  ;;  %v8250_v41 = vcombine.high %v524_v34, %v532_v35  ;;  %v540_v42 = vld [vmem:[#allocation2 + $0xe80] sm:$0xff] }
  0x85   :  { %v8155_v0 = vcombine.low %v429_v51, %v437_v53  ;;  %v548_v43 = vld [vmem:[#allocation2 + $0xec0] sm:$0xff] }
  0x87   :  { %3281 = vmatpush1.bf16.msra.mxu0 %v8025_v60  ;;  %3367 = vmatpush1.bf16.msra.mxu1 %v8027_v61  ;;  %v445_v60 = vld [vmem:[#allocation2 + $0xb88] sm:$0xff]  ;;  %v8156_v61 = vcombine.high %v429_v51, %v437_v53  ;;  %v564_v51 = vld [vmem:[#allocation2 + $0xf40] sm:$0xff] }
  0x88   :  { %3282 = vmatprep.subr.bf16.mxu0 %v8042_v62  ;;  %3368 = vmatprep.subr.bf16.mxu1 %v8044_v63  ;;  %v453_v62 = vld [vmem:[#allocation2 + $0xbc8] sm:$0xff]  ;;  %v8153_v63 = vcombine.low %v428_v49, %v436_v50  ;;  %v8266_v49 = vcombine.high %v540_v42, %v548_v43  ;;  %v556_v50 = vld [vmem:[#allocation2 + $0xf00] sm:$0xff] }
  0x89   :  { %v8171_v8 = vcombine.low %v445_v60, %v453_v62 }
  0x8b   :  { %3283 = vmatpush1.bf16.msra.mxu0 %v8041_v4  ;;  %3369 = vmatpush1.bf16.msra.mxu1 %v8043_v5  ;;  %v461_v4 = vld [vmem:[#allocation2 + $0xc08] sm:$0xff]  ;;  %v8172_v5 = vcombine.high %v445_v60, %v453_v62  ;;  %v580_v60 = vld [vmem:[#allocation2 + $0xfc0] sm:$0xff] }
  0x8c   :  { %3295 = vmatprep.subr.bf16.mxu0 %v8058_v6  ;;  %3381 = vmatprep.subr.bf16.mxu1 %v8060_v7  ;;  %v469_v6 = vld [vmem:[#allocation2 + $0xc48] sm:$0xff]  ;;  %v8169_v7 = vcombine.low %v444_v58, %v452_v59  ;;  %v8282_v58 = vcombine.high %v556_v50, %v564_v51  ;;  %v572_v59 = vld [vmem:[#allocation2 + $0xf80] sm:$0xff] }
  0x8e   :  { %3285 = vmatmul.mubr.bf16.vlgmr.msra.gmra.mrb[0].mxu0 %v8966_v10  ;;  %3371 = vmatmul.mubr.bf16.vlgmr.msra.gmra.mrb[0].mxu1 %v8966_v10  ;;  %v476_v10 = vld [vmem:[#allocation2 + $0xc80] sm:$0xff] }
  0x8f   :  { %3296 = vmatpush1.bf16.msra.mxu0 %v8057_v13  ;;  %3382 = vmatpush1.bf16.msra.mxu1 %v8059_v14  ;;  %v8188_v13 = vcombine.high %v461_v4, %v469_v6  ;;  %v485_v14 = vld [vmem:[#allocation2 + $0xcc8] sm:$0xff]  ;;  %v8202_v17 = vcombine.high %v476_v10, %v484_v11 }
  0x90   :  { %3297 = vmatprep.subr.bf16.mxu0 %v8074_v15  ;;  %3383 = vmatprep.subr.bf16.mxu1 %v8076_v16  ;;  %v8185_v15 = vcombine.low %v460_v2, %v468_v3  ;;  %v8187_v16 = vcombine.low %v461_v4, %v469_v6  ;;  %v8204_v21 = vcombine.high %v477_v12, %v485_v14  ;;  %v78_v3 = vld [vmem:[#allocation2 + $0x10] sm:$0xff] }
  0x91   :  { %3327 = vmatprep.mubr.bf16.mxu0 %v8967_v19  ;;  %3413 = vmatprep.mubr.bf16.mxu1 %v8967_v19  ;;  %v500_v19 = vld [vmem:[#allocation2 + $0xd40] sm:$0xff]  ;;  %v8298_v2 = vcombine.high %v572_v59, %v580_v60  ;;  %v86_v4 = vld [vmem:[#allocation2 + $0x50] sm:$0xff] }
  0x92   :  { %v8218_v25 = vcombine.high %v492_v18, %v500_v19 }
  0x93   :  { %3298 = vmatpush1.bf16.msra.mxu0 %v8073_v22  ;;  %3384 = vmatpush1.bf16.msra.mxu1 %v8075_v23  ;;  %v501_v22 = vld [vmem:[#allocation2 + $0xd48] sm:$0xff]  ;;  %v8201_v23 = vcombine.low %v476_v10, %v484_v11  ;;  %v7806_v11 = vcombine.high %v78_v3, %v86_v4 }
  0x94   :  { %3299 = vmatprep.subr.bf16.mxu0 %v8090_v24  ;;  %3385 = vmatprep.subr.bf16.mxu1 %v8092_v28  ;;  %v8203_v24 = vcombine.low %v477_v12, %v485_v14  ;;  %v509_v28 = vld [vmem:[#allocation2 + $0xd88] sm:$0xff]  ;;  %v8220_v29 = vcombine.high %v493_v20, %v501_v22  ;;  %v94_v12 = vld [vmem:[#allocation2 + $0x90] sm:$0xff]  ;;  %v95_v14 = vld [vmem:[#allocation2 + $0x98] sm:$0xff] }
  0x95   :  { %v8969_v10 = vld [vmem:[%s10162_s0 + $0x8] ss:$16 sps:$4 sm:$0xff]  }
  0x97   :  { %3300 = vmatpush1.bf16.msra.mxu0 %v8089_v30  ;;  %3386 = vmatpush1.bf16.msra.mxu1 %v8091_v31  ;;  %v517_v30 = vld [vmem:[#allocation2 + $0xdc8] sm:$0xff]  ;;  %v8217_v31 = vcombine.low %v492_v18, %v500_v19 }
  0x98   :  { %3301 = vmatprep.subr.bf16.mxu0 %v8106_v32  ;;  %3387 = vmatprep.subr.bf16.mxu1 %v8108_v36  ;;  %v8219_v32 = vcombine.low %v493_v20, %v501_v22  ;;  %v525_v36 = vld [vmem:[#allocation2 + $0xe08] sm:$0xff]  ;;  %v8236_v37 = vcombine.high %v509_v28, %v517_v30  ;;  %v110_v20 = vld [vmem:[#allocation2 + $0x110] sm:$0xff]  ;;  %v111_v22 = vld [vmem:[#allocation2 + $0x118] sm:$0xff] }
  0x9b   :  { %3302 = vmatpush1.bf16.msra.mxu0 %v8105_v38  ;;  %3388 = vmatpush1.bf16.msra.mxu1 %v8107_v39  ;;  %v533_v38 = vld [vmem:[#allocation2 + $0xe48] sm:$0xff]  ;;  %v8233_v39 = vcombine.low %v508_v26, %v516_v27 }
  0x9c   :  { %3303 = vmatprep.subr.bf16.mxu0 %v8122_v40  ;;  %3389 = vmatprep.subr.bf16.mxu1 %v8124_v44  ;;  %v8235_v40 = vcombine.low %v509_v28, %v517_v30  ;;  %v541_v44 = vld [vmem:[#allocation2 + $0xe88] sm:$0xff]  ;;  %v8252_v45 = vcombine.high %v525_v36, %v533_v38  ;;  %v126_v28 = vld [vmem:[#allocation2 + $0x190] sm:$0xff]  ;;  %v127_v30 = vld [vmem:[#allocation2 + $0x198] sm:$0xff] }
  0x9f   :  { %3304 = vmatpush1.bf16.msra.mxu0 %v8121_v46  ;;  %3390 = vmatpush1.bf16.msra.mxu1 %v8123_v47  ;;  %v549_v46 = vld [vmem:[#allocation2 + $0xec8] sm:$0xff]  ;;  %v8249_v47 = vcombine.low %v524_v34, %v532_v35 }
  0xa0   :  { %3305 = vmatprep.subr.bf16.mxu0 %v8138_v48  ;;  %3391 = vmatprep.subr.bf16.mxu1 %v8140_v52  ;;  %v8251_v48 = vcombine.low %v525_v36, %v533_v38  ;;  %v557_v52 = vld [vmem:[#allocation2 + $0xf08] sm:$0xff]  ;;  %v8268_v53 = vcombine.high %v541_v44, %v549_v46  ;;  %v142_v36 = vld [vmem:[#allocation2 + $0x210] sm:$0xff]  ;;  %v143_v38 = vld [vmem:[#allocation2 + $0x218] sm:$0xff] }
  0xa3   :  { %3306 = vmatpush1.bf16.msra.mxu0 %v8137_v54  ;;  %3392 = vmatpush1.bf16.msra.mxu1 %v8139_v55  ;;  %v565_v54 = vld [vmem:[#allocation2 + $0xf48] sm:$0xff]  ;;  %v8265_v55 = vcombine.low %v540_v42, %v548_v43 }
  0xa4   :  { %3307 = vmatprep.subr.bf16.mxu0 %v8154_v57  ;;  %3393 = vmatprep.subr.bf16.mxu1 %v8156_v61  ;;  %v8267_v57 = vcombine.low %v541_v44, %v549_v46  ;;  %v573_v61 = vld [vmem:[#allocation2 + $0xf88] sm:$0xff]  ;;  %v8284_v62 = vcombine.high %v557_v52, %v565_v54  ;;  %v158_v44 = vld [vmem:[#allocation2 + $0x290] sm:$0xff] }
  0xa7   :  { %3308 = vmatpush1.bf16.msra.mxu0 %v8153_v63  ;;  %3394 = vmatpush1.bf16.msra.mxu1 %v8155_v0  ;;  %v581_v63 = vld [vmem:[#allocation2 + $0xfc8] sm:$0xff]  ;;  %v8281_v0 = vcombine.low %v556_v50, %v564_v51  ;;  %v174_v51 = vld [vmem:[#allocation2 + $0x310] sm:$0xff] }
  0xa8   :  { %3309 = vmatprep.subr.bf16.mxu0 %v8170_v1  ;;  %3395 = vmatprep.subr.bf16.mxu1 %v8172_v5  ;;  %v8283_v1 = vcombine.low %v557_v52, %v565_v54  ;;  %v79_v5 = vld [vmem:[#allocation2 + $0x18] sm:$0xff]  ;;  %v8300_v6 = vcombine.high %v573_v61, %v581_v63  ;;  %v182_v52 = vld [vmem:[#allocation2 + $0x350] sm:$0xff] }
  0xab   :  { %3310 = vmatpush1.bf16.msra.mxu0 %v8169_v7  ;;  %3396 = vmatpush1.bf16.msra.mxu1 %v8171_v8  ;;  %v87_v7 = vld [vmem:[#allocation2 + $0x58] sm:$0xff]  ;;  %v8297_v8 = vcombine.low %v572_v59, %v580_v60  ;;  %v7902_v59 = vcombine.high %v174_v51, %v182_v52  ;;  %v190_v60 = vld [vmem:[#allocation2 + $0x390] sm:$0xff] }
  0xac   :  { %3311 = vmatprep.subr.bf16.mxu0 %v8186_v9  ;;  %3397 = vmatprep.subr.bf16.mxu1 %v8188_v13  ;;  %v8299_v9 = vcombine.low %v573_v61, %v581_v63  ;;  %v102_v13 = vld [vmem:[#allocation2 + $0xd0] sm:$0xff]  ;;  %v7807_v18 = vcombine.low %v79_v5, %v87_v7 }
  0xad   :  { %v7822_v19 = vcombine.high %v94_v12, %v102_v13  ;;  %v198_v61 = vld [vmem:[#allocation2 + $0x3d0] sm:$0xff] }
  0xaf   :  { %3312 = vmatpush1.bf16.msra.mxu0 %v8185_v15  ;;  %3398 = vmatpush1.bf16.msra.mxu1 %v8187_v16  ;;  %v7808_v15 = vcombine.high %v79_v5, %v87_v7  ;;  %v103_v16 = vld [vmem:[#allocation2 + $0xd8] sm:$0xff]  ;;  %v214_v5 = vld [vmem:[#allocation2 + $0x450] sm:$0xff] }
  0xb0   :  { %3313 = vmatprep.subr.bf16.mxu0 %v8202_v17  ;;  %3399 = vmatprep.subr.bf16.mxu1 %v8204_v21  ;;  %v7805_v17 = vcombine.low %v78_v3, %v86_v4  ;;  %v118_v21 = vld [vmem:[#allocation2 + $0x150] sm:$0xff]  ;;  %v7823_v26 = vcombine.low %v95_v14, %v103_v16  ;;  %v7918_v3 = vcombine.high %v190_v60, %v198_v61 }
  0xb1   :  { %v7838_v27 = vcombine.high %v110_v20, %v118_v21  ;;  %v206_v4 = vld [vmem:[#allocation2 + $0x410] sm:$0xff] }
  0xb3   :  { %3314 = vmatpush1.bf16.msra.mxu0 %v8201_v23  ;;  %3400 = vmatpush1.bf16.msra.mxu1 %v8203_v24  ;;  %v7824_v23 = vcombine.high %v95_v14, %v103_v16  ;;  %v119_v24 = vld [vmem:[#allocation2 + $0x158] sm:$0xff] }
  0xb4   :  { %3315 = vmatprep.subr.bf16.mxu0 %v8218_v25  ;;  %3401 = vmatprep.subr.bf16.mxu1 %v8220_v29  ;;  %v7821_v25 = vcombine.low %v94_v12, %v102_v13  ;;  %v134_v29 = vld [vmem:[#allocation2 + $0x1d0] sm:$0xff]  ;;  %v7839_v34 = vcombine.low %v111_v22, %v119_v24  ;;  %v223_v14 = vld [vmem:[#allocation2 + $0x498] sm:$0xff] }
  0xb5   :  { %v7854_v35 = vcombine.high %v126_v28, %v134_v29  ;;  %v222_v12 = vld [vmem:[#allocation2 + $0x490] sm:$0xff]  ;;  %v231_v16 = vld [vmem:[#allocation2 + $0x4d8] sm:$0xff] }
  0xb6   :  { %v230_v13 = vld [vmem:[#allocation2 + $0x4d0] sm:$0xff] }
  0xb7   :  { %3316 = vmatpush1.bf16.msra.mxu0 %v8217_v31  ;;  %3402 = vmatpush1.bf16.msra.mxu1 %v8219_v32  ;;  %v7840_v31 = vcombine.high %v111_v22, %v119_v24  ;;  %v135_v32 = vld [vmem:[#allocation2 + $0x1d8] sm:$0xff] }
  0xb8   :  { %3317 = vmatprep.subr.bf16.mxu0 %v8234_v33  ;;  %3403 = vmatprep.subr.bf16.mxu1 %v8236_v37  ;;  %v7837_v33 = vcombine.low %v110_v20, %v118_v21  ;;  %v150_v37 = vld [vmem:[#allocation2 + $0x250] sm:$0xff]  ;;  %v7855_v42 = vcombine.low %v127_v30, %v135_v32  ;;  %v239_v22 = vld [vmem:[#allocation2 + $0x518] sm:$0xff] }
  0xb9   :  { %v7870_v43 = vcombine.high %v142_v36, %v150_v37  ;;  %v238_v20 = vld [vmem:[#allocation2 + $0x510] sm:$0xff]  ;;  %v247_v24 = vld [vmem:[#allocation2 + $0x558] sm:$0xff] }
  0xba   :  { %v246_v21 = vld [vmem:[#allocation2 + $0x550] sm:$0xff] }
  0xbb   :  { %3318 = vmatpush1.bf16.msra.mxu0 %v8233_v39  ;;  %3404 = vmatpush1.bf16.msra.mxu1 %v8235_v40  ;;  %v7856_v39 = vcombine.high %v127_v30, %v135_v32  ;;  %v151_v40 = vld [vmem:[#allocation2 + $0x258] sm:$0xff] }
  0xbc   :  { %3319 = vmatprep.subr.bf16.mxu0 %v8250_v41  ;;  %3405 = vmatprep.subr.bf16.mxu1 %v8252_v45  ;;  %v7853_v41 = vcombine.low %v126_v28, %v134_v29  ;;  %v159_v45 = vld [vmem:[#allocation2 + $0x298] sm:$0xff]  ;;  %v7872_v46 = vcombine.high %v143_v38, %v151_v40  ;;  %v254_v28 = vld [vmem:[#allocation2 + $0x590] sm:$0xff] }
  0xbd   :  { %v262_v29 = vld [vmem:[#allocation2 + $0x5d0] sm:$0xff]  ;;  %v255_v30 = vld [vmem:[#allocation2 + $0x598] sm:$0xff] }
  0xbe   :  { %v263_v32 = vld [vmem:[#allocation2 + $0x5d8] sm:$0xff] }
  0xbf   :  { %3320 = vmatpush1.bf16.msra.mxu0 %v8249_v47  ;;  %3406 = vmatpush1.bf16.msra.mxu1 %v8251_v48  ;;  %v167_v47 = vld [vmem:[#allocation2 + $0x2d8] sm:$0xff]  ;;  %v7869_v48 = vcombine.low %v142_v36, %v150_v37  ;;  %v270_v36 = vld [vmem:[#allocation2 + $0x610] sm:$0xff] }
  0xc0   :  { %3321 = vmatprep.subr.bf16.mxu0 %v8266_v49  ;;  %3407 = vmatprep.subr.bf16.mxu1 %v8268_v53  ;;  %v7871_v49 = vcombine.low %v143_v38, %v151_v40  ;;  %v175_v53 = vld [vmem:[#allocation2 + $0x318] sm:$0xff]  ;;  %v7888_v54 = vcombine.high %v159_v45, %v167_v47  ;;  %v278_v37 = vld [vmem:[#allocation2 + $0x650] sm:$0xff] }
  0xc1   :  { %v271_v38 = vld [vmem:[#allocation2 + $0x618] sm:$0xff] }
  0xc2   :  { %v279_v40 = vld [vmem:[#allocation2 + $0x658] sm:$0xff] }
  0xc3   :  { %3322 = vmatpush1.bf16.msra.mxu0 %v8265_v55  ;;  %3408 = vmatpush1.bf16.msra.mxu1 %v8267_v57  ;;  %v183_v55 = vld [vmem:[#allocation2 + $0x358] sm:$0xff] }
  0xc4   :  { %3323 = vmatprep.subr.bf16.mxu0 %v8282_v58  ;;  %3409 = vmatprep.subr.bf16.mxu1 %v8284_v62  ;;  %v7887_v58 = vcombine.low %v159_v45, %v167_v47  ;;  %v191_v62 = vld [vmem:[#allocation2 + $0x398] sm:$0xff]  ;;  %v7904_v63 = vcombine.high %v175_v53, %v183_v55 }
  0xc5   :  { %v287_v45 = vld [vmem:[#allocation2 + $0x698] sm:$0xff] }
  0xc6   :  { %v295_v47 = vld [vmem:[#allocation2 + $0x6d8] sm:$0xff] }
  0xc7   :  { %3324 = vmatpush1.bf16.msra.mxu0 %v8281_v0  ;;  %3410 = vmatpush1.bf16.msra.mxu1 %v8283_v1  ;;  %v199_v0 = vld [vmem:[#allocation2 + $0x3d8] sm:$0xff]  ;;  %v7901_v1 = vcombine.low %v174_v51, %v182_v52  ;;  %v302_v51 = vld [vmem:[#allocation2 + $0x710] sm:$0xff] }
  0xc8   :  { %3325 = vmatprep.subr.bf16.mxu0 %v8298_v2  ;;  %3411 = vmatprep.subr.bf16.mxu1 %v8300_v6  ;;  %v7903_v2 = vcombine.low %v175_v53, %v183_v55  ;;  %v207_v6 = vld [vmem:[#allocation2 + $0x418] sm:$0xff]  ;;  %v7920_v7 = vcombine.high %v191_v62, %v199_v0  ;;  %v310_v52 = vld [vmem:[#allocation2 + $0x750] sm:$0xff] }
  0xc9   :  { %v303_v53 = vld [vmem:[#allocation2 + $0x718] sm:$0xff] }
  0xca   :  { %v311_v55 = vld [vmem:[#allocation2 + $0x758] sm:$0xff] }
  0xcb   :  { %3326 = vmatpush1.bf16.msra.mxu0 %v8297_v8  ;;  %3412 = vmatpush1.bf16.msra.mxu1 %v8299_v9  ;;  %v215_v8 = vld [vmem:[#allocation2 + $0x458] sm:$0xff]  ;;  %v7917_v9 = vcombine.low %v190_v60, %v198_v61  ;;  %v318_v60 = vld [vmem:[#allocation2 + $0x790] sm:$0xff] }
  0xcc   :  { %3424 = vmatprep.subr.bf16.mxu0 %v7806_v11  ;;  %3510 = vmatprep.subr.bf16.mxu1 %v7808_v15  ;;  %v7934_v11 = vcombine.high %v206_v4, %v214_v5  ;;  %v7936_v15 = vcombine.high %v207_v6, %v215_v8  ;;  %v326_v61 = vld [vmem:[#allocation2 + $0x7d0] sm:$0xff] }
  0xce   :  { %3328 = vmatmul.mubr.bf16.vlgmr.msra.gmra.mrb[0].mxu0 %v8969_v10  ;;  %3414 = vmatmul.mubr.bf16.vlgmr.msra.gmra.mrb[0].mxu1 %v8969_v10  ;;  %v7919_v10 = vcombine.low %v191_v62, %v199_v0  ;;  %v319_v62 = vld [vmem:[#allocation2 + $0x798] sm:$0xff] }
  0xcf   :  { %3425 = vmatpush1.bf16.msra.mxu0 %v7805_v17  ;;  %3511 = vmatpush1.bf16.msra.mxu1 %v7807_v18  ;;  %v7933_v17 = vcombine.low %v206_v4, %v214_v5  ;;  %v7935_v18 = vcombine.low %v207_v6, %v215_v8  ;;  %v327_v0 = vld [vmem:[#allocation2 + $0x7d8] sm:$0xff]  ;;  %v334_v4 = vld [vmem:[#allocation2 + $0x810] sm:$0xff] }
  0xd0   :  { %3426 = vmatprep.subr.bf16.mxu0 %v7822_v19  ;;  %3512 = vmatprep.subr.bf16.mxu1 %v7824_v23  ;;  %v7950_v19 = vcombine.high %v222_v12, %v230_v13  ;;  %v7952_v23 = vcombine.high %v223_v14, %v231_v16  ;;  %v342_v5 = vld [vmem:[#allocation2 + $0x850] sm:$0xff]  ;;  %v335_v6 = vld [vmem:[#allocation2 + $0x818] sm:$0xff] }
  0xd1   :  { %3456 = vmatprep.mubr.bf16.mxu0 %v9963_v56  ;;  %3542 = vmatprep.mubr.bf16.mxu1 %v9963_v56  ;;  %v166_v56 = vld [vmem:[#allocation2 + $0x2d0] sm:$0xff]  ;;  %v343_v8 = vld [vmem:[#allocation2 + $0x858] sm:$0xff] }
  0xd2   :  { %v7886_v50 = vcombine.high %v158_v44, %v166_v56  ;;  %v7885_v57 = vcombine.low %v158_v44, %v166_v56  ;;  %v286_v44 = vld [vmem:[#allocation2 + $0x690] sm:$0xff] }
  0xd3   :  { %3427 = vmatpush1.bf16.msra.mxu0 %v7821_v25  ;;  %3513 = vmatpush1.bf16.msra.mxu1 %v7823_v26  ;;  %v7949_v25 = vcombine.low %v222_v12, %v230_v13  ;;  %v7951_v26 = vcombine.low %v223_v14, %v231_v16  ;;  %v294_v56 = vld [vmem:[#allocation2 + $0x6d0] sm:$0xff]  ;;  %v351_v14 = vld [vmem:[#allocation2 + $0x898] sm:$0xff] }
  0xd4   :  { %3428 = vmatprep.subr.bf16.mxu0 %v7838_v27  ;;  %3514 = vmatprep.subr.bf16.mxu1 %v7840_v31  ;;  %v7966_v27 = vcombine.high %v238_v20, %v246_v21  ;;  %v7968_v31 = vcombine.high %v239_v22, %v247_v24  ;;  %v350_v12 = vld [vmem:[#allocation2 + $0x890] sm:$0xff]  ;;  %v359_v16 = vld [vmem:[#allocation2 + $0x8d8] sm:$0xff] }
  0xd5   :  { %v358_v13 = vld [vmem:[#allocation2 + $0x8d0] sm:$0xff] }
  0xd7   :  { %3429 = vmatpush1.bf16.msra.mxu0 %v7837_v33  ;;  %3515 = vmatpush1.bf16.msra.mxu1 %v7839_v34  ;;  %v7965_v33 = vcombine.low %v238_v20, %v246_v21  ;;  %v7967_v34 = vcombine.low %v239_v22, %v247_v24  ;;  %v366_v20 = vld [vmem:[#allocation2 + $0x910] sm:$0xff]  ;;  %v367_v22 = vld [vmem:[#allocation2 + $0x918] sm:$0xff] }
  0xd8   :  { %3430 = vmatprep.subr.bf16.mxu0 %v7854_v35  ;;  %3516 = vmatprep.subr.bf16.mxu1 %v7856_v39  ;;  %v7982_v35 = vcombine.high %v254_v28, %v262_v29  ;;  %v7984_v39 = vcombine.high %v255_v30, %v263_v32  ;;  %v374_v21 = vld [vmem:[#allocation2 + $0x950] sm:$0xff]  ;;  %v375_v24 = vld [vmem:[#allocation2 + $0x958] sm:$0xff] }
  0xdb   :  { %3431 = vmatpush1.bf16.msra.mxu0 %v7853_v41  ;;  %3517 = vmatpush1.bf16.msra.mxu1 %v7855_v42  ;;  %v7981_v41 = vcombine.low %v254_v28, %v262_v29  ;;  %v7983_v42 = vcombine.low %v255_v30, %v263_v32  ;;  %v8094_v28 = vcombine.high %v366_v20, %v374_v21  ;;  %v382_v29 = vld [vmem:[#allocation2 + $0x990] sm:$0xff] }
  0xdc   :  { %3432 = vmatprep.subr.bf16.mxu0 %v7870_v43  ;;  %3518 = vmatprep.subr.bf16.mxu1 %v7872_v46  ;;  %v7998_v43 = vcombine.high %v270_v36, %v278_v37  ;;  %v8000_v46 = vcombine.high %v271_v38, %v279_v40  ;;  %v390_v30 = vld [vmem:[#allocation2 + $0x9d0] sm:$0xff]  ;;  %v8096_v32 = vcombine.high %v367_v22, %v375_v24 }
  0xdf   :  { %3433 = vmatpush1.bf16.msra.mxu0 %v7869_v48  ;;  %3519 = vmatpush1.bf16.msra.mxu1 %v7871_v49  ;;  %v7997_v48 = vcombine.low %v270_v36, %v278_v37  ;;  %v7999_v49 = vcombine.low %v271_v38, %v279_v40  ;;  %v8095_v36 = vcombine.low %v367_v22, %v375_v24  ;;  %v398_v38 = vld [vmem:[#allocation2 + $0xa10] sm:$0xff]  ;;  %v399_v40 = vld [vmem:[#allocation2 + $0xa18] sm:$0xff] }
  0xe0   :  { %3434 = vmatprep.subr.bf16.mxu0 %v7886_v50  ;;  %3520 = vmatprep.subr.bf16.mxu1 %v7888_v54  ;;  %v8014_v50 = vcombine.high %v286_v44, %v294_v56  ;;  %v8016_v54 = vcombine.high %v287_v45, %v295_v47  ;;  %v8110_v37 = vcombine.high %v382_v29, %v390_v30  ;;  %v494_v22 = vld [vmem:[#allocation2 + $0xd10] sm:$0xff]  ;;  %v495_v24 = vld [vmem:[#allocation2 + $0xd18] sm:$0xff] }
  0xe3   :  { %3435 = vmatpush1.bf16.msra.mxu0 %v7885_v57  ;;  %3521 = vmatpush1.bf16.msra.mxu1 %v7887_v58  ;;  %v8013_v57 = vcombine.low %v286_v44, %v294_v56  ;;  %v8015_v58 = vcombine.low %v287_v45, %v295_v47  ;;  %v414_v45 = vld [vmem:[#allocation2 + $0xa90] sm:$0xff]  ;;  %v415_v47 = vld [vmem:[#allocation2 + $0xa98] sm:$0xff] }
  0xe4   :  { %3436 = vmatprep.subr.bf16.mxu0 %v7902_v59  ;;  %3522 = vmatprep.subr.bf16.mxu1 %v7904_v63  ;;  %v8030_v59 = vcombine.high %v302_v51, %v310_v52  ;;  %v8032_v63 = vcombine.high %v303_v53, %v311_v55 }
  0xe7   :  { %3437 = vmatpush1.bf16.msra.mxu0 %v7901_v1  ;;  %3523 = vmatpush1.bf16.msra.mxu1 %v7903_v2  ;;  %v8029_v1 = vcombine.low %v302_v51, %v310_v52  ;;  %v8031_v2 = vcombine.low %v303_v53, %v311_v55  ;;  %v430_v53 = vld [vmem:[#allocation2 + $0xb10] sm:$0xff]  ;;  %v431_v55 = vld [vmem:[#allocation2 + $0xb18] sm:$0xff] }
  0xe8   :  { %3438 = vmatprep.subr.bf16.mxu0 %v7918_v3  ;;  %3524 = vmatprep.subr.bf16.mxu1 %v7920_v7  ;;  %v8046_v3 = vcombine.high %v318_v60, %v326_v61  ;;  %v8048_v7 = vcombine.high %v319_v62, %v327_v0 }
  0xeb   :  { %3439 = vmatpush1.bf16.msra.mxu0 %v7917_v9  ;;  %3525 = vmatpush1.bf16.msra.mxu1 %v7919_v10  ;;  %v8045_v9 = vcombine.low %v318_v60, %v326_v61  ;;  %v8047_v10 = vcombine.low %v319_v62, %v327_v0  ;;  %v446_v62 = vld [vmem:[#allocation2 + $0xb90] sm:$0xff] }
  0xec   :  { %3440 = vmatprep.subr.bf16.mxu0 %v7934_v11  ;;  %3526 = vmatprep.subr.bf16.mxu1 %v7936_v15  ;;  %v8062_v11 = vcombine.high %v334_v4, %v342_v5  ;;  %v8064_v15 = vcombine.high %v335_v6, %v343_v8 }
  0xef   :  { %3441 = vmatpush1.bf16.msra.mxu0 %v7933_v17  ;;  %3527 = vmatpush1.bf16.msra.mxu1 %v7935_v18  ;;  %v8061_v17 = vcombine.low %v334_v4, %v342_v5  ;;  %v8063_v18 = vcombine.low %v335_v6, %v343_v8  ;;  %v462_v6 = vld [vmem:[#allocation2 + $0xc10] sm:$0xff]  ;;  %v463_v8 = vld [vmem:[#allocation2 + $0xc18] sm:$0xff] }
  0xf0   :  { %3442 = vmatprep.subr.bf16.mxu0 %v7950_v19  ;;  %3528 = vmatprep.subr.bf16.mxu1 %v7952_v23  ;;  %v8078_v19 = vcombine.high %v350_v12, %v358_v13  ;;  %v8080_v23 = vcombine.high %v351_v14, %v359_v16 }
  0xf3   :  { %3443 = vmatpush1.bf16.msra.mxu0 %v7949_v25  ;;  %3529 = vmatpush1.bf16.msra.mxu1 %v7951_v26  ;;  %v9738_v25 = vld [vmem:[%s10162_s0] ss:$16 sps:$4 sm:$0xff]   ;;  %v8077_v26 = vcombine.low %v350_v12, %v358_v13 }
  0xf4   :  { %3444 = vmatprep.subr.bf16.mxu0 %v7966_v27  ;;  %3530 = vmatprep.subr.bf16.mxu1 %v7968_v31  ;;  %v8079_v27 = vcombine.low %v351_v14, %v359_v16  ;;  %v383_v31 = vld [vmem:[#allocation2 + $0x998] sm:$0xff]  ;;  %v478_v14 = vld [vmem:[#allocation2 + $0xc90] sm:$0xff] }
  0xf5   :  { %v479_v16 = vld [vmem:[#allocation2 + $0xc98] sm:$0xff] }
  0xf7   :  { %3445 = vmatpush1.bf16.msra.mxu0 %v7965_v33  ;;  %3531 = vmatpush1.bf16.msra.mxu1 %v7967_v34  ;;  %v391_v33 = vld [vmem:[#allocation2 + $0x9d8] sm:$0xff] }
  0xf8   :  { %3446 = vmatprep.subr.bf16.mxu0 %v7982_v35  ;;  %3532 = vmatprep.subr.bf16.mxu1 %v7984_v39  ;;  %v9739_v34 = vld [vmem:[%s10162_s0 + $0xc] ss:$16 sps:$4 sm:$0xff]   ;;  %v8093_v35 = vcombine.low %v366_v20, %v374_v21  ;;  %v406_v39 = vld [vmem:[#allocation2 + $0xa50] sm:$0xff]  ;;  %v8111_v44 = vcombine.low %v383_v31, %v391_v33 }
  0xf9   :  { %v8126_v56 = vcombine.high %v398_v38, %v406_v39 }
  0xfb   :  { %3447 = vmatpush1.bf16.msra.mxu0 %v7981_v41  ;;  %3533 = vmatpush1.bf16.msra.mxu1 %v7983_v42  ;;  %v8112_v41 = vcombine.high %v383_v31, %v391_v33  ;;  %v407_v42 = vld [vmem:[#allocation2 + $0xa58] sm:$0xff]  ;;  %v518_v31 = vld [vmem:[#allocation2 + $0xdd0] sm:$0xff] }
  0xfc   :  { %3448 = vmatprep.subr.bf16.mxu0 %v7998_v43  ;;  %3534 = vmatprep.subr.bf16.mxu1 %v8000_v46  ;;  %v8109_v43 = vcombine.low %v382_v29, %v390_v30  ;;  %v422_v46 = vld [vmem:[#allocation2 + $0xad0] sm:$0xff]  ;;  %v8127_v51 = vcombine.low %v399_v40, %v407_v42 }
  0xfd   :  { %v8142_v52 = vcombine.high %v414_v45, %v422_v46  ;;  %v510_v30 = vld [vmem:[#allocation2 + $0xd90] sm:$0xff] }
  0xff   :  { %3449 = vmatpush1.bf16.msra.mxu0 %v7997_v48  ;;  %3535 = vmatpush1.bf16.msra.mxu1 %v7999_v49  ;;  %v8128_v48 = vcombine.high %v399_v40, %v407_v42  ;;  %v423_v49 = vld [vmem:[#allocation2 + $0xad8] sm:$0xff] }
 0x100   :  { %3450 = vmatprep.subr.bf16.mxu0 %v8014_v50  ;;  %3536 = vmatprep.subr.bf16.mxu1 %v8016_v54  ;;  %v8125_v50 = vcombine.low %v398_v38, %v406_v39  ;;  %v438_v54 = vld [vmem:[#allocation2 + $0xb50] sm:$0xff]  ;;  %v8143_v60 = vcombine.low %v415_v47, %v423_v49  ;;  %v527_v40 = vld [vmem:[#allocation2 + $0xe18] sm:$0xff] }
 0x101   :  { %v8158_v61 = vcombine.high %v430_v53, %v438_v54  ;;  %v526_v38 = vld [vmem:[#allocation2 + $0xe10] sm:$0xff]  ;;  %v535_v42 = vld [vmem:[#allocation2 + $0xe58] sm:$0xff] }
 0x102   :  { %v534_v39 = vld [vmem:[#allocation2 + $0xe50] sm:$0xff] }
 0x103   :  { %3451 = vmatpush1.bf16.msra.mxu0 %v8013_v57  ;;  %3537 = vmatpush1.bf16.msra.mxu1 %v8015_v58  ;;  %v8144_v57 = vcombine.high %v415_v47, %v423_v49  ;;  %v439_v58 = vld [vmem:[#allocation2 + $0xb58] sm:$0xff] }
 0x104   :  { %3452 = vmatprep.subr.bf16.mxu0 %v8030_v59  ;;  %3538 = vmatprep.subr.bf16.mxu1 %v8032_v63  ;;  %v8141_v59 = vcombine.low %v414_v45, %v422_v46  ;;  %v454_v63 = vld [vmem:[#allocation2 + $0xbd0] sm:$0xff]  ;;  %v8160_v0 = vcombine.high %v431_v55, %v439_v58  ;;  %v8159_v4 = vcombine.low %v431_v55, %v439_v58  ;;  %v543_v47 = vld [vmem:[#allocation2 + $0xe98] sm:$0xff] }
 0x105   :  { %v8174_v5 = vcombine.high %v446_v62, %v454_v63  ;;  %v542_v45 = vld [vmem:[#allocation2 + $0xe90] sm:$0xff]  ;;  %v551_v49 = vld [vmem:[#allocation2 + $0xed8] sm:$0xff] }
 0x106   :  { %v550_v46 = vld [vmem:[#allocation2 + $0xed0] sm:$0xff]  ;;  %v559_v55 = vld [vmem:[#allocation2 + $0xf18] sm:$0xff] }
 0x107   :  { %3453 = vmatpush1.bf16.msra.mxu0 %v8029_v1  ;;  %3539 = vmatpush1.bf16.msra.mxu1 %v8031_v2  ;;  %v447_v1 = vld [vmem:[#allocation2 + $0xb98] sm:$0xff] }
 0x108   :  { %3454 = vmatprep.subr.bf16.mxu0 %v8046_v3  ;;  %3540 = vmatprep.subr.bf16.mxu1 %v8048_v7  ;;  %v455_v2 = vld [vmem:[#allocation2 + $0xbd8] sm:$0xff]  ;;  %v8157_v3 = vcombine.low %v430_v53, %v438_v54  ;;  %v470_v7 = vld [vmem:[#allocation2 + $0xc50] sm:$0xff] }
 0x109   :  { %v8175_v12 = vcombine.low %v447_v1, %v455_v2  ;;  %v8190_v13 = vcombine.high %v462_v6, %v470_v7  ;;  %v558_v53 = vld [vmem:[#allocation2 + $0xf10] sm:$0xff]  ;;  %v567_v58 = vld [vmem:[#allocation2 + $0xf58] sm:$0xff] }
 0x10a   :  { %v566_v54 = vld [vmem:[#allocation2 + $0xf50] sm:$0xff] }
 0x10b   :  { %3455 = vmatpush1.bf16.msra.mxu0 %v8045_v9  ;;  %3541 = vmatpush1.bf16.msra.mxu1 %v8047_v10  ;;  %v8176_v9 = vcombine.high %v447_v1, %v455_v2  ;;  %v471_v10 = vld [vmem:[#allocation2 + $0xc58] sm:$0xff]  ;;  %v8288_v1 = vcombine.high %v559_v55, %v567_v58 }
 0x10c   :  { %3467 = vmatprep.subr.bf16.mxu0 %v8062_v11  ;;  %3553 = vmatprep.subr.bf16.mxu1 %v8064_v15  ;;  %v8173_v11 = vcombine.low %v446_v62, %v454_v63  ;;  %v486_v15 = vld [vmem:[#allocation2 + $0xcd0] sm:$0xff]  ;;  %v8191_v20 = vcombine.low %v463_v8, %v471_v10  ;;  %v583_v2 = vld [vmem:[#allocation2 + $0xfd8] sm:$0xff] }
 0x10d   :  { %v8206_v21 = vcombine.high %v478_v14, %v486_v15  ;;  %v574_v62 = vld [vmem:[#allocation2 + $0xf90] sm:$0xff] }
 0x10e   :  { %3457 = vmatmul.mubr.bf16.vlgmr.msra.gmra.mrb[4].mxu0 %v9738_v25  ;;  %3543 = vmatmul.mubr.bf16.vlgmr.msra.gmra.mrb[4].mxu1 %v9738_v25  ;;  %v582_v63 = vld [vmem:[#allocation2 + $0xfd0] sm:$0xff] }
 0x10f   :  { %3468 = vmatpush1.bf16.msra.mxu0 %v8061_v17  ;;  %3554 = vmatpush1.bf16.msra.mxu1 %v8063_v18  ;;  %v8192_v17 = vcombine.high %v463_v8, %v471_v10  ;;  %v487_v18 = vld [vmem:[#allocation2 + $0xcd8] sm:$0xff]  ;;  %v81_v8 = vld [vmem:[#allocation2 + $0x28] sm:$0xff] }
 0x110   :  { %3469 = vmatprep.subr.bf16.mxu0 %v8078_v19  ;;  %3555 = vmatprep.subr.bf16.mxu1 %v8080_v23  ;;  %v8189_v19 = vcombine.low %v462_v6, %v470_v7  ;;  %v502_v23 = vld [vmem:[#allocation2 + $0xd50] sm:$0xff]  ;;  %v8208_v25 = vcombine.high %v479_v16, %v487_v18  ;;  %v80_v6 = vld [vmem:[#allocation2 + $0x20] sm:$0xff]  ;;  %v89_v10 = vld [vmem:[#allocation2 + $0x68] sm:$0xff] }
 0x111   :  { %3499 = vmatprep.mubr.bf16.mxu0 %v9739_v34  ;;  %3585 = vmatprep.mubr.bf16.mxu1 %v9739_v34  ;;  %v8222_v29 = vcombine.high %v494_v22, %v502_v23  ;;  %v519_v34 = vld [vmem:[#allocation2 + $0xdd8] sm:$0xff]  ;;  %v88_v7 = vld [vmem:[#allocation2 + $0x60] sm:$0xff] }
 0x113   :  { %3470 = vmatpush1.bf16.msra.mxu0 %v8077_v26  ;;  %3556 = vmatpush1.bf16.msra.mxu1 %v8079_v27  ;;  %v503_v26 = vld [vmem:[#allocation2 + $0xd58] sm:$0xff]  ;;  %v8205_v27 = vcombine.low %v478_v14, %v486_v15  ;;  %v96_v14 = vld [vmem:[#allocation2 + $0xa0] sm:$0xff] }
 0x114   :  { %3471 = vmatprep.subr.bf16.mxu0 %v8094_v28  ;;  %3557 = vmatprep.subr.bf16.mxu1 %v8096_v32  ;;  %v8207_v28 = vcombine.low %v479_v16, %v487_v18  ;;  %v511_v32 = vld [vmem:[#allocation2 + $0xd98] sm:$0xff]  ;;  %v8224_v33 = vcombine.high %v495_v24, %v503_v26  ;;  %v104_v15 = vld [vmem:[#allocation2 + $0xe0] sm:$0xff]  ;;  %v97_v16 = vld [vmem:[#allocation2 + $0xa8] sm:$0xff] }
 0x115   :  { %v105_v18 = vld [vmem:[#allocation2 + $0xe8] sm:$0xff] }
 0x117   :  { %3472 = vmatpush1.bf16.msra.mxu0 %v8093_v35  ;;  %3558 = vmatpush1.bf16.msra.mxu1 %v8095_v36  ;;  %v8221_v35 = vcombine.low %v494_v22, %v502_v23  ;;  %v8223_v36 = vcombine.low %v495_v24, %v503_v26  ;;  %v112_v22 = vld [vmem:[#allocation2 + $0x120] sm:$0xff]  ;;  %v113_v24 = vld [vmem:[#allocation2 + $0x128] sm:$0xff] }
 0x118   :  { %3473 = vmatprep.subr.bf16.mxu0 %v8110_v37  ;;  %3559 = vmatprep.subr.bf16.mxu1 %v8112_v41  ;;  %v8238_v37 = vcombine.high %v510_v30, %v518_v31  ;;  %v8240_v41 = vcombine.high %v511_v32, %v519_v34  ;;  %v120_v23 = vld [vmem:[#allocation2 + $0x160] sm:$0xff]  ;;  %v121_v26 = vld [vmem:[#allocation2 + $0x168] sm:$0xff] }
 0x11b   :  { %3474 = vmatpush1.bf16.msra.mxu0 %v8109_v43  ;;  %3560 = vmatpush1.bf16.msra.mxu1 %v8111_v44  ;;  %v8237_v43 = vcombine.low %v510_v30, %v518_v31  ;;  %v8239_v44 = vcombine.low %v511_v32, %v519_v34  ;;  %v7842_v30 = vcombine.high %v112_v22, %v120_v23  ;;  %v128_v31 = vld [vmem:[#allocation2 + $0x1a0] sm:$0xff] }
 0x11c   :  { %3475 = vmatprep.subr.bf16.mxu0 %v8126_v56  ;;  %3561 = vmatprep.subr.bf16.mxu1 %v8128_v48  ;;  %v8254_v56 = vcombine.high %v526_v38, %v534_v39  ;;  %v8256_v48 = vcombine.high %v527_v40, %v535_v42  ;;  %v136_v32 = vld [vmem:[#allocation2 + $0x1e0] sm:$0xff]  ;;  %v7844_v34 = vcombine.high %v113_v24, %v121_v26 }
 0x11f   :  { %3476 = vmatpush1.bf16.msra.mxu0 %v8125_v50  ;;  %3562 = vmatpush1.bf16.msra.mxu1 %v8127_v51  ;;  %v8253_v50 = vcombine.low %v526_v38, %v534_v39  ;;  %v8255_v51 = vcombine.low %v527_v40, %v535_v42  ;;  %v7843_v38 = vcombine.low %v113_v24, %v121_v26  ;;  %v144_v40 = vld [vmem:[#allocation2 + $0x220] sm:$0xff]  ;;  %v145_v42 = vld [vmem:[#allocation2 + $0x228] sm:$0xff] }
 0x120   :  { %3477 = vmatprep.subr.bf16.mxu0 %v8142_v52  ;;  %3563 = vmatprep.subr.bf16.mxu1 %v8144_v57  ;;  %v8270_v52 = vcombine.high %v542_v45, %v550_v46  ;;  %v8272_v57 = vcombine.high %v543_v47, %v551_v49  ;;  %v7858_v39 = vcombine.high %v128_v31, %v136_v32  ;;  %v240_v24 = vld [vmem:[#allocation2 + $0x520] sm:$0xff]  ;;  %v241_v26 = vld [vmem:[#allocation2 + $0x528] sm:$0xff] }
 0x123   :  { %3478 = vmatpush1.bf16.msra.mxu0 %v8141_v59  ;;  %3564 = vmatpush1.bf16.msra.mxu1 %v8143_v60  ;;  %v8269_v59 = vcombine.low %v542_v45, %v550_v46  ;;  %v8271_v60 = vcombine.low %v543_v47, %v551_v49  ;;  %v160_v47 = vld [vmem:[#allocation2 + $0x2a0] sm:$0xff]  ;;  %v161_v49 = vld [vmem:[#allocation2 + $0x2a8] sm:$0xff] }
 0x124   :  { %3479 = vmatprep.subr.bf16.mxu0 %v8158_v61  ;;  %3565 = vmatprep.subr.bf16.mxu1 %v8160_v0  ;;  %v8286_v61 = vcombine.high %v558_v53, %v566_v54  ;;  %v575_v0 = vld [vmem:[#allocation2 + $0xf98] sm:$0xff] }
 0x127   :  { %3480 = vmatpush1.bf16.msra.mxu0 %v8157_v3  ;;  %3566 = vmatpush1.bf16.msra.mxu1 %v8159_v4  ;;  %v8285_v3 = vcombine.low %v558_v53, %v566_v54  ;;  %v8287_v4 = vcombine.low %v559_v55, %v567_v58  ;;  %v176_v55 = vld [vmem:[#allocation2 + $0x320] sm:$0xff]  ;;  %v177_v58 = vld [vmem:[#allocation2 + $0x328] sm:$0xff] }
 0x128   :  { %3481 = vmatprep.subr.bf16.mxu0 %v8174_v5  ;;  %3567 = vmatprep.subr.bf16.mxu1 %v8176_v9  ;;  %v8302_v5 = vcombine.high %v574_v62, %v582_v63  ;;  %v8304_v9 = vcombine.high %v575_v0, %v583_v2 }
 0x12b   :  { %3482 = vmatpush1.bf16.msra.mxu0 %v8173_v11  ;;  %3568 = vmatpush1.bf16.msra.mxu1 %v8175_v12  ;;  %v8301_v11 = vcombine.low %v574_v62, %v582_v63  ;;  %v8303_v12 = vcombine.low %v575_v0, %v583_v2  ;;  %v192_v0 = vld [vmem:[#allocation2 + $0x3a0] sm:$0xff]  ;;  %v193_v2 = vld [vmem:[#allocation2 + $0x3a8] sm:$0xff] }
 0x12c   :  { %3483 = vmatprep.subr.bf16.mxu0 %v8190_v13  ;;  %3569 = vmatprep.subr.bf16.mxu1 %v8192_v17  ;;  %v7810_v13 = vcombine.high %v80_v6, %v88_v7  ;;  %v7812_v17 = vcombine.high %v81_v8, %v89_v10 }
 0x12f   :  { %3484 = vmatpush1.bf16.msra.mxu0 %v8189_v19  ;;  %3570 = vmatpush1.bf16.msra.mxu1 %v8191_v20  ;;  %v7809_v19 = vcombine.low %v80_v6, %v88_v7  ;;  %v7811_v20 = vcombine.low %v81_v8, %v89_v10  ;;  %v208_v8 = vld [vmem:[#allocation2 + $0x420] sm:$0xff]  ;;  %v209_v10 = vld [vmem:[#allocation2 + $0x428] sm:$0xff] }
 0x130   :  { %3485 = vmatprep.subr.bf16.mxu0 %v8206_v21  ;;  %3571 = vmatprep.subr.bf16.mxu1 %v8208_v25  ;;  %v7826_v21 = vcombine.high %v96_v14, %v104_v15  ;;  %v7828_v25 = vcombine.high %v97_v16, %v105_v18 }
 0x133   :  { %3486 = vmatpush1.bf16.msra.mxu0 %v8205_v27  ;;  %3572 = vmatpush1.bf16.msra.mxu1 %v8207_v28  ;;  %v9740_v27 = vld [vmem:[%s10162_s0 + $0x8] ss:$16 sps:$4 sm:$0xff]   ;;  %v7825_v28 = vcombine.low %v96_v14, %v104_v15 }
 0x134   :  { %3487 = vmatprep.subr.bf16.mxu0 %v8222_v29  ;;  %3573 = vmatprep.subr.bf16.mxu1 %v8224_v33  ;;  %v7827_v29 = vcombine.low %v97_v16, %v105_v18  ;;  %v129_v33 = vld [vmem:[#allocation2 + $0x1a8] sm:$0xff]  ;;  %v224_v16 = vld [vmem:[#allocation2 + $0x4a0] sm:$0xff] }
 0x135   :  { %v225_v18 = vld [vmem:[#allocation2 + $0x4a8] sm:$0xff] }
 0x137   :  { %3488 = vmatpush1.bf16.msra.mxu0 %v8221_v35  ;;  %3574 = vmatpush1.bf16.msra.mxu1 %v8223_v36  ;;  %v137_v35 = vld [vmem:[#allocation2 + $0x1e8] sm:$0xff]  ;;  %v9741_v36 = vld [vmem:[%s10162_s0 + $0x4] ss:$16 sps:$4 sm:$0xff]  }
 0x138   :  { %3489 = vmatprep.subr.bf16.mxu0 %v8238_v37  ;;  %3575 = vmatprep.subr.bf16.mxu1 %v8240_v41  ;;  %v7841_v37 = vcombine.low %v112_v22, %v120_v23  ;;  %v152_v41 = vld [vmem:[#allocation2 + $0x260] sm:$0xff]  ;;  %v7859_v45 = vcombine.low %v129_v33, %v137_v35 }
 0x139   :  { %v7874_v46 = vcombine.high %v144_v40, %v152_v41 }
 0x13b   :  { %3490 = vmatpush1.bf16.msra.mxu0 %v8237_v43  ;;  %3576 = vmatpush1.bf16.msra.mxu1 %v8239_v44  ;;  %v7860_v43 = vcombine.high %v129_v33, %v137_v35  ;;  %v153_v44 = vld [vmem:[#allocation2 + $0x268] sm:$0xff]  ;;  %v264_v33 = vld [vmem:[#allocation2 + $0x5e0] sm:$0xff] }
 0x13c   :  { %3491 = vmatprep.subr.bf16.mxu0 %v8254_v56  ;;  %3577 = vmatprep.subr.bf16.mxu1 %v8256_v48  ;;  %v7857_v56 = vcombine.low %v128_v31, %v136_v32  ;;  %v168_v48 = vld [vmem:[#allocation2 + $0x2e0] sm:$0xff]  ;;  %v7875_v53 = vcombine.low %v145_v42, %v153_v44 }
 0x13d   :  { %v7890_v54 = vcombine.high %v160_v47, %v168_v48  ;;  %v256_v32 = vld [vmem:[#allocation2 + $0x5a0] sm:$0xff] }
 0x13f   :  { %3492 = vmatpush1.bf16.msra.mxu0 %v8253_v50  ;;  %3578 = vmatpush1.bf16.msra.mxu1 %v8255_v51  ;;  %v7876_v50 = vcombine.high %v145_v42, %v153_v44  ;;  %v169_v51 = vld [vmem:[#allocation2 + $0x2e8] sm:$0xff] }
 0x140   :  { %3493 = vmatprep.subr.bf16.mxu0 %v8270_v52  ;;  %3579 = vmatprep.subr.bf16.mxu1 %v8272_v57  ;;  %v7873_v52 = vcombine.low %v144_v40, %v152_v41  ;;  %v184_v57 = vld [vmem:[#allocation2 + $0x360] sm:$0xff]  ;;  %v7891_v62 = vcombine.low %v161_v49, %v169_v51  ;;  %v273_v42 = vld [vmem:[#allocation2 + $0x628] sm:$0xff] }
 0x141   :  { %v7906_v63 = vcombine.high %v176_v55, %v184_v57  ;;  %v272_v40 = vld [vmem:[#allocation2 + $0x620] sm:$0xff]  ;;  %v281_v44 = vld [vmem:[#allocation2 + $0x668] sm:$0xff] }
 0x142   :  { %v280_v41 = vld [vmem:[#allocation2 + $0x660] sm:$0xff] }
 0x143   :  { %3494 = vmatpush1.bf16.msra.mxu0 %v8269_v59  ;;  %3580 = vmatpush1.bf16.msra.mxu1 %v8271_v60  ;;  %v7892_v59 = vcombine.high %v161_v49, %v169_v51  ;;  %v185_v60 = vld [vmem:[#allocation2 + $0x368] sm:$0xff] }
 0x144   :  { %3495 = vmatprep.subr.bf16.mxu0 %v8286_v61  ;;  %3581 = vmatprep.subr.bf16.mxu1 %v8288_v1  ;;  %v7889_v61 = vcombine.low %v160_v47, %v168_v48  ;;  %v200_v1 = vld [vmem:[#allocation2 + $0x3e0] sm:$0xff]  ;;  %v7907_v6 = vcombine.low %v177_v58, %v185_v60  ;;  %v289_v49 = vld [vmem:[#allocation2 + $0x6a8] sm:$0xff] }
 0x145   :  { %v7922_v7 = vcombine.high %v192_v0, %v200_v1  ;;  %v288_v47 = vld [vmem:[#allocation2 + $0x6a0] sm:$0xff]  ;;  %v297_v51 = vld [vmem:[#allocation2 + $0x6e8] sm:$0xff] }
 0x146   :  { %v296_v48 = vld [vmem:[#allocation2 + $0x6e0] sm:$0xff] }
 0x147   :  { %3496 = vmatpush1.bf16.msra.mxu0 %v8285_v3  ;;  %3582 = vmatpush1.bf16.msra.mxu1 %v8287_v4  ;;  %v7908_v3 = vcombine.high %v177_v58, %v185_v60  ;;  %v201_v4 = vld [vmem:[#allocation2 + $0x3e8] sm:$0xff] }
 0x148   :  { %3497 = vmatprep.subr.bf16.mxu0 %v8302_v5  ;;  %3583 = vmatprep.subr.bf16.mxu1 %v8304_v9  ;;  %v7905_v5 = vcombine.low %v176_v55, %v184_v57  ;;  %v216_v9 = vld [vmem:[#allocation2 + $0x460] sm:$0xff]  ;;  %v7923_v14 = vcombine.low %v193_v2, %v201_v4  ;;  %v305_v58 = vld [vmem:[#allocation2 + $0x728] sm:$0xff] }
 0x149   :  { %v7938_v15 = vcombine.high %v208_v8, %v216_v9  ;;  %v304_v55 = vld [vmem:[#allocation2 + $0x720] sm:$0xff]  ;;  %v313_v60 = vld [vmem:[#allocation2 + $0x768] sm:$0xff] }
 0x14a   :  { %v312_v57 = vld [vmem:[#allocation2 + $0x760] sm:$0xff] }
 0x14b   :  { %3498 = vmatpush1.bf16.msra.mxu0 %v8301_v11  ;;  %3584 = vmatpush1.bf16.msra.mxu1 %v8303_v12  ;;  %v7924_v11 = vcombine.high %v193_v2, %v201_v4  ;;  %v217_v12 = vld [vmem:[#allocation2 + $0x468] sm:$0xff] }
 0x14c   :  { %3596 = vmatprep.subr.bf16.mxu0 %v7810_v13  ;;  %3682 = vmatprep.subr.bf16.mxu1 %v7812_v17  ;;  %v7921_v13 = vcombine.low %v192_v0, %v200_v1  ;;  %v232_v17 = vld [vmem:[#allocation2 + $0x4e0] sm:$0xff]  ;;  %v7939_v22 = vcombine.low %v209_v10, %v217_v12  ;;  %v321_v2 = vld [vmem:[#allocation2 + $0x7a8] sm:$0xff] }
 0x14d   :  { %v7954_v23 = vcombine.high %v224_v16, %v232_v17  ;;  %v320_v0 = vld [vmem:[#allocation2 + $0x7a0] sm:$0xff]  ;;  %v329_v4 = vld [vmem:[#allocation2 + $0x7e8] sm:$0xff] }
 0x14e   :  { %3500 = vmatmul.mubr.bf16.vlgmr.msra.gmra.mrb[4].mxu0 %v9740_v27  ;;  %3586 = vmatmul.mubr.bf16.vlgmr.msra.gmra.mrb[4].mxu1 %v9740_v27  ;;  %v328_v1 = vld [vmem:[#allocation2 + $0x7e0] sm:$0xff] }
 0x14f   :  { %3597 = vmatpush1.bf16.msra.mxu0 %v7809_v19  ;;  %3683 = vmatpush1.bf16.msra.mxu1 %v7811_v20  ;;  %v7940_v19 = vcombine.high %v209_v10, %v217_v12  ;;  %v233_v20 = vld [vmem:[#allocation2 + $0x4e8] sm:$0xff] }
 0x150   :  { %3598 = vmatprep.subr.bf16.mxu0 %v7826_v21  ;;  %3684 = vmatprep.subr.bf16.mxu1 %v7828_v25  ;;  %v7937_v21 = vcombine.low %v208_v8, %v216_v9  ;;  %v248_v25 = vld [vmem:[#allocation2 + $0x560] sm:$0xff]  ;;  %v7956_v27 = vcombine.high %v225_v18, %v233_v20  ;;  %v337_v10 = vld [vmem:[#allocation2 + $0x828] sm:$0xff] }
 0x151   :  { %3628 = vmatprep.mubr.bf16.mxu0 %v9741_v36  ;;  %3714 = vmatprep.mubr.bf16.mxu1 %v9741_v36  ;;  %v7970_v31 = vcombine.high %v240_v24, %v248_v25  ;;  %v265_v36 = vld [vmem:[#allocation2 + $0x5e8] sm:$0xff]  ;;  %v336_v8 = vld [vmem:[#allocation2 + $0x820] sm:$0xff] }
 0x152   :  { %v344_v9 = vld [vmem:[#allocation2 + $0x860] sm:$0xff]  ;;  %v345_v12 = vld [vmem:[#allocation2 + $0x868] sm:$0xff] }
 0x153   :  { %3599 = vmatpush1.bf16.msra.mxu0 %v7825_v28  ;;  %3685 = vmatpush1.bf16.msra.mxu1 %v7827_v29  ;;  %v249_v28 = vld [vmem:[#allocation2 + $0x568] sm:$0xff]  ;;  %v7953_v29 = vcombine.low %v224_v16, %v232_v17  ;;  %v352_v16 = vld [vmem:[#allocation2 + $0x8a0] sm:$0xff] }
 0x154   :  { %3600 = vmatprep.subr.bf16.mxu0 %v7842_v30  ;;  %3686 = vmatprep.subr.bf16.mxu1 %v7844_v34  ;;  %v7955_v30 = vcombine.low %v225_v18, %v233_v20  ;;  %v257_v34 = vld [vmem:[#allocation2 + $0x5a8] sm:$0xff]  ;;  %v7972_v35 = vcombine.high %v241_v26, %v249_v28  ;;  %v360_v17 = vld [vmem:[#allocation2 + $0x8e0] sm:$0xff] }
 0x155   :  { %v353_v18 = vld [vmem:[#allocation2 + $0x8a8] sm:$0xff] }
 0x156   :  { %v361_v20 = vld [vmem:[#allocation2 + $0x8e8] sm:$0xff] }
 0x157   :  { %3601 = vmatpush1.bf16.msra.mxu0 %v7841_v37  ;;  %3687 = vmatpush1.bf16.msra.mxu1 %v7843_v38  ;;  %v7969_v37 = vcombine.low %v240_v24, %v248_v25  ;;  %v7971_v38 = vcombine.low %v241_v26, %v249_v28  ;;  %v368_v24 = vld [vmem:[#allocation2 + $0x920] sm:$0xff]  ;;  %v369_v26 = vld [vmem:[#allocation2 + $0x928] sm:$0xff] }
 0x158   :  { %3602 = vmatprep.subr.bf16.mxu0 %v7858_v39  ;;  %3688 = vmatprep.subr.bf16.mxu1 %v7860_v43  ;;  %v7986_v39 = vcombine.high %v256_v32, %v264_v33  ;;  %v7988_v43 = vcombine.high %v257_v34, %v265_v36  ;;  %v376_v25 = vld [vmem:[#allocation2 + $0x960] sm:$0xff]  ;;  %v377_v28 = vld [vmem:[#allocation2 + $0x968] sm:$0xff] }
 0x15b   :  { %3603 = vmatpush1.bf16.msra.mxu0 %v7857_v56  ;;  %3689 = vmatpush1.bf16.msra.mxu1 %v7859_v45  ;;  %v7985_v56 = vcombine.low %v256_v32, %v264_v33  ;;  %v7987_v45 = vcombine.low %v257_v34, %v265_v36  ;;  %v8098_v32 = vcombine.high %v368_v24, %v376_v25  ;;  %v384_v34 = vld [vmem:[#allocation2 + $0x9a0] sm:$0xff]  ;;  %v10000_v36 = vld [vmem:[%s10162_s0 + $0xc] ss:$16 sps:$4 sm:$0xff]  }
 0x15c   :  { %3604 = vmatprep.subr.bf16.mxu0 %v7874_v46  ;;  %3690 = vmatprep.subr.bf16.mxu1 %v7876_v50  ;;  %v8002_v46 = vcombine.high %v272_v40, %v280_v41  ;;  %v8004_v50 = vcombine.high %v273_v42, %v281_v44  ;;  %v8100_v33 = vcombine.high %v369_v26, %v377_v28 }
 0x15f   :  { %3605 = vmatpush1.bf16.msra.mxu0 %v7873_v52  ;;  %3691 = vmatpush1.bf16.msra.mxu1 %v7875_v53  ;;  %v8001_v52 = vcombine.low %v272_v40, %v280_v41  ;;  %v8003_v53 = vcombine.low %v273_v42, %v281_v44  ;;  %v8097_v40 = vcombine.low %v368_v24, %v376_v25  ;;  %v400_v44 = vld [vmem:[#allocation2 + $0xa20] sm:$0xff] }
 0x160   :  { %3606 = vmatprep.subr.bf16.mxu0 %v7890_v54  ;;  %3692 = vmatprep.subr.bf16.mxu1 %v7892_v59  ;;  %v8018_v54 = vcombine.high %v288_v47, %v296_v48  ;;  %v8020_v59 = vcombine.high %v289_v49, %v297_v51  ;;  %v8099_v41 = vcombine.low %v369_v26, %v377_v28 }
 0x163   :  { %3607 = vmatpush1.bf16.msra.mxu0 %v7889_v61  ;;  %3693 = vmatpush1.bf16.msra.mxu1 %v7891_v62  ;;  %v8017_v61 = vcombine.low %v288_v47, %v296_v48  ;;  %v8019_v62 = vcombine.low %v289_v49, %v297_v51 }
 0x164   :  { %3608 = vmatprep.subr.bf16.mxu0 %v7906_v63  ;;  %3694 = vmatprep.subr.bf16.mxu1 %v7908_v3  ;;  %v8034_v63 = vcombine.high %v304_v55, %v312_v57  ;;  %v8036_v3 = vcombine.high %v305_v58, %v313_v60 }
 0x167   :  { %3609 = vmatpush1.bf16.msra.mxu0 %v7905_v5  ;;  %3695 = vmatpush1.bf16.msra.mxu1 %v7907_v6  ;;  %v8033_v5 = vcombine.low %v304_v55, %v312_v57  ;;  %v8035_v6 = vcombine.low %v305_v58, %v313_v60  ;;  %v417_v55 = vld [vmem:[#allocation2 + $0xaa8] sm:$0xff] }
 0x168   :  { %3610 = vmatprep.subr.bf16.mxu0 %v7922_v7  ;;  %3696 = vmatprep.subr.bf16.mxu1 %v7924_v11  ;;  %v8050_v7 = vcombine.high %v320_v0, %v328_v1  ;;  %v8052_v11 = vcombine.high %v321_v2, %v329_v4  ;;  %v425_v57 = vld [vmem:[#allocation2 + $0xae8] sm:$0xff] }
 0x16b   :  { %3611 = vmatpush1.bf16.msra.mxu0 %v7921_v13  ;;  %3697 = vmatpush1.bf16.msra.mxu1 %v7923_v14  ;;  %v8049_v13 = vcombine.low %v320_v0, %v328_v1  ;;  %v8051_v14 = vcombine.low %v321_v2, %v329_v4  ;;  %v8148_v1 = vcombine.high %v417_v55, %v425_v57  ;;  %v432_v2 = vld [vmem:[#allocation2 + $0xb20] sm:$0xff] }
 0x16c   :  { %3612 = vmatprep.subr.bf16.mxu0 %v7938_v15  ;;  %3698 = vmatprep.subr.bf16.mxu1 %v7940_v19  ;;  %v8066_v15 = vcombine.high %v336_v8, %v344_v9  ;;  %v8068_v19 = vcombine.high %v337_v10, %v345_v12 }
 0x16f   :  { %3613 = vmatpush1.bf16.msra.mxu0 %v7937_v21  ;;  %3699 = vmatpush1.bf16.msra.mxu1 %v7939_v22  ;;  %v8065_v21 = vcombine.low %v336_v8, %v344_v9  ;;  %v8067_v22 = vcombine.low %v337_v10, %v345_v12 }
 0x170   :  { %3614 = vmatprep.subr.bf16.mxu0 %v7954_v23  ;;  %3700 = vmatprep.subr.bf16.mxu1 %v7956_v27  ;;  %v8082_v23 = vcombine.high %v352_v16, %v360_v17  ;;  %v8084_v27 = vcombine.high %v353_v18, %v361_v20 }
 0x173   :  { %3615 = vmatpush1.bf16.msra.mxu0 %v7953_v29  ;;  %3701 = vmatpush1.bf16.msra.mxu1 %v7955_v30  ;;  %v9993_v29 = vld [vmem:[%s10162_s0] ss:$16 sps:$4 sm:$0xff]   ;;  %v8081_v30 = vcombine.low %v352_v16, %v360_v17 }
 0x174   :  { %3616 = vmatprep.subr.bf16.mxu0 %v7970_v31  ;;  %3702 = vmatprep.subr.bf16.mxu1 %v7972_v35  ;;  %v8083_v31 = vcombine.low %v353_v18, %v361_v20  ;;  %v392_v35 = vld [vmem:[#allocation2 + $0x9e0] sm:$0xff]  ;;  %v449_v20 = vld [vmem:[#allocation2 + $0xba8] sm:$0xff] }
 0x175   :  { %v8114_v42 = vcombine.high %v384_v34, %v392_v35  ;;  %v8113_v48 = vcombine.low %v384_v34, %v392_v35  ;;  %v456_v16 = vld [vmem:[#allocation2 + $0xbe0] sm:$0xff] }
 0x177   :  { %3617 = vmatpush1.bf16.msra.mxu0 %v7969_v37  ;;  %3703 = vmatpush1.bf16.msra.mxu1 %v7971_v38  ;;  %v385_v37 = vld [vmem:[#allocation2 + $0x9a8] sm:$0xff] }
 0x178   :  { %3618 = vmatprep.subr.bf16.mxu0 %v7986_v39  ;;  %3704 = vmatprep.subr.bf16.mxu1 %v7988_v43  ;;  %v393_v38 = vld [vmem:[#allocation2 + $0x9e8] sm:$0xff]  ;;  %v592_v39 = vlaneseq }
 0x179   :  { %v8116_v43 = vcombine.high %v385_v37, %v393_v38  ;;  %v8115_v49 = vcombine.low %v385_v37, %v393_v38 }
 0x17a   :  { %v10004_v47 = vshrl.u32 %v592_v39, 7 }
 0x17b   :  { %3619 = vmatpush1.bf16.msra.mxu0 %v7985_v56  ;;  %3705 = vmatpush1.bf16.msra.mxu1 %v7987_v45  ;;  %v408_v56 = vld [vmem:[#allocation2 + $0xa60] sm:$0xff]  ;;  %v401_v45 = vld [vmem:[#allocation2 + $0xa28] sm:$0xff] }
 0x17c   :  { %3620 = vmatprep.subr.bf16.mxu0 %v8002_v46  ;;  %3706 = vmatprep.subr.bf16.mxu1 %v8004_v50  ;;  %v409_v46 = vld [vmem:[#allocation2 + $0xa68] sm:$0xff]  ;;  %v8130_v50 = vcombine.high %v400_v44, %v408_v56  ;;  %v8129_v58 = vcombine.low %v400_v44, %v408_v56  ;;  %v10012_v60 = vsub.s32 2, %v10004_v47 }
 0x17d   :  { %v8132_v51 = vcombine.high %v401_v45, %v409_v46 }
 0x17f   :  { %3621 = vmatpush1.bf16.msra.mxu0 %v8001_v52  ;;  %3707 = vmatpush1.bf16.msra.mxu1 %v8003_v53  ;;  %v416_v52 = vld [vmem:[#allocation2 + $0xaa0] sm:$0xff] }
 0x180   :  { %3622 = vmatprep.subr.bf16.mxu0 %v8018_v54  ;;  %3708 = vmatprep.subr.bf16.mxu1 %v8020_v59  ;;  %v424_v53 = vld [vmem:[#allocation2 + $0xae0] sm:$0xff]  ;;  %v10007_v54 = vsub.s32 0, %v10004_v47 }
 0x181   :  { %v10009_v59 = vld [vmem:[#allocation5] sm:$0xff]  ;;  %v8146_v0 = vcombine.high %v416_v52, %v424_v53  ;;  %v8145_v9 = vcombine.low %v416_v52, %v424_v53 }
 0x182   :  { %v595_v4 = vrot.slane %v10009_v59, %v10007_v54 }
 0x183   :  { %3623 = vmatpush1.bf16.msra.mxu0 %v8017_v61  ;;  %3709 = vmatpush1.bf16.msra.mxu1 %v8019_v62  ;;  %v10015_v61 = vsub.s32 1, %v10004_v47  ;;  %v8131_v62 = vcombine.low %v401_v45, %v409_v46  ;;  %v465_v45 = vld [vmem:[#allocation2 + $0xc28] sm:$0xff] }
 0x184   :  { %3624 = vmatprep.subr.bf16.mxu0 %v8034_v63  ;;  %3710 = vmatprep.subr.bf16.mxu1 %v8036_v3  ;;  %v10018_v63 = vsub.s32 3, %v10004_v47  ;;  %v440_v3 = vld [vmem:[#allocation2 + $0xb60] sm:$0xff]  ;;  %v473_v46 = vld [vmem:[#allocation2 + $0xc68] sm:$0xff] }
 0x185   :  { %v599_v8 = vrot.slane %v10009_v59, %v10015_v61  ;;  %v8162_v12 = vcombine.high %v432_v2, %v440_v3  ;;  %v8161_v26 = vcombine.low %v432_v2, %v440_v3  ;;  %v488_v2 = vld [vmem:[#allocation2 + $0xce0] sm:$0xff] }
 0x186   :  { %v607_v10 = vrot.slane %v10009_v59, %v10018_v63 }
 0x187   :  { %3625 = vmatpush1.bf16.msra.mxu0 %v8033_v5  ;;  %3711 = vmatpush1.bf16.msra.mxu1 %v8035_v6  ;;  %v433_v5 = vld [vmem:[#allocation2 + $0xb28] sm:$0xff] }
 0x188   :  { %3626 = vmatprep.subr.bf16.mxu0 %v8050_v7  ;;  %3712 = vmatprep.subr.bf16.mxu1 %v8052_v11  ;;  %v441_v6 = vld [vmem:[#allocation2 + $0xb68] sm:$0xff]  ;;  %v603_v7 = vrot.slane %v10009_v59, %v10012_v60  ;;  %v8147_v11 = vcombine.low %v417_v55, %v425_v57 }
 0x18b   :  { %3627 = vmatpush1.bf16.msra.mxu0 %v8049_v13  ;;  %3713 = vmatpush1.bf16.msra.mxu1 %v8051_v14  ;;  %v8164_v14 = vcombine.high %v433_v5, %v441_v6 }
 0x18c   :  { %3639 = vmatprep.subr.bf16.mxu0 %v8066_v15  ;;  %3725 = vmatprep.subr.bf16.mxu1 %v8068_v19  ;;  %v448_v15 = vld [vmem:[#allocation2 + $0xba0] sm:$0xff] }
 0x18d   :  { %v8177_v38 = vcombine.low %v448_v15, %v456_v16 }
 0x18e   :  { %3629 = vmatmul.mubr.bf16.vlgmr.msra.gmra.mrb[8].mxu0 %v9993_v29  ;;  %3715 = vmatmul.mubr.bf16.vlgmr.msra.gmra.mrb[8].mxu1 %v9993_v29 }
 0x18f   :  { %3640 = vmatpush1.bf16.msra.mxu0 %v8065_v21  ;;  %3726 = vmatpush1.bf16.msra.mxu1 %v8067_v22  ;;  %v457_v21 = vld [vmem:[#allocation2 + $0xbe8] sm:$0xff] }
 0x190   :  { %3641 = vmatprep.subr.bf16.mxu0 %v8082_v23  ;;  %3727 = vmatprep.subr.bf16.mxu1 %v8084_v27  ;;  %v8163_v27 = vcombine.low %v433_v5, %v441_v6  ;;  %v8180_v39 = vcombine.high %v449_v20, %v457_v21  ;;  %v8179_v56 = vcombine.low %v449_v20, %v457_v21  ;;  %v489_v5 = vld [vmem:[#allocation2 + $0xce8] sm:$0xff] }
 0x191   :  { %3671 = vmatprep.mubr.bf16.mxu0 %v10000_v36  ;;  %3757 = vmatprep.mubr.bf16.mxu1 %v10000_v36  ;;  %v513_v20 = vld [vmem:[#allocation2 + $0xda8] sm:$0xff] }
 0x192   :  { %v521_v21 = vld [vmem:[#allocation2 + $0xde8] sm:$0xff] }
 0x193   :  { %3642 = vmatpush1.bf16.msra.mxu0 %v8081_v30  ;;  %3728 = vmatpush1.bf16.msra.mxu1 %v8083_v31 }
 0x194   :  { %3643 = vmatprep.subr.bf16.mxu0 %v8098_v32  ;;  %3729 = vmatprep.subr.bf16.mxu1 %v8100_v33  ;;  %v8178_v33 = vcombine.high %v448_v15, %v456_v16 }
 0x197   :  { %3644 = vmatpush1.bf16.msra.mxu0 %v8097_v40  ;;  %3730 = vmatpush1.bf16.msra.mxu1 %v8099_v41  ;;  %v464_v40 = vld [vmem:[#allocation2 + $0xc20] sm:$0xff] }
 0x198   :  { %3645 = vmatprep.subr.bf16.mxu0 %v8114_v42  ;;  %3731 = vmatprep.subr.bf16.mxu1 %v8116_v43  ;;  %v472_v41 = vld [vmem:[#allocation2 + $0xc60] sm:$0xff] }
 0x199   :  { %v8194_v57 = vcombine.high %v464_v40, %v472_v41  ;;  %v8193_v6 = vcombine.low %v464_v40, %v472_v41 }
 0x19b   :  { %3646 = vmatpush1.bf16.msra.mxu0 %v8113_v48  ;;  %3732 = vmatpush1.bf16.msra.mxu1 %v8115_v49 }
 0x19c   :  { %3647 = vmatprep.subr.bf16.mxu0 %v8130_v50  ;;  %3733 = vmatprep.subr.bf16.mxu1 %v8132_v51 }
 0x19f   :  { %3648 = vmatpush1.bf16.msra.mxu0 %v8129_v58  ;;  %3734 = vmatpush1.bf16.msra.mxu1 %v8131_v62 }
 0x1a0   :  { %3649 = vmatprep.subr.bf16.mxu0 %v8146_v0  ;;  %3735 = vmatprep.subr.bf16.mxu1 %v8148_v1  ;;  %v8196_v0 = vcombine.high %v465_v45, %v473_v46  ;;  %v480_v1 = vld [vmem:[#allocation2 + $0xca0] sm:$0xff] }
 0x1a1   :  { %v3329_v13 = vpop.f32.mrb[0].mxu0  ;;  %v3415_v18 = vpop.f32.mrb[0].mxu1 }
 0x1a2   :  { %v8825_v17 = vadd.f32 %v3329_v13, %v595_v4  ;;  %v3331_v19 = vpop.f32.mrb[1].mxu0  ;;  %v8829_v22 = vadd.f32 %v3415_v18, %v603_v7  ;;  %v3417_v24 = vpop.f32.mrb[1].mxu1  ;;  %v505_v13 = vld [vmem:[#allocation2 + $0xd68] sm:$0xff]  ;;  %v512_v18 = vld [vmem:[#allocation2 + $0xda0] sm:$0xff] }
 0x1a3   :  { %v8826_v23 = vadd.f32 %v3331_v19, %v599_v8  ;;  %v3333_v25 = vpop.f32.mrb[2].mxu0  ;;  %3650 = vmatpush1.bf16.msra.mxu0 %v8145_v9  ;;  %v8830_v28 = vadd.f32 %v3417_v24, %v607_v10  ;;  %v3419_v31 = vpop.f32.mrb[2].mxu1  ;;  %3736 = vmatpush1.bf16.msra.mxu1 %v8147_v11  ;;  %v504_v11 = vld [vmem:[#allocation2 + $0xd60] sm:$0xff] }
 0x1a4   :  { %v8827_v30 = vadd.f32 %v3333_v25, %v595_v4  ;;  %v3335_v32 = vpop.f32.mrb[3].mxu0  ;;  %3651 = vmatprep.subr.bf16.mxu0 %v8162_v12  ;;  %v8831_v34 = vadd.f32 %v3419_v31, %v603_v7  ;;  %v3421_v37 = vpop.f32.mrb[3].mxu1  ;;  %3737 = vmatprep.subr.bf16.mxu1 %v8164_v14  ;;  %v3940_v42 = vmax.f32 %v8825_v17, 0.0  ;;  %v3942_v48 = vmax.f32 %v8829_v22, 0.0  ;;  %v481_v4 = vld [vmem:[#allocation2 + $0xca8] sm:$0xff]  ;;  %v520_v19 = vld [vmem:[#allocation2 + $0xde0] sm:$0xff] }
 0x1a5   :  { %v8828_v35 = vadd.f32 %v3335_v32, %v599_v8  ;;  %v8832_v44 = vadd.f32 %v3421_v37, %v607_v10  ;;  %v3941_v49 = vmax.f32 %v8826_v23, 0.0  ;;  %v3943_v52 = vmax.f32 %v8830_v28, 0.0  ;;  %v496_v10 = vld [vmem:[#allocation2 + $0xd20] sm:$0xff]  ;;  %v497_v12 = vld [vmem:[#allocation2 + $0xd28] sm:$0xff] }
 0x1a6   :  { %v3956_v43 = vmax.f32 %v8827_v30, 0.0  ;;  %v3958_v50 = vmax.f32 %v8831_v34, 0.0  ;;  %v8195_v7 = vcombine.low %v465_v45, %v473_v46  ;;  %v8210_v8 = vcombine.high %v480_v1, %v488_v2  ;;  %v529_v28 = vld [vmem:[#allocation2 + $0xe28] sm:$0xff]  ;;  %v552_v37 = vld [vmem:[#allocation2 + $0xee0] sm:$0xff] }
 0x1a7   :  { %v3957_v51 = vmax.f32 %v8828_v35, 0.0  ;;  %3652 = vmatpush1.bf16.msra.mxu0 %v8161_v26  ;;  %v3959_v55 = vmax.f32 %v8832_v44, 0.0  ;;  %3738 = vmatpush1.bf16.msra.mxu1 %v8163_v27  ;;  %v8212_v9 = vcombine.high %v481_v4, %v489_v5  ;;  %v8209_v14 = vcombine.low %v480_v1, %v488_v2  ;;  %v528_v26 = vld [vmem:[#allocation2 + $0xe20] sm:$0xff]  ;;  %v537_v30 = vld [vmem:[#allocation2 + $0xe68] sm:$0xff] }
 0x1a8   :  { %v10028_v53 = vpack.c.bf16 %v3956_v43, %v3940_v42  ;;  %3653 = vmatprep.subr.bf16.mxu0 %v8178_v33  ;;  %v10030_v58 = vpack.c.bf16 %v3958_v50, %v3942_v48  ;;  %3739 = vmatprep.subr.bf16.mxu1 %v8180_v39  ;;  %v8211_v15 = vcombine.low %v481_v4, %v489_v5  ;;  %v536_v27 = vld [vmem:[#allocation2 + $0xe60] sm:$0xff]  ;;  %v553_v39 = vld [vmem:[#allocation2 + $0xee8] sm:$0xff] }
 0x1a9   :  { %v10032_v62 = vpack.c.bf16 %v3957_v51, %v3941_v49  ;;  %v10034_v3 = vpack.c.bf16 %v3959_v55, %v3943_v52  ;;  %v8226_v16 = vcombine.high %v496_v10, %v504_v11  ;;  %v8228_v17 = vcombine.high %v497_v12, %v505_v13  ;;  %v544_v35 = vld [vmem:[#allocation2 + $0xea0] sm:$0xff]  ;;  %v561_v45 = vld [vmem:[#allocation2 + $0xf28] sm:$0xff] }
 0x1aa   :  { %v8225_v22 = vcombine.low %v496_v10, %v504_v11  ;;  %v8227_v23 = vcombine.low %v497_v12, %v505_v13  ;;  %v8242_v24 = vcombine.high %v512_v18, %v520_v19  ;;  %v8244_v25 = vcombine.high %v513_v20, %v521_v21  ;;  %v560_v44 = vld [vmem:[#allocation2 + $0xf20] sm:$0xff]  ;;  %v569_v46 = vld [vmem:[#allocation2 + $0xf68] sm:$0xff] }
 0x1ab   :  { %3654 = vmatpush1.bf16.msra.mxu0 %v8177_v38  ;;  %3740 = vmatpush1.bf16.msra.mxu1 %v8179_v56  ;;  %v8241_v31 = vcombine.low %v512_v18, %v520_v19  ;;  %v8243_v32 = vcombine.low %v513_v20, %v521_v21  ;;  %v8258_v33 = vcombine.high %v528_v26, %v536_v27  ;;  %v545_v38 = vld [vmem:[#allocation2 + $0xea8] sm:$0xff]  ;;  %v568_v56 = vld [vmem:[#allocation2 + $0xf60] sm:$0xff] }
 0x1ac   :  { %3655 = vmatprep.subr.bf16.mxu0 %v8194_v57  ;;  %3741 = vmatprep.subr.bf16.mxu1 %v8196_v0  ;;  %v8260_v34 = vcombine.high %v529_v28, %v537_v30  ;;  %v8257_v40 = vcombine.low %v528_v26, %v536_v27  ;;  %v8259_v41 = vcombine.low %v529_v28, %v537_v30  ;;  %v576_v52 = vld [vmem:[#allocation2 + $0xfa0] sm:$0xff]  ;;  %v577_v57 = vld [vmem:[#allocation2 + $0xfa8] sm:$0xff]  ;;  %v123_v26 = vld [vmem:[#allocation2 + $0x178] sm:$0xff] }
 0x1ad   :  { %v8274_v42 = vcombine.high %v544_v35, %v552_v37  ;;  %v8276_v43 = vcombine.high %v545_v38, %v553_v39  ;;  %v8273_v48 = vcombine.low %v544_v35, %v552_v37  ;;  %v8275_v49 = vcombine.low %v545_v38, %v553_v39  ;;  %v584_v55 = vld [vmem:[#allocation2 + $0xfe0] sm:$0xff]  ;;  %v585_v0 = vld [vmem:[#allocation2 + $0xfe8] sm:$0xff]  ;;  %v131_v35 = vld [vmem:[#allocation2 + $0x1b8] sm:$0xff] }
 0x1ae   :  { %v8290_v50 = vcombine.high %v560_v44, %v568_v56  ;;  %v8292_v51 = vcombine.high %v561_v45, %v569_v46  ;;  %v8289_v1 = vcombine.low %v560_v44, %v568_v56  ;;  %v8291_v2 = vcombine.low %v561_v45, %v569_v46  ;;  %v139_v37 = vld [vmem:[#allocation2 + $0x1f8] sm:$0xff] }
 0x1af   :  { %3656 = vmatpush1.bf16.msra.mxu0 %v8193_v6  ;;  %3742 = vmatpush1.bf16.msra.mxu1 %v8195_v7  ;;  %v8306_v4 = vcombine.high %v576_v52, %v584_v55  ;;  %v8308_v5 = vcombine.high %v577_v57, %v585_v0  ;;  %v82_v6 = vld [vmem:[#allocation2 + $0x30] sm:$0xff]  ;;  %v8305_v10 = vcombine.low %v576_v52, %v584_v55  ;;  %v147_v44 = vld [vmem:[#allocation2 + $0x238] sm:$0xff] }
 0x1b0   :  { %3657 = vmatprep.subr.bf16.mxu0 %v8210_v8  ;;  %3743 = vmatprep.subr.bf16.mxu1 %v8212_v9  ;;  %v90_v7 = vld [vmem:[#allocation2 + $0x70] sm:$0xff]  ;;  %v83_v8 = vld [vmem:[#allocation2 + $0x38] sm:$0xff]  ;;  %v8307_v11 = vcombine.low %v577_v57, %v585_v0  ;;  %v7863_v46 = vcombine.low %v131_v35, %v139_v37 }
 0x1b1   :  { %v91_v9 = vld [vmem:[#allocation2 + $0x78] sm:$0xff]  ;;  %v7814_v12 = vcombine.high %v82_v6, %v90_v7  ;;  %v7813_v18 = vcombine.low %v82_v6, %v90_v7 }
 0x1b2   :  { %v7816_v13 = vcombine.high %v83_v8, %v91_v9  ;;  %v7815_v19 = vcombine.low %v83_v8, %v91_v9  ;;  %v155_v56 = vld [vmem:[#allocation2 + $0x278] sm:$0xff] }
 0x1b3   :  { %3658 = vmatpush1.bf16.msra.mxu0 %v8209_v14  ;;  %3744 = vmatpush1.bf16.msra.mxu1 %v8211_v15  ;;  %v98_v14 = vld [vmem:[#allocation2 + $0xb0] sm:$0xff]  ;;  %v163_v52 = vld [vmem:[#allocation2 + $0x2b8] sm:$0xff]  ;;  %v7879_v0 = vcombine.low %v147_v44, %v155_v56 }
 0x1b4   :  { %3659 = vmatprep.subr.bf16.mxu0 %v8226_v16  ;;  %3745 = vmatprep.subr.bf16.mxu1 %v8228_v17  ;;  %v106_v15 = vld [vmem:[#allocation2 + $0xf0] sm:$0xff]  ;;  %v99_v16 = vld [vmem:[#allocation2 + $0xb8] sm:$0xff] }
 0x1b5   :  { %v107_v17 = vld [vmem:[#allocation2 + $0xf8] sm:$0xff]  ;;  %v7830_v20 = vcombine.high %v98_v14, %v106_v15  ;;  %v7829_v27 = vcombine.low %v98_v14, %v106_v15 }
 0x1b6   :  { %v7832_v21 = vcombine.high %v99_v16, %v107_v17  ;;  %v7831_v28 = vcombine.low %v99_v16, %v107_v17  ;;  %v171_v55 = vld [vmem:[#allocation2 + $0x2f8] sm:$0xff] }
 0x1b7   :  { %3660 = vmatpush1.bf16.msra.mxu0 %v8225_v22  ;;  %3746 = vmatpush1.bf16.msra.mxu1 %v8227_v23  ;;  %v114_v22 = vld [vmem:[#allocation2 + $0x130] sm:$0xff]  ;;  %v179_v6 = vld [vmem:[#allocation2 + $0x338] sm:$0xff]  ;;  %v7895_v9 = vcombine.low %v163_v52, %v171_v55 }
 0x1b8   :  { %3661 = vmatprep.subr.bf16.mxu0 %v8242_v24  ;;  %3747 = vmatprep.subr.bf16.mxu1 %v8244_v25  ;;  %v122_v23 = vld [vmem:[#allocation2 + $0x170] sm:$0xff]  ;;  %v10039_v24 = vld [vmem:[%s10162_s0 + $0x8] ss:$16 sps:$4 sm:$0xff]  }
 0x1b9   :  { %v115_v25 = vld [vmem:[#allocation2 + $0x138] sm:$0xff]  ;;  %v7846_v30 = vcombine.high %v114_v22, %v122_v23  ;;  %v7845_v38 = vcombine.low %v114_v22, %v122_v23 }
 0x1ba   :  { %v7847_v39 = vcombine.low %v115_v25, %v123_v26  ;;  %v187_v7 = vld [vmem:[#allocation2 + $0x378] sm:$0xff] }
 0x1bb   :  { %3662 = vmatpush1.bf16.msra.mxu0 %v8241_v31  ;;  %3748 = vmatpush1.bf16.msra.mxu1 %v8243_v32  ;;  %v7848_v31 = vcombine.high %v115_v25, %v123_v26  ;;  %v130_v32 = vld [vmem:[#allocation2 + $0x1b0] sm:$0xff]  ;;  %v195_v14 = vld [vmem:[#allocation2 + $0x3b8] sm:$0xff]  ;;  %v7911_v17 = vcombine.low %v179_v6, %v187_v7 }
 0x1bc   :  { %3663 = vmatprep.subr.bf16.mxu0 %v8258_v33  ;;  %3749 = vmatprep.subr.bf16.mxu1 %v8260_v34  ;;  %v138_v33 = vld [vmem:[#allocation2 + $0x1f0] sm:$0xff]  ;;  %v203_v15 = vld [vmem:[#allocation2 + $0x3f8] sm:$0xff] }
 0x1bd   :  { %v9745_v34 = vld [vmem:[%s10162_s0 + $0x4] ss:$16 sps:$4 sm:$0xff]   ;;  %v7861_v45 = vcombine.low %v130_v32, %v138_v33  ;;  %v211_v22 = vld [vmem:[#allocation2 + $0x438] sm:$0xff]  ;;  %v7927_v26 = vcombine.low %v195_v14, %v203_v15  ;;  %s9872_s0 = smov [#allocation10]  }
 0x1be   :  { %v219_v23 = vld [vmem:[#allocation2 + $0x478] sm:$0xff]  ;;  %s7783_s13 = sshll.u32 %s9872_s0, 4  ;;  %s7784_s13 = int_to_ptr.vmem [resolvable:$true] %s7783_s13 }
 0x1bf   :  { %3664 = vmatpush1.bf16.msra.mxu0 %v8257_v40  ;;  %3750 = vmatpush1.bf16.msra.mxu1 %v8259_v41  ;;  %v7862_v40 = vcombine.high %v130_v32, %v138_v33  ;;  %v7864_v41 = vcombine.high %v131_v35, %v139_v37  ;;  %v227_v32 = vld [vmem:[#allocation2 + $0x4b8] sm:$0xff]  ;;  %v7943_v35 = vcombine.low %v211_v22, %v219_v23  ;;  %s9834_s14 = scalar_lea.vmem %s7784_s13, 1024  ;;  %p9839_p5 = scmp.lt.s32.totalorder %s7784_s13, %s7784_s13 }
 0x1c0   :  { %3665 = vmatprep.subr.bf16.mxu0 %v8274_v42  ;;  %3751 = vmatprep.subr.bf16.mxu1 %v8276_v43  ;;  %v146_v42 = vld [vmem:[#allocation2 + $0x230] sm:$0xff]  ;;  %v235_v33 = vld [vmem:[#allocation2 + $0x4f8] sm:$0xff]  ;;  %p9835_p4 = scmp.ne.s32.totalorder %s7784_s13, %s9834_s14  ;;  %p9840_p6 = scmp.lt.s32.totalorder %s9834_s14, %s9834_s14 }
 0x1c1   :  { %v154_v43 = vld [vmem:[#allocation2 + $0x270] sm:$0xff] }
 0x1c2   :  { %v7877_v57 = vcombine.low %v146_v42, %v154_v43  ;;  %p9841_p7 = por %p9840_p6, %p9839_p5 }
 0x1c3   :  { %3666 = vmatpush1.bf16.msra.mxu0 %v8273_v48  ;;  %3752 = vmatpush1.bf16.msra.mxu1 %v8275_v49  ;;  %v7878_v48 = vcombine.high %v146_v42, %v154_v43  ;;  %v7880_v49 = vcombine.high %v147_v44, %v155_v56  ;;  %v251_v42 = vld [vmem:[#allocation2 + $0x578] sm:$0xff]  ;;  %v7959_v44 = vcombine.low %v227_v32, %v235_v33 }
 0x1c4   :  { %3667 = vmatprep.subr.bf16.mxu0 %v8290_v50  ;;  %3753 = vmatprep.subr.bf16.mxu1 %v8292_v51  ;;  %v162_v50 = vld [vmem:[#allocation2 + $0x2b0] sm:$0xff]  ;;  %p9842_p8 = pnand %p9841_p7, %p9835_p4 }
 0x1c5   :  { %v170_v51 = vld [vmem:[#allocation2 + $0x2f0] sm:$0xff] }
 0x1c6   :  { %v7893_v8 = vcombine.low %v162_v50, %v170_v51 }
 0x1c7   :  { %3668 = vmatpush1.bf16.msra.mxu0 %v8289_v1  ;;  %3754 = vmatpush1.bf16.msra.mxu1 %v8291_v2  ;;  %v7894_v1 = vcombine.high %v162_v50, %v170_v51  ;;  %v7896_v2 = vcombine.high %v163_v52, %v171_v55  ;;  %v267_v50 = vld [vmem:[#allocation2 + $0x5f8] sm:$0xff] }
 0x1c8   :  { %3669 = vmatprep.subr.bf16.mxu0 %v8306_v4  ;;  %3755 = vmatprep.subr.bf16.mxu1 %v8308_v5  ;;  %v178_v4 = vld [vmem:[#allocation2 + $0x330] sm:$0xff] }
 0x1c9   :  { %v186_v5 = vld [vmem:[#allocation2 + $0x370] sm:$0xff] }
 0x1ca   :  { %v7909_v16 = vcombine.low %v178_v4, %v186_v5 }
 0x1cb   :  { %3670 = vmatpush1.bf16.msra.mxu0 %v8305_v10  ;;  %3756 = vmatpush1.bf16.msra.mxu1 %v8307_v11  ;;  %v7910_v10 = vcombine.high %v178_v4, %v186_v5  ;;  %v7912_v11 = vcombine.high %v179_v6, %v187_v7  ;;  %v283_v4 = vld [vmem:[#allocation2 + $0x678] sm:$0xff] }
 0x1cc   :  { %3768 = vmatprep.subr.bf16.mxu0 %v7814_v12  ;;  %3854 = vmatprep.subr.bf16.mxu1 %v7816_v13  ;;  %v194_v12 = vld [vmem:[#allocation2 + $0x3b0] sm:$0xff] }
 0x1cd   :  { %v202_v13 = vld [vmem:[#allocation2 + $0x3f0] sm:$0xff] }
 0x1ce   :  { %3672 = vmatmul.mubr.bf16.vlgmr.msra.gmra.mrb[8].mxu0 %v10039_v24  ;;  %3758 = vmatmul.mubr.bf16.vlgmr.msra.gmra.mrb[8].mxu1 %v10039_v24  ;;  %v7925_v25 = vcombine.low %v194_v12, %v202_v13 }
 0x1cf   :  { %3769 = vmatpush1.bf16.msra.mxu0 %v7813_v18  ;;  %3855 = vmatpush1.bf16.msra.mxu1 %v7815_v19  ;;  %v7926_v18 = vcombine.high %v194_v12, %v202_v13  ;;  %v7928_v19 = vcombine.high %v195_v14, %v203_v15  ;;  %v299_v12 = vld [vmem:[#allocation2 + $0x6f8] sm:$0xff] }
 0x1d0   :  { %3770 = vmatprep.subr.bf16.mxu0 %v7830_v20  ;;  %3856 = vmatprep.subr.bf16.mxu1 %v7832_v21  ;;  %v210_v20 = vld [vmem:[#allocation2 + $0x430] sm:$0xff] }
 0x1d1   :  { %3800 = vmatprep.mubr.bf16.mxu0 %v9745_v34  ;;  %3886 = vmatprep.mubr.bf16.mxu1 %v9745_v34  ;;  %v218_v21 = vld [vmem:[#allocation2 + $0x470] sm:$0xff] }
 0x1d2   :  { %v7941_v34 = vcombine.low %v210_v20, %v218_v21 }
 0x1d3   :  { %3771 = vmatpush1.bf16.msra.mxu0 %v7829_v27  ;;  %3857 = vmatpush1.bf16.msra.mxu1 %v7831_v28  ;;  %v7942_v27 = vcombine.high %v210_v20, %v218_v21  ;;  %v7944_v28 = vcombine.high %v211_v22, %v219_v23  ;;  %v315_v20 = vld [vmem:[#allocation2 + $0x778] sm:$0xff] }
 0x1d4   :  { %3772 = vmatprep.subr.bf16.mxu0 %v7846_v30  ;;  %3858 = vmatprep.subr.bf16.mxu1 %v7848_v31  ;;  %v226_v30 = vld [vmem:[#allocation2 + $0x4b0] sm:$0xff] }
 0x1d5   :  { %v234_v31 = vld [vmem:[#allocation2 + $0x4f0] sm:$0xff] }
 0x1d6   :  { %v7958_v37 = vcombine.high %v226_v30, %v234_v31  ;;  %v7957_v43 = vcombine.low %v226_v30, %v234_v31  ;;  %v331_v30 = vld [vmem:[#allocation2 + $0x7f8] sm:$0xff] }
 0x1d7   :  { %3773 = vmatpush1.bf16.msra.mxu0 %v7845_v38  ;;  %3859 = vmatpush1.bf16.msra.mxu1 %v7847_v39  ;;  %v7960_v38 = vcombine.high %v227_v32, %v235_v33  ;;  %v242_v39 = vld [vmem:[#allocation2 + $0x530] sm:$0xff] }
 0x1d8   :  { %3774 = vmatprep.subr.bf16.mxu0 %v7862_v40  ;;  %3860 = vmatprep.subr.bf16.mxu1 %v7864_v41  ;;  %v250_v40 = vld [vmem:[#allocation2 + $0x570] sm:$0xff]  ;;  %v243_v41 = vld [vmem:[#allocation2 + $0x538] sm:$0xff] }
 0x1d9   :  { %v7974_v56 = vcombine.high %v242_v39, %v250_v40  ;;  %v7973_v51 = vcombine.low %v242_v39, %v250_v40  ;;  %v7975_v52 = vcombine.low %v243_v41, %v251_v42  ;;  %v347_v39 = vld [vmem:[#allocation2 + $0x878] sm:$0xff] }
 0x1db   :  { %3775 = vmatpush1.bf16.msra.mxu0 %v7861_v45  ;;  %3861 = vmatpush1.bf16.msra.mxu1 %v7863_v46  ;;  %v7976_v45 = vcombine.high %v243_v41, %v251_v42  ;;  %v258_v46 = vld [vmem:[#allocation2 + $0x5b0] sm:$0xff] }
 0x1dc   :  { %3776 = vmatprep.subr.bf16.mxu0 %v7878_v48  ;;  %3862 = vmatprep.subr.bf16.mxu1 %v7880_v49  ;;  %v266_v48 = vld [vmem:[#allocation2 + $0x5f0] sm:$0xff]  ;;  %v259_v49 = vld [vmem:[#allocation2 + $0x5b8] sm:$0xff] }
 0x1dd   :  { %v7990_v55 = vcombine.high %v258_v46, %v266_v48  ;;  %v7989_v5 = vcombine.low %v258_v46, %v266_v48  ;;  %v7991_v6 = vcombine.low %v259_v49, %v267_v50  ;;  %v363_v46 = vld [vmem:[#allocation2 + $0x8f8] sm:$0xff] }
 0x1df   :  { %3777 = vmatpush1.bf16.msra.mxu0 %v7877_v57  ;;  %3863 = vmatpush1.bf16.msra.mxu1 %v7879_v0  ;;  %v7992_v57 = vcombine.high %v259_v49, %v267_v50  ;;  %v274_v0 = vld [vmem:[#allocation2 + $0x630] sm:$0xff] }
 0x1e0   :  { %3778 = vmatprep.subr.bf16.mxu0 %v7894_v1  ;;  %3864 = vmatprep.subr.bf16.mxu1 %v7896_v2  ;;  %v282_v1 = vld [vmem:[#allocation2 + $0x670] sm:$0xff]  ;;  %v275_v2 = vld [vmem:[#allocation2 + $0x638] sm:$0xff] }
 0x1e1   :  { %v8006_v7 = vcombine.high %v274_v0, %v282_v1  ;;  %v8005_v13 = vcombine.low %v274_v0, %v282_v1  ;;  %v8007_v14 = vcombine.low %v275_v2, %v283_v4  ;;  %v379_v0 = vld [vmem:[#allocation2 + $0x978] sm:$0xff] }
 0x1e3   :  { %3779 = vmatpush1.bf16.msra.mxu0 %v7893_v8  ;;  %3865 = vmatpush1.bf16.msra.mxu1 %v7895_v9  ;;  %v8008_v8 = vcombine.high %v275_v2, %v283_v4  ;;  %v290_v9 = vld [vmem:[#allocation2 + $0x6b0] sm:$0xff] }
 0x1e4   :  { %3780 = vmatprep.subr.bf16.mxu0 %v7910_v10  ;;  %3866 = vmatprep.subr.bf16.mxu1 %v7912_v11  ;;  %v298_v10 = vld [vmem:[#allocation2 + $0x6f0] sm:$0xff]  ;;  %v291_v11 = vld [vmem:[#allocation2 + $0x6b8] sm:$0xff] }
 0x1e5   :  { %v8022_v15 = vcombine.high %v290_v9, %v298_v10  ;;  %v8021_v21 = vcombine.low %v290_v9, %v298_v10  ;;  %v8023_v22 = vcombine.low %v291_v11, %v299_v12  ;;  %v395_v9 = vld [vmem:[#allocation2 + $0x9f8] sm:$0xff] }
 0x1e7   :  { %3781 = vmatpush1.bf16.msra.mxu0 %v7909_v16  ;;  %3867 = vmatpush1.bf16.msra.mxu1 %v7911_v17  ;;  %v8024_v16 = vcombine.high %v291_v11, %v299_v12  ;;  %v306_v17 = vld [vmem:[#allocation2 + $0x730] sm:$0xff] }
 0x1e8   :  { %3782 = vmatprep.subr.bf16.mxu0 %v7926_v18  ;;  %3868 = vmatprep.subr.bf16.mxu1 %v7928_v19  ;;  %v314_v18 = vld [vmem:[#allocation2 + $0x770] sm:$0xff]  ;;  %v307_v19 = vld [vmem:[#allocation2 + $0x738] sm:$0xff] }
 0x1e9   :  { %v8038_v23 = vcombine.high %v306_v17, %v314_v18  ;;  %v8037_v31 = vcombine.low %v306_v17, %v314_v18  ;;  %v8039_v32 = vcombine.low %v307_v19, %v315_v20 }
 0x1eb   :  { %3783 = vmatpush1.bf16.msra.mxu0 %v7925_v25  ;;  %3869 = vmatpush1.bf16.msra.mxu1 %v7927_v26  ;;  %v8040_v25 = vcombine.high %v307_v19, %v315_v20  ;;  %v322_v26 = vld [vmem:[#allocation2 + $0x7b0] sm:$0xff] }
 0x1ec   :  { %3784 = vmatprep.subr.bf16.mxu0 %v7942_v27  ;;  %3870 = vmatprep.subr.bf16.mxu1 %v7944_v28  ;;  %v330_v27 = vld [vmem:[#allocation2 + $0x7f0] sm:$0xff]  ;;  %v323_v28 = vld [vmem:[#allocation2 + $0x7b8] sm:$0xff] }
 0x1ed   :  { %v8054_v33 = vcombine.high %v322_v26, %v330_v27  ;;  %v8053_v40 = vcombine.low %v322_v26, %v330_v27  ;;  %v8055_v41 = vcombine.low %v323_v28, %v331_v30  ;;  %v418_v20 = vld [vmem:[#allocation2 + $0xab0] sm:$0xff]  ;;  %v618_v27 = vsub.s32 6, %v10004_v47 }
 0x1ef   :  { %3785 = vmatpush1.bf16.msra.mxu0 %v7941_v34  ;;  %3871 = vmatpush1.bf16.msra.mxu1 %v7943_v35  ;;  %v8056_v34 = vcombine.high %v323_v28, %v331_v30  ;;  %v338_v35 = vld [vmem:[#allocation2 + $0x830] sm:$0xff]  ;;  %v614_v28 = vsub.s32 5, %v10004_v47 }
 0x1f0   :  { %3786 = vmatprep.subr.bf16.mxu0 %v7958_v37  ;;  %3872 = vmatprep.subr.bf16.mxu1 %v7960_v38  ;;  %v346_v37 = vld [vmem:[#allocation2 + $0x870] sm:$0xff]  ;;  %v339_v38 = vld [vmem:[#allocation2 + $0x838] sm:$0xff] }
 0x1f1   :  { %v8070_v42 = vcombine.high %v338_v35, %v346_v37  ;;  %v8069_v48 = vcombine.low %v338_v35, %v346_v37  ;;  %v8071_v49 = vcombine.low %v339_v38, %v347_v39  ;;  %v442_v35 = vld [vmem:[#allocation2 + $0xb70] sm:$0xff] }
 0x1f3   :  { %3787 = vmatpush1.bf16.msra.mxu0 %v7957_v43  ;;  %3873 = vmatpush1.bf16.msra.mxu1 %v7959_v44  ;;  %v8072_v43 = vcombine.high %v339_v38, %v347_v39  ;;  %v354_v44 = vld [vmem:[#allocation2 + $0x8b0] sm:$0xff]  ;;  %v435_v38 = vld [vmem:[#allocation2 + $0xb38] sm:$0xff] }
 0x1f4   :  { %3788 = vmatprep.subr.bf16.mxu0 %v7974_v56  ;;  %3874 = vmatprep.subr.bf16.mxu1 %v7976_v45  ;;  %v362_v56 = vld [vmem:[#allocation2 + $0x8f0] sm:$0xff]  ;;  %v355_v45 = vld [vmem:[#allocation2 + $0x8b8] sm:$0xff] }
 0x1f5   :  { %v8086_v50 = vcombine.high %v354_v44, %v362_v56  ;;  %v8085_v1 = vcombine.low %v354_v44, %v362_v56  ;;  %v8087_v2 = vcombine.low %v355_v45, %v363_v46  ;;  %v443_v39 = vld [vmem:[#allocation2 + $0xb78] sm:$0xff] }
 0x1f7   :  { %3789 = vmatpush1.bf16.msra.mxu0 %v7973_v51  ;;  %3875 = vmatpush1.bf16.msra.mxu1 %v7975_v52  ;;  %v8088_v51 = vcombine.high %v355_v45, %v363_v46  ;;  %v370_v52 = vld [vmem:[#allocation2 + $0x930] sm:$0xff]  ;;  %v8168_v46 = vcombine.high %v435_v38, %v443_v39 }
 0x1f8   :  { %3790 = vmatprep.subr.bf16.mxu0 %v7990_v55  ;;  %3876 = vmatprep.subr.bf16.mxu1 %v7992_v57  ;;  %v378_v55 = vld [vmem:[#allocation2 + $0x970] sm:$0xff]  ;;  %v371_v57 = vld [vmem:[#allocation2 + $0x938] sm:$0xff] }
 0x1f9   :  { %v8102_v4 = vcombine.high %v370_v52, %v378_v55  ;;  %v8101_v10 = vcombine.low %v370_v52, %v378_v55  ;;  %v451_v55 = vld [vmem:[#allocation2 + $0xbb8] sm:$0xff] }
 0x1fb   :  { %3791 = vmatpush1.bf16.msra.mxu0 %v7989_v5  ;;  %3877 = vmatpush1.bf16.msra.mxu1 %v7991_v6  ;;  %v8104_v5 = vcombine.high %v371_v57, %v379_v0  ;;  %v386_v6 = vld [vmem:[#allocation2 + $0x9b0] sm:$0xff] }
 0x1fc   :  { %3792 = vmatprep.subr.bf16.mxu0 %v8006_v7  ;;  %3878 = vmatprep.subr.bf16.mxu1 %v8008_v8  ;;  %v394_v7 = vld [vmem:[#allocation2 + $0x9f0] sm:$0xff]  ;;  %v387_v8 = vld [vmem:[#allocation2 + $0x9b8] sm:$0xff] }
 0x1fd   :  { %v8118_v11 = vcombine.high %v386_v6, %v394_v7  ;;  %v8120_v12 = vcombine.high %v387_v8, %v395_v9  ;;  %v8117_v17 = vcombine.low %v386_v6, %v394_v7  ;;  %v8119_v18 = vcombine.low %v387_v8, %v395_v9 }
 0x1ff   :  { %3793 = vmatpush1.bf16.msra.mxu0 %v8005_v13  ;;  %3879 = vmatpush1.bf16.msra.mxu1 %v8007_v14  ;;  %v402_v13 = vld [vmem:[#allocation2 + $0xa30] sm:$0xff] }
 0x200   :  { %3794 = vmatprep.subr.bf16.mxu0 %v8022_v15  ;;  %3880 = vmatprep.subr.bf16.mxu1 %v8024_v16  ;;  %v410_v14 = vld [vmem:[#allocation2 + $0xa70] sm:$0xff]  ;;  %v403_v15 = vld [vmem:[#allocation2 + $0xa38] sm:$0xff] }
 0x201   :  { %v411_v16 = vld [vmem:[#allocation2 + $0xa78] sm:$0xff]  ;;  %v8134_v19 = vcombine.high %v402_v13, %v410_v14  ;;  %v8133_v26 = vcombine.low %v402_v13, %v410_v14 }
 0x202   :  { %v8135_v30 = vcombine.low %v403_v15, %v411_v16 }
 0x203   :  { %3795 = vmatpush1.bf16.msra.mxu0 %v8021_v21  ;;  %3881 = vmatpush1.bf16.msra.mxu1 %v8023_v22  ;;  %v426_v21 = vld [vmem:[#allocation2 + $0xaf0] sm:$0xff]  ;;  %v610_v22 = vsub.s32 4, %v10004_v47 }
 0x204   :  { %3796 = vmatprep.subr.bf16.mxu0 %v8038_v23  ;;  %3882 = vmatprep.subr.bf16.mxu1 %v8040_v25  ;;  %v419_v23 = vld [vmem:[#allocation2 + $0xab8] sm:$0xff] }
 0x205   :  { %v427_v25 = vld [vmem:[#allocation2 + $0xaf8] sm:$0xff]  ;;  %v611_v37 = vrot.slane %v10009_v59, %v610_v22 }
 0x206   :  { %v8151_v44 = vcombine.low %v419_v23, %v427_v25 }
 0x207   :  { %3797 = vmatpush1.bf16.msra.mxu0 %v8037_v31  ;;  %3883 = vmatpush1.bf16.msra.mxu1 %v8039_v32  ;;  %v622_v31 = vsub.s32 7, %v10004_v47  ;;  %v8150_v32 = vcombine.high %v418_v20, %v426_v21 }
 0x208   :  { %3798 = vmatprep.subr.bf16.mxu0 %v8054_v33  ;;  %3884 = vmatprep.subr.bf16.mxu1 %v8056_v34  ;;  %v8152_v33 = vcombine.high %v419_v23, %v427_v25  ;;  %v434_v34 = vld [vmem:[#allocation2 + $0xb30] sm:$0xff] }
 0x209   :  { %v8166_v56 = vcombine.high %v434_v34, %v442_v35 }
 0x20b   :  { %3799 = vmatpush1.bf16.msra.mxu0 %v8053_v40  ;;  %3885 = vmatpush1.bf16.msra.mxu1 %v8055_v41  ;;  %v619_v40 = vrot.slane %v10009_v59, %v618_v27  ;;  %v615_v41 = vrot.slane %v10009_v59, %v614_v28 }
 0x20c   :  { %3811 = vmatprep.subr.bf16.mxu0 %v8070_v42  ;;  %3897 = vmatprep.subr.bf16.mxu1 %v8072_v43  ;;  %v8149_v42 = vcombine.low %v418_v20, %v426_v21  ;;  %v623_v43 = vrot.slane %v10009_v59, %v622_v31  ;;  %v8167_v59 = vcombine.low %v435_v38, %v443_v39  ;;  %v467_v20 = vld [vmem:[#allocation2 + $0xc38] sm:$0xff] }
 0x20d   :  { %v475_v21 = vld [vmem:[#allocation2 + $0xc78] sm:$0xff] }
 0x20e   :  { %3801 = vmatmul.mubr.bf16.vlgmr.msra.gmra.mrb[12].mxu0 %v9993_v29  ;;  %3887 = vmatmul.mubr.bf16.vlgmr.msra.gmra.mrb[12].mxu1 %v9993_v29  ;;  %v8103_v29 = vcombine.low %v371_v57, %v379_v0  ;;  %v459_v57 = vld [vmem:[#allocation2 + $0xbf8] sm:$0xff]  ;;  %v8200_v39 = vcombine.high %v467_v20, %v475_v21 }
 0x20f   :  { %3812 = vmatpush1.bf16.msra.mxu0 %v8069_v48  ;;  %3898 = vmatpush1.bf16.msra.mxu1 %v8071_v49  ;;  %v450_v48 = vld [vmem:[#allocation2 + $0xbb0] sm:$0xff]  ;;  %v8184_v14 = vcombine.high %v451_v55, %v459_v57 }
 0x210   :  { %3813 = vmatprep.subr.bf16.mxu0 %v8086_v50  ;;  %3899 = vmatprep.subr.bf16.mxu1 %v8088_v51  ;;  %v458_v49 = vld [vmem:[#allocation2 + $0xbf0] sm:$0xff] }
 0x211   :  { %3843 = vmatprep.mubr.bf16.mxu0 %v10000_v36  ;;  %3929 = vmatprep.mubr.bf16.mxu1 %v10000_v36  ;;  %v8136_v36 = vcombine.high %v403_v15, %v411_v16  ;;  %v8181_v13 = vcombine.low %v450_v48, %v458_v49  ;;  %v466_v15 = vld [vmem:[#allocation2 + $0xc30] sm:$0xff] }
 0x212   :  { %v474_v16 = vld [vmem:[#allocation2 + $0xc70] sm:$0xff] }
 0x213   :  { %3814 = vmatpush1.bf16.msra.mxu0 %v8085_v1  ;;  %3900 = vmatpush1.bf16.msra.mxu1 %v8087_v2 }
 0x214   :  { %3815 = vmatprep.subr.bf16.mxu0 %v8102_v4  ;;  %3901 = vmatprep.subr.bf16.mxu1 %v8104_v5  ;;  %v8165_v5 = vcombine.low %v434_v34, %v442_v35  ;;  %v8198_v35 = vcombine.high %v466_v15, %v474_v16 }
 0x217   :  { %3816 = vmatpush1.bf16.msra.mxu0 %v8101_v10  ;;  %3902 = vmatpush1.bf16.msra.mxu1 %v8103_v29  ;;  %v8182_v10 = vcombine.high %v450_v48, %v458_v49  ;;  %v498_v49 = vld [vmem:[#allocation2 + $0xd30] sm:$0xff] }
 0x218   :  { %3817 = vmatprep.subr.bf16.mxu0 %v8118_v11  ;;  %3903 = vmatprep.subr.bf16.mxu1 %v8120_v12 }
 0x21b   :  { %3818 = vmatpush1.bf16.msra.mxu0 %v8117_v17  ;;  %3904 = vmatpush1.bf16.msra.mxu1 %v8119_v18 }
 0x21c   :  { %3819 = vmatprep.subr.bf16.mxu0 %v8134_v19  ;;  %3905 = vmatprep.subr.bf16.mxu1 %v8136_v36  ;;  %v8183_v36 = vcombine.low %v451_v55, %v459_v57 }
 0x21f   :  { %3820 = vmatpush1.bf16.msra.mxu0 %v8133_v26  ;;  %3906 = vmatpush1.bf16.msra.mxu1 %v8135_v30 }
 0x220   :  { %3821 = vmatprep.subr.bf16.mxu0 %v8150_v32  ;;  %3907 = vmatprep.subr.bf16.mxu1 %v8152_v33 }
 0x221   :  { %v3501_v45 = vpop.f32.mrb[4].mxu0  ;;  %v3587_v51 = vpop.f32.mrb[4].mxu1 }
 0x222   :  { %v8833_v50 = vadd.f32 %v3501_v45, %v611_v37  ;;  %v3503_v52 = vpop.f32.mrb[5].mxu0  ;;  %v8837_v0 = vadd.f32 %v3587_v51, %v619_v40  ;;  %v3589_v2 = vpop.f32.mrb[5].mxu1  ;;  %v8199_v45 = vcombine.low %v467_v20, %v475_v21  ;;  %v499_v51 = vld [vmem:[#allocation2 + $0xd38] sm:$0xff] }
 0x223   :  { %v8834_v1 = vadd.f32 %v3503_v52, %v615_v41  ;;  %v3505_v4 = vpop.f32.mrb[6].mxu0  ;;  %3822 = vmatpush1.bf16.msra.mxu0 %v8149_v42  ;;  %v8838_v6 = vadd.f32 %v3589_v2, %v623_v43  ;;  %v3591_v8 = vpop.f32.mrb[6].mxu1  ;;  %3908 = vmatpush1.bf16.msra.mxu1 %v8151_v44  ;;  %v491_v44 = vld [vmem:[#allocation2 + $0xcf8] sm:$0xff]  ;;  %v514_v2 = vld [vmem:[#allocation2 + $0xdb0] sm:$0xff] }
 0x224   :  { %v8835_v7 = vadd.f32 %v3505_v4, %v611_v37  ;;  %v3507_v9 = vpop.f32.mrb[7].mxu0  ;;  %3823 = vmatprep.subr.bf16.mxu0 %v8166_v56  ;;  %v8839_v29 = vadd.f32 %v3591_v8, %v619_v40  ;;  %v3593_v12 = vpop.f32.mrb[7].mxu1  ;;  %3909 = vmatprep.subr.bf16.mxu1 %v8168_v46  ;;  %v3944_v17 = vmax.f32 %v8833_v50, 0.0  ;;  %v3946_v23 = vmax.f32 %v8837_v0, 0.0  ;;  %v482_v40 = vld [vmem:[#allocation2 + $0xcb0] sm:$0xff]  ;;  %v507_v52 = vld [vmem:[#allocation2 + $0xd78] sm:$0xff] }
 0x225   :  { %v8836_v11 = vadd.f32 %v3507_v9, %v615_v41  ;;  %v8840_v19 = vadd.f32 %v3593_v12, %v623_v43  ;;  %v3945_v25 = vmax.f32 %v8834_v1, 0.0  ;;  %v3947_v32 = vmax.f32 %v8838_v6, 0.0  ;;  %v490_v41 = vld [vmem:[#allocation2 + $0xcf0] sm:$0xff]  ;;  %v483_v43 = vld [vmem:[#allocation2 + $0xcb8] sm:$0xff] }
 0x226   :  { %v3960_v18 = vmax.f32 %v8835_v7, 0.0  ;;  %v3962_v26 = vmax.f32 %v8839_v29, 0.0  ;;  %v8197_v56 = vcombine.low %v466_v15, %v474_v16  ;;  %v8214_v46 = vcombine.high %v482_v40, %v490_v41  ;;  %v506_v50 = vld [vmem:[#allocation2 + $0xd70] sm:$0xff]  ;;  %v539_v12 = vld [vmem:[#allocation2 + $0xe78] sm:$0xff] }
 0x227   :  { %v3961_v30 = vmax.f32 %v8836_v11, 0.0  ;;  %3824 = vmatpush1.bf16.msra.mxu0 %v8165_v5  ;;  %v3963_v34 = vmax.f32 %v8840_v19, 0.0  ;;  %3910 = vmatpush1.bf16.msra.mxu1 %v8167_v59  ;;  %v8216_v48 = vcombine.high %v483_v43, %v491_v44  ;;  %v8213_v55 = vcombine.low %v482_v40, %v490_v41  ;;  %v522_v4 = vld [vmem:[#allocation2 + $0xdf0] sm:$0xff]  ;;  %v515_v5 = vld [vmem:[#allocation2 + $0xdb8] sm:$0xff] }
 0x228   :  { %v10066_v33 = vpack.c.bf16 %v3960_v18, %v3944_v17  ;;  %3825 = vmatprep.subr.bf16.mxu0 %v8182_v10  ;;  %v10068_v37 = vpack.c.bf16 %v3962_v26, %v3946_v23  ;;  %3911 = vmatprep.subr.bf16.mxu1 %v8184_v14  ;;  %v8215_v57 = vcombine.low %v483_v43, %v491_v44  ;;  %v523_v59 = vld [vmem:[#allocation2 + $0xdf8] sm:$0xff]  ;;  %v530_v10 = vld [vmem:[#allocation2 + $0xe30] sm:$0xff] }
 0x229   :  { %v10070_v38 = vpack.c.bf16 %v3961_v30, %v3945_v25  ;;  %v10072_v42 = vpack.c.bf16 %v3963_v34, %v3947_v32  ;;  %v8230_v0 = vcombine.high %v498_v49, %v506_v50  ;;  %v8232_v1 = vcombine.high %v499_v51, %v507_v52  ;;  %v538_v29 = vld [vmem:[#allocation2 + $0xe70] sm:$0xff]  ;;  %v531_v11 = vld [vmem:[#allocation2 + $0xe38] sm:$0xff] }
 0x22a   :  { %v8229_v6 = vcombine.low %v498_v49, %v506_v50  ;;  %v8231_v7 = vcombine.low %v499_v51, %v507_v52  ;;  %v8246_v8 = vcombine.high %v514_v2, %v522_v4  ;;  %v8248_v9 = vcombine.high %v515_v5, %v523_v59  ;;  %v546_v17 = vld [vmem:[#allocation2 + $0xeb0] sm:$0xff]  ;;  %v547_v19 = vld [vmem:[#allocation2 + $0xeb8] sm:$0xff] }
 0x22b   :  { %3826 = vmatpush1.bf16.msra.mxu0 %v8181_v13  ;;  %3912 = vmatpush1.bf16.msra.mxu1 %v8183_v36  ;;  %v8245_v13 = vcombine.low %v514_v2, %v522_v4  ;;  %v8247_v14 = vcombine.low %v515_v5, %v523_v59  ;;  %v8262_v15 = vcombine.high %v530_v10, %v538_v29  ;;  %v554_v18 = vld [vmem:[#allocation2 + $0xef0] sm:$0xff]  ;;  %v555_v36 = vld [vmem:[#allocation2 + $0xef8] sm:$0xff] }
 0x22c   :  { %3827 = vmatprep.subr.bf16.mxu0 %v8198_v35  ;;  %3913 = vmatprep.subr.bf16.mxu1 %v8200_v39  ;;  %v8264_v16 = vcombine.high %v531_v11, %v539_v12  ;;  %v8261_v20 = vcombine.low %v530_v10, %v538_v29  ;;  %v8263_v21 = vcombine.low %v531_v11, %v539_v12  ;;  %v562_v26 = vld [vmem:[#allocation2 + $0xf30] sm:$0xff]  ;;  %v563_v32 = vld [vmem:[#allocation2 + $0xf38] sm:$0xff] }
 0x22d   :  { %v8278_v23 = vcombine.high %v546_v17, %v554_v18  ;;  %v8280_v25 = vcombine.high %v547_v19, %v555_v36  ;;  %v570_v30 = vld [vmem:[#allocation2 + $0xf70] sm:$0xff]  ;;  %v571_v34 = vld [vmem:[#allocation2 + $0xf78] sm:$0xff]  ;;  %v8277_v35 = vcombine.low %v546_v17, %v554_v18  ;;  %v8279_v39 = vcombine.low %v547_v19, %v555_v36 }
 0x22e   :  { %v8294_v40 = vcombine.high %v562_v26, %v570_v30  ;;  %v8296_v41 = vcombine.high %v563_v32, %v571_v34  ;;  %v578_v43 = vld [vmem:[#allocation2 + $0xfb0] sm:$0xff]  ;;  %v8981_v4 = vld [vmem:[#allocation7 + $0x2c] ss:$16 sps:$4 sm:$0xff]   ;;  %v8979_v59 = vld [vmem:[#allocation7 + $0x28] ss:$16 sps:$4 sm:$0xff]  }
 0x22f   :  { %3828 = vmatpush1.bf16.msra.mxu0 %v8197_v56  ;;  %3914 = vmatpush1.bf16.msra.mxu1 %v8199_v45  ;;  %v586_v44 = vld [vmem:[#allocation2 + $0xff0] sm:$0xff]  ;;  %v579_v56 = vld [vmem:[#allocation2 + $0xfb8] sm:$0xff] }
 0x230   :  { %3829 = vmatprep.subr.bf16.mxu0 %v8214_v46  ;;  %3915 = vmatprep.subr.bf16.mxu1 %v8216_v48  ;;  %v587_v45 = vld [vmem:[#allocation2 + $0xff8] sm:$0xff]  ;;  %v8293_v46 = vcombine.low %v562_v26, %v570_v30  ;;  %v8295_v48 = vcombine.low %v563_v32, %v571_v34  ;;  %v8310_v49 = vcombine.high %v578_v43, %v586_v44  ;;  %v8978_v2 = vld [vmem:[#allocation7 + $0x24] ss:$16 sps:$4 sm:$0xff]   ;;  %v8976_v5 = vld [vmem:[#allocation7 + $0x20] ss:$16 sps:$4 sm:$0xff]  }
 0x231   :  { %v8312_v50 = vcombine.high %v579_v56, %v587_v45  ;;  %v8309_v51 = vcombine.low %v578_v43, %v586_v44  ;;  %v8311_v52 = vcombine.low %v579_v56, %v587_v45  ;;  %v8990_v10 = vld [vmem:[#allocation7 + $0x64] ss:$16 sps:$4 sm:$0xff]   ;;  %v8988_v29 = vld [vmem:[#allocation7 + $0x60] ss:$16 sps:$4 sm:$0xff]   ;;  %v8991_v11 = vld [vmem:[#allocation7 + $0x68] ss:$16 sps:$4 sm:$0xff]  }
 0x232   :  { %v8996_v12 = vld [vmem:[#allocation7 + $0x84] ss:$16 sps:$4 sm:$0xff]   ;;  %v9000_v17 = vld [vmem:[#allocation7 + $0xa0] ss:$16 sps:$4 sm:$0xff]   ;;  %v9003_v18 = vld [vmem:[#allocation7 + $0xa8] ss:$16 sps:$4 sm:$0xff]  }
 0x233   :  { %3830 = vmatpush1.bf16.msra.mxu0 %v8213_v55  ;;  %3916 = vmatpush1.bf16.msra.mxu1 %v8215_v57  ;;  %v8972_v55 = vld [vmem:[#allocation7 + $0x4] ss:$16 sps:$4 sm:$0xff]   ;;  %v8975_v57 = vld [vmem:[#allocation7 + $0xc] ss:$16 sps:$4 sm:$0xff]   ;;  %v9012_v26 = vld [vmem:[#allocation7 + $0xe0] ss:$16 sps:$4 sm:$0xff]  }
 0x234   :  { %3831 = vmatprep.subr.bf16.mxu0 %v8230_v0  ;;  %3917 = vmatprep.subr.bf16.mxu1 %v8232_v1  ;;  %v8970_v0 = vld [vmem:[#allocation7] ss:$16 sps:$4 sm:$0xff]   ;;  %v8973_v1 = vld [vmem:[#allocation7 + $0x8] ss:$16 sps:$4 sm:$0xff]   ;;  %v9008_v19 = vld [vmem:[#allocation7 + $0xc4] ss:$16 sps:$4 sm:$0xff]  }
 0x235   :  { %v9011_v36 = vld [vmem:[#allocation7 + $0xcc] ss:$16 sps:$4 sm:$0xff]   ;;  %v9015_v30 = vld [vmem:[#allocation7 + $0xe8] ss:$16 sps:$4 sm:$0xff]   ;;  %v9020_v32 = vld [vmem:[#allocation7 + $0x104] ss:$16 sps:$4 sm:$0xff]  }
 0x236   :  { %v9023_v34 = vld [vmem:[#allocation7 + $0x10c] ss:$16 sps:$4 sm:$0xff]   ;;  %v9024_v43 = vld [vmem:[#allocation7 + $0x120] ss:$16 sps:$4 sm:$0xff]   ;;  %v9027_v44 = vld [vmem:[#allocation7 + $0x128] ss:$16 sps:$4 sm:$0xff]  }
 0x237   :  { %3832 = vmatpush1.bf16.msra.mxu0 %v8229_v6  ;;  %3918 = vmatpush1.bf16.msra.mxu1 %v8231_v7  ;;  %v8984_v6 = vld [vmem:[#allocation7 + $0x44] ss:$16 sps:$4 sm:$0xff]   ;;  %v8987_v7 = vld [vmem:[#allocation7 + $0x4c] ss:$16 sps:$4 sm:$0xff]  }
 0x238   :  { %3833 = vmatprep.subr.bf16.mxu0 %v8246_v8  ;;  %3919 = vmatprep.subr.bf16.mxu1 %v8248_v9  ;;  %v8982_v8 = vld [vmem:[#allocation7 + $0x40] ss:$16 sps:$4 sm:$0xff]   ;;  %v8985_v9 = vld [vmem:[#allocation7 + $0x48] ss:$16 sps:$4 sm:$0xff]   ;;  %v9032_v56 = vld [vmem:[#allocation7 + $0x144] ss:$16 sps:$4 sm:$0xff]  }
 0x239   :  { %v9035_v45 = vld [vmem:[#allocation7 + $0x14c] ss:$16 sps:$4 sm:$0xff]  }
 0x23b   :  { %3834 = vmatpush1.bf16.msra.mxu0 %v8245_v13  ;;  %3920 = vmatpush1.bf16.msra.mxu1 %v8247_v14  ;;  %v8999_v13 = vld [vmem:[#allocation7 + $0x8c] ss:$16 sps:$4 sm:$0xff]   ;;  %v8997_v14 = vld [vmem:[#allocation7 + $0x88] ss:$16 sps:$4 sm:$0xff]  }
 0x23c   :  { %3835 = vmatprep.subr.bf16.mxu0 %v8262_v15  ;;  %3921 = vmatprep.subr.bf16.mxu1 %v8264_v16  ;;  %v9002_v15 = vld [vmem:[#allocation7 + $0xa4] ss:$16 sps:$4 sm:$0xff]   ;;  %v9005_v16 = vld [vmem:[#allocation7 + $0xac] ss:$16 sps:$4 sm:$0xff]  }
 0x23f   :  { %3836 = vmatpush1.bf16.msra.mxu0 %v8261_v20  ;;  %3922 = vmatpush1.bf16.msra.mxu1 %v8263_v21  ;;  %v9006_v20 = vld [vmem:[#allocation7 + $0xc0] ss:$16 sps:$4 sm:$0xff]   ;;  %v9009_v21 = vld [vmem:[#allocation7 + $0xc8] ss:$16 sps:$4 sm:$0xff]  }
 0x240   :  { %3837 = vmatprep.subr.bf16.mxu0 %v8278_v23  ;;  %3923 = vmatprep.subr.bf16.mxu1 %v8280_v25  ;;  %v9014_v23 = vld [vmem:[#allocation7 + $0xe4] ss:$16 sps:$4 sm:$0xff]   ;;  %v9017_v25 = vld [vmem:[#allocation7 + $0xec] ss:$16 sps:$4 sm:$0xff]  }
 0x243   :  { %3838 = vmatpush1.bf16.msra.mxu0 %v8277_v35  ;;  %3924 = vmatpush1.bf16.msra.mxu1 %v8279_v39  ;;  %v9018_v35 = vld [vmem:[#allocation7 + $0x100] ss:$16 sps:$4 sm:$0xff]   ;;  %v9021_v39 = vld [vmem:[#allocation7 + $0x108] ss:$16 sps:$4 sm:$0xff]  }
 0x244   :  { %3839 = vmatprep.subr.bf16.mxu0 %v8294_v40  ;;  %3925 = vmatprep.subr.bf16.mxu1 %v8296_v41  ;;  %v9026_v40 = vld [vmem:[#allocation7 + $0x124] ss:$16 sps:$4 sm:$0xff]   ;;  %v9029_v41 = vld [vmem:[#allocation7 + $0x12c] ss:$16 sps:$4 sm:$0xff]  }
 0x247   :  { %3840 = vmatpush1.bf16.msra.mxu0 %v8293_v46  ;;  %3926 = vmatpush1.bf16.msra.mxu1 %v8295_v48  ;;  %v9030_v46 = vld [vmem:[#allocation7 + $0x140] ss:$16 sps:$4 sm:$0xff]   ;;  %v9033_v48 = vld [vmem:[#allocation7 + $0x148] ss:$16 sps:$4 sm:$0xff]  }
 0x248   :  { %3841 = vmatprep.subr.bf16.mxu0 %v8310_v49  ;;  %3927 = vmatprep.subr.bf16.mxu1 %v8312_v50  ;;  %v9038_v49 = vld [vmem:[#allocation7 + $0x164] ss:$16 sps:$4 sm:$0xff]   ;;  %v9041_v50 = vld [vmem:[#allocation7 + $0x16c] ss:$16 sps:$4 sm:$0xff]  }
 0x24b   :  { %3842 = vmatpush1.bf16.msra.mxu0 %v8309_v51  ;;  %3928 = vmatpush1.bf16.msra.mxu1 %v8311_v52  ;;  %v9036_v51 = vld [vmem:[#allocation7 + $0x160] ss:$16 sps:$4 sm:$0xff]   ;;  %v9039_v52 = vld [vmem:[#allocation7 + $0x168] ss:$16 sps:$4 sm:$0xff]  }
 0x24c   :  { %7082 = vmatprep.subr.bf16.mxu0 %v8972_v55  ;;  %7426 = vmatprep.subr.bf16.mxu1 %v8975_v57  ;;  %v9044_v55 = vld [vmem:[#allocation7 + $0x184] ss:$16 sps:$4 sm:$0xff]   ;;  %v9047_v57 = vld [vmem:[#allocation7 + $0x18c] ss:$16 sps:$4 sm:$0xff]  }
 0x24e   :  { %3844 = vmatmul.mubr.bf16.vlgmr.msra.gmra.mrb[12].mxu0 %v10039_v24  ;;  %3930 = vmatmul.mubr.bf16.vlgmr.msra.gmra.mrb[12].mxu1 %v10039_v24  ;;  %v8993_v24 = vld [vmem:[#allocation7 + $0x6c] ss:$16 sps:$4 sm:$0xff]  }
 0x24f   :  { %7083 = vmatpush1.bf16.msra.mxu0 %v8970_v0  ;;  %7114 = vmatprep.mubr.bf16.mxu0 %v10032_v62  ;;  %v9042_v0 = vld [vmem:[#allocation7 + $0x180] ss:$16 sps:$4 sm:$0xff]  }
 0x250   :  { %7427 = vmatpush1.bf16.msra.mxu1 %v8973_v1  ;;  %7458 = vmatprep.mubr.bf16.mxu1 %v10032_v62  ;;  %v8994_v62 = vld [vmem:[#allocation7 + $0x80] ss:$16 sps:$4 sm:$0xff]   ;;  %v9045_v1 = vld [vmem:[#allocation7 + $0x188] ss:$16 sps:$4 sm:$0xff]  }
 0x251   :  { %7084 = vmatprep.subr.bf16.mxu0 %v8978_v2  ;;  %7428 = vmatprep.subr.bf16.mxu1 %v8981_v4  ;;  %v9050_v2 = vld [vmem:[#allocation7 + $0x1a4] ss:$16 sps:$4 sm:$0xff]   ;;  %v9053_v4 = vld [vmem:[#allocation7 + $0x1ac] ss:$16 sps:$4 sm:$0xff]  }
 0x253   :  { %7085 = vmatpush1.bf16.msra.mxu0 %v8976_v5  ;;  %v9048_v5 = vld [vmem:[#allocation7 + $0x1a0] ss:$16 sps:$4 sm:$0xff]  }
 0x254   :  { %7429 = vmatpush1.bf16.msra.mxu1 %v8979_v59  ;;  %7086 = vmatprep.subr.bf16.mxu0 %v8984_v6  ;;  %v9051_v59 = vld [vmem:[#allocation7 + $0x1a8] ss:$16 sps:$4 sm:$0xff]   ;;  %v9056_v6 = vld [vmem:[#allocation7 + $0x1c4] ss:$16 sps:$4 sm:$0xff]  }
 0x255   :  { %7430 = vmatprep.subr.bf16.mxu1 %v8987_v7  ;;  %v9059_v7 = vld [vmem:[#allocation7 + $0x1cc] ss:$16 sps:$4 sm:$0xff]  }
 0x257   :  { %7087 = vmatpush1.bf16.msra.mxu0 %v8982_v8  ;;  %v9054_v8 = vld [vmem:[#allocation7 + $0x1c0] ss:$16 sps:$4 sm:$0xff]  }
 0x258   :  { %7431 = vmatpush1.bf16.msra.mxu1 %v8985_v9  ;;  %7088 = vmatprep.subr.bf16.mxu0 %v8990_v10  ;;  %v9057_v9 = vld [vmem:[#allocation7 + $0x1c8] ss:$16 sps:$4 sm:$0xff]   ;;  %v9062_v10 = vld [vmem:[#allocation7 + $0x1e4] ss:$16 sps:$4 sm:$0xff]  }
 0x259   :  { %7432 = vmatprep.subr.bf16.mxu1 %v8993_v24  ;;  %v9065_v24 = vld [vmem:[#allocation7 + $0x1ec] ss:$16 sps:$4 sm:$0xff]  }
 0x25b   :  { %7089 = vmatpush1.bf16.msra.mxu0 %v8988_v29  ;;  %v9060_v29 = vld [vmem:[#allocation7 + $0x1e0] ss:$16 sps:$4 sm:$0xff]  }
 0x25c   :  { %7433 = vmatpush1.bf16.msra.mxu1 %v8991_v11  ;;  %7090 = vmatprep.subr.bf16.mxu0 %v8996_v12  ;;  %v9063_v11 = vld [vmem:[#allocation7 + $0x1e8] ss:$16 sps:$4 sm:$0xff]   ;;  %v9068_v12 = vld [vmem:[#allocation7 + $0x204] ss:$16 sps:$4 sm:$0xff]  }
 0x25d   :  { %7434 = vmatprep.subr.bf16.mxu1 %v8999_v13  ;;  %v9071_v13 = vld [vmem:[#allocation7 + $0x20c] ss:$16 sps:$4 sm:$0xff]  }
 0x25f   :  { %7091 = vmatpush1.bf16.msra.mxu0 %v8994_v62  ;;  %v9066_v62 = vld [vmem:[#allocation7 + $0x200] ss:$16 sps:$4 sm:$0xff]  }
 0x260   :  { %7435 = vmatpush1.bf16.msra.mxu1 %v8997_v14  ;;  %7092 = vmatprep.subr.bf16.mxu0 %v9002_v15  ;;  %v9069_v14 = vld [vmem:[#allocation7 + $0x208] ss:$16 sps:$4 sm:$0xff]   ;;  %v9074_v15 = vld [vmem:[#allocation7 + $0x224] ss:$16 sps:$4 sm:$0xff]  }
 0x261   :  { %7436 = vmatprep.subr.bf16.mxu1 %v9005_v16  ;;  %v9077_v16 = vld [vmem:[#allocation7 + $0x22c] ss:$16 sps:$4 sm:$0xff]  }
 0x263   :  { %7093 = vmatpush1.bf16.msra.mxu0 %v9000_v17  ;;  %v9072_v17 = vld [vmem:[#allocation7 + $0x220] ss:$16 sps:$4 sm:$0xff]  }
 0x264   :  { %7437 = vmatpush1.bf16.msra.mxu1 %v9003_v18  ;;  %7094 = vmatprep.subr.bf16.mxu0 %v9008_v19  ;;  %v9075_v18 = vld [vmem:[#allocation7 + $0x228] ss:$16 sps:$4 sm:$0xff]   ;;  %v9080_v19 = vld [vmem:[#allocation7 + $0x244] ss:$16 sps:$4 sm:$0xff]  }
 0x265   :  { %7438 = vmatprep.subr.bf16.mxu1 %v9011_v36  ;;  %v9083_v36 = vld [vmem:[#allocation7 + $0x24c] ss:$16 sps:$4 sm:$0xff]  }
 0x267   :  { %7095 = vmatpush1.bf16.msra.mxu0 %v9006_v20  ;;  %v9078_v20 = vld [vmem:[#allocation7 + $0x240] ss:$16 sps:$4 sm:$0xff]  }
 0x268   :  { %7439 = vmatpush1.bf16.msra.mxu1 %v9009_v21  ;;  %7096 = vmatprep.subr.bf16.mxu0 %v9014_v23  ;;  %v9081_v21 = vld [vmem:[#allocation7 + $0x248] ss:$16 sps:$4 sm:$0xff]   ;;  %v9086_v23 = vld [vmem:[#allocation7 + $0x264] ss:$16 sps:$4 sm:$0xff]  }
 0x269   :  { %7440 = vmatprep.subr.bf16.mxu1 %v9017_v25  ;;  %v9084_v25 = vld [vmem:[#allocation7 + $0x260] ss:$16 sps:$4 sm:$0xff]  }
 0x26b   :  { %7097 = vmatpush1.bf16.msra.mxu0 %v9012_v26  ;;  %v9087_v26 = vld [vmem:[#allocation7 + $0x268] ss:$16 sps:$4 sm:$0xff]  }
 0x26c   :  { %7441 = vmatpush1.bf16.msra.mxu1 %v9015_v30  ;;  %7098 = vmatprep.subr.bf16.mxu0 %v9020_v32  ;;  %v9092_v30 = vld [vmem:[#allocation7 + $0x284] ss:$16 sps:$4 sm:$0xff]   ;;  %v9095_v32 = vld [vmem:[#allocation7 + $0x28c] ss:$16 sps:$4 sm:$0xff]  }
 0x26d   :  { %7442 = vmatprep.subr.bf16.mxu1 %v9023_v34  ;;  %v10082_v34 = vld [vmem:[#allocation5 + $0x8] sm:$0xff] }
 0x26f   :  { %7099 = vmatpush1.bf16.msra.mxu0 %v9018_v35  ;;  %v9093_v35 = vld [vmem:[#allocation7 + $0x288] ss:$16 sps:$4 sm:$0xff]  }
 0x270   :  { %7443 = vmatpush1.bf16.msra.mxu1 %v9021_v39  ;;  %7100 = vmatprep.subr.bf16.mxu0 %v9026_v40  ;;  %v9098_v39 = vld [vmem:[#allocation7 + $0x2a4] ss:$16 sps:$4 sm:$0xff]   ;;  %v9101_v40 = vld [vmem:[#allocation7 + $0x2ac] ss:$16 sps:$4 sm:$0xff]  }
 0x271   :  { %7444 = vmatprep.subr.bf16.mxu1 %v9029_v41  ;;  %v627_v41 = vrot.slane %v10082_v34, %v10007_v54 }
 0x273   :  { %7101 = vmatpush1.bf16.msra.mxu0 %v9024_v43  ;;  %v635_v43 = vrot.slane %v10082_v34, %v10012_v60 }
 0x274   :  { %7445 = vmatpush1.bf16.msra.mxu1 %v9027_v44  ;;  %7102 = vmatprep.subr.bf16.mxu0 %v9032_v56  ;;  %v631_v44 = vrot.slane %v10082_v34, %v10015_v61  ;;  %v9096_v56 = vld [vmem:[#allocation7 + $0x2a0] ss:$16 sps:$4 sm:$0xff]  }
 0x275   :  { %7446 = vmatprep.subr.bf16.mxu1 %v9035_v45  ;;  %v639_v45 = vrot.slane %v10082_v34, %v10018_v63 }
 0x277   :  { %7103 = vmatpush1.bf16.msra.mxu0 %v9030_v46  ;;  %v9099_v46 = vld [vmem:[#allocation7 + $0x2a8] ss:$16 sps:$4 sm:$0xff]  }
 0x278   :  { %7447 = vmatpush1.bf16.msra.mxu1 %v9033_v48  ;;  %7104 = vmatprep.subr.bf16.mxu0 %v9038_v49  ;;  %v9104_v48 = vld [vmem:[#allocation7 + $0x2c4] ss:$16 sps:$4 sm:$0xff]  }
 0x279   :  { %7448 = vmatprep.subr.bf16.mxu1 %v9041_v50  ;;  %v9107_v50 = vld [vmem:[#allocation7 + $0x2cc] ss:$16 sps:$4 sm:$0xff]  }
 0x27b   :  { %7105 = vmatpush1.bf16.msra.mxu0 %v9036_v51 }
 0x27c   :  { %7449 = vmatpush1.bf16.msra.mxu1 %v9039_v52  ;;  %7106 = vmatprep.subr.bf16.mxu0 %v9044_v55 }
 0x27d   :  { %7450 = vmatprep.subr.bf16.mxu1 %v9047_v57 }
 0x27f   :  { %7107 = vmatpush1.bf16.msra.mxu0 %v9042_v0 }
 0x280   :  { %7451 = vmatpush1.bf16.msra.mxu1 %v9045_v1  ;;  %7108 = vmatprep.subr.bf16.mxu0 %v9050_v2 }
 0x281   :  { %7452 = vmatprep.subr.bf16.mxu1 %v9053_v4  ;;  %v9102_v4 = vld [vmem:[#allocation7 + $0x2c0] ss:$16 sps:$4 sm:$0xff]  }
 0x283   :  { %7109 = vmatpush1.bf16.msra.mxu0 %v9048_v5 }
 0x284   :  { %7453 = vmatpush1.bf16.msra.mxu1 %v9051_v59  ;;  %7110 = vmatprep.subr.bf16.mxu0 %v9056_v6 }
 0x285   :  { %7454 = vmatprep.subr.bf16.mxu1 %v9059_v7 }
 0x287   :  { %7111 = vmatpush1.bf16.msra.mxu0 %v9054_v8  ;;  %v9105_v8 = vld [vmem:[#allocation7 + $0x2c8] ss:$16 sps:$4 sm:$0xff]  }
 0x288   :  { %7455 = vmatpush1.bf16.msra.mxu1 %v9057_v9  ;;  %7112 = vmatprep.subr.bf16.mxu0 %v9062_v10  ;;  %v9110_v9 = vld [vmem:[#allocation7 + $0x2e4] ss:$16 sps:$4 sm:$0xff]  }
 0x289   :  { %7456 = vmatprep.subr.bf16.mxu1 %v9065_v24 }
 0x28b   :  { %7113 = vmatpush1.bf16.msra.mxu0 %v9060_v29 }
 0x28c   :  { %7457 = vmatpush1.bf16.msra.mxu1 %v9063_v11  ;;  %7125 = vmatprep.subr.bf16.mxu0 %v9068_v12  ;;  %v9113_v11 = vld [vmem:[#allocation7 + $0x2ec] ss:$16 sps:$4 sm:$0xff]  }
 0x28d   :  { %7469 = vmatprep.subr.bf16.mxu1 %v9071_v13 }
 0x28e   :  { %7115 = vmatmul.mubr.bf16.vlgmr.msra.gmra.mrb[16].mxu0 %v10028_v53 }
 0x28f   :  { %7459 = vmatmul.mubr.bf16.vlgmr.msra.gmra.mrb[16].mxu1 %v10028_v53  ;;  %7126 = vmatpush1.bf16.msra.mxu0 %v9066_v62  ;;  %v9089_v53 = vld [vmem:[#allocation7 + $0x26c] ss:$16 sps:$4 sm:$0xff]  }
 0x290   :  { %7157 = vmatprep.mubr.bf16.mxu0 %v10034_v3  ;;  %7470 = vmatpush1.bf16.msra.mxu1 %v9069_v14 }
 0x291   :  { %7501 = vmatprep.mubr.bf16.mxu1 %v10034_v3  ;;  %7127 = vmatprep.subr.bf16.mxu0 %v9074_v15  ;;  %v9090_v3 = vld [vmem:[#allocation7 + $0x280] ss:$16 sps:$4 sm:$0xff]  }
 0x292   :  { %7471 = vmatprep.subr.bf16.mxu1 %v9077_v16 }
 0x293   :  { %7128 = vmatpush1.bf16.msra.mxu0 %v9072_v17 }
 0x294   :  { %7472 = vmatpush1.bf16.msra.mxu1 %v9075_v18  ;;  %7129 = vmatprep.subr.bf16.mxu0 %v9080_v19  ;;  %v9108_v18 = vld [vmem:[#allocation7 + $0x2e0] ss:$16 sps:$4 sm:$0xff]  }
 0x295   :  { %7473 = vmatprep.subr.bf16.mxu1 %v9083_v36 }
 0x297   :  { %7130 = vmatpush1.bf16.msra.mxu0 %v9078_v20 }
 0x298   :  { %7474 = vmatpush1.bf16.msra.mxu1 %v9081_v21  ;;  %7131 = vmatprep.subr.bf16.mxu0 %v9086_v23  ;;  %v9111_v21 = vld [vmem:[#allocation7 + $0x2e8] ss:$16 sps:$4 sm:$0xff]   ;;  %v9116_v23 = vld [vmem:[#allocation7 + $0x304] ss:$16 sps:$4 sm:$0xff]  }
 0x299   :  { %7475 = vmatprep.subr.bf16.mxu1 %v9089_v53 }
 0x29b   :  { %7132 = vmatpush1.bf16.msra.mxu0 %v9084_v25 }
 0x29c   :  { %7476 = vmatpush1.bf16.msra.mxu1 %v9087_v26  ;;  %7133 = vmatprep.subr.bf16.mxu0 %v9092_v30  ;;  %v9119_v26 = vld [vmem:[#allocation7 + $0x30c] ss:$16 sps:$4 sm:$0xff]  }
 0x29d   :  { %7477 = vmatprep.subr.bf16.mxu1 %v9095_v32  ;;  %v9114_v32 = vld [vmem:[#allocation7 + $0x300] ss:$16 sps:$4 sm:$0xff]  }
 0x29f   :  { %7134 = vmatpush1.bf16.msra.mxu0 %v9090_v3  ;;  %v9117_v3 = vld [vmem:[#allocation7 + $0x308] ss:$16 sps:$4 sm:$0xff]  }
 0x2a0   :  { %7478 = vmatpush1.bf16.msra.mxu1 %v9093_v35  ;;  %7135 = vmatprep.subr.bf16.mxu0 %v9098_v39  ;;  %v9122_v35 = vld [vmem:[#allocation7 + $0x324] ss:$16 sps:$4 sm:$0xff]   ;;  %v9125_v39 = vld [vmem:[#allocation7 + $0x32c] ss:$16 sps:$4 sm:$0xff]  }
 0x2a1   :  { %v3673_v49 = vpop.f32.mrb[8].mxu0  ;;  %7479 = vmatprep.subr.bf16.mxu1 %v9101_v40  ;;  %v3759_v52 = vpop.f32.mrb[8].mxu1  ;;  %v9120_v40 = vld [vmem:[#allocation7 + $0x320] ss:$16 sps:$4 sm:$0xff]  }
 0x2a2   :  { %v8841_v51 = vadd.f32 %v3673_v49, %v627_v41  ;;  %v3675_v55 = vpop.f32.mrb[9].mxu0  ;;  %v8845_v57 = vadd.f32 %v3759_v52, %v635_v43  ;;  %v3761_v1 = vpop.f32.mrb[9].mxu1  ;;  %v9132_v49 = vld [vmem:[#allocation7 + $0x360] ss:$16 sps:$4 sm:$0xff]   ;;  %v9143_v52 = vld [vmem:[#allocation7 + $0x38c] ss:$16 sps:$4 sm:$0xff]  }
 0x2a3   :  { %v8842_v0 = vadd.f32 %v3675_v55, %v631_v44  ;;  %v3677_v2 = vpop.f32.mrb[10].mxu0  ;;  %7136 = vmatpush1.bf16.msra.mxu0 %v9096_v56  ;;  %v8846_v5 = vadd.f32 %v3761_v1, %v639_v45  ;;  %v3763_v6 = vpop.f32.mrb[10].mxu1  ;;  %v9126_v56 = vld [vmem:[#allocation7 + $0x340] ss:$16 sps:$4 sm:$0xff]   ;;  %v9149_v1 = vld [vmem:[#allocation7 + $0x3ac] ss:$16 sps:$4 sm:$0xff]  }
 0x2a4   :  { %v8843_v59 = vadd.f32 %v3677_v2, %v627_v41  ;;  %7480 = vmatpush1.bf16.msra.mxu1 %v9099_v46  ;;  %v3679_v7 = vpop.f32.mrb[11].mxu0  ;;  %7137 = vmatprep.subr.bf16.mxu0 %v9104_v48  ;;  %v8847_v10 = vadd.f32 %v3763_v6, %v635_v43  ;;  %v3765_v29 = vpop.f32.mrb[11].mxu1  ;;  %v3948_v12 = vmax.f32 %v8841_v51, 0.0  ;;  %v3950_v14 = vmax.f32 %v8845_v57, 0.0  ;;  %v9123_v41 = vld [vmem:[#allocation7 + $0x328] ss:$16 sps:$4 sm:$0xff]  }
 0x2a5   :  { %v8844_v24 = vadd.f32 %v3679_v7, %v631_v44  ;;  %7481 = vmatprep.subr.bf16.mxu1 %v9107_v50  ;;  %v8848_v62 = vadd.f32 %v3765_v29, %v639_v45  ;;  %v3949_v15 = vmax.f32 %v8842_v0, 0.0  ;;  %v3951_v19 = vmax.f32 %v8846_v5, 0.0  ;;  %v9128_v43 = vld [vmem:[#allocation7 + $0x344] ss:$16 sps:$4 sm:$0xff]   ;;  %v9131_v44 = vld [vmem:[#allocation7 + $0x34c] ss:$16 sps:$4 sm:$0xff]  }
 0x2a6   :  { %v3964_v13 = vmax.f32 %v8843_v59, 0.0  ;;  %v3966_v16 = vmax.f32 %v8847_v10, 0.0  ;;  %v9129_v45 = vld [vmem:[#allocation7 + $0x348] ss:$16 sps:$4 sm:$0xff]   ;;  %v9134_v46 = vld [vmem:[#allocation7 + $0x364] ss:$16 sps:$4 sm:$0xff]  }
 0x2a7   :  { %v3965_v17 = vmax.f32 %v8844_v24, 0.0  ;;  %7138 = vmatpush1.bf16.msra.mxu0 %v9102_v4  ;;  %v3967_v20 = vmax.f32 %v8848_v62, 0.0  ;;  %v9137_v48 = vld [vmem:[#allocation7 + $0x36c] ss:$16 sps:$4 sm:$0xff]   ;;  %v9135_v50 = vld [vmem:[#allocation7 + $0x368] ss:$16 sps:$4 sm:$0xff]  }
 0x2a8   :  { %v10092_v36 = vpack.c.bf16 %v3964_v13, %v3948_v12  ;;  %7482 = vmatpush1.bf16.msra.mxu1 %v9105_v8  ;;  %7139 = vmatprep.subr.bf16.mxu0 %v9110_v9  ;;  %v10094_v53 = vpack.c.bf16 %v3966_v16, %v3950_v14  ;;  %v9140_v51 = vld [vmem:[#allocation7 + $0x384] ss:$16 sps:$4 sm:$0xff]   ;;  %v9138_v55 = vld [vmem:[#allocation7 + $0x380] ss:$16 sps:$4 sm:$0xff]   ;;  %v9141_v57 = vld [vmem:[#allocation7 + $0x388] ss:$16 sps:$4 sm:$0xff]  }
 0x2a9   :  { %v10096_v25 = vpack.c.bf16 %v3965_v17, %v3949_v15  ;;  %7483 = vmatprep.subr.bf16.mxu1 %v9113_v11  ;;  %v10098_v30 = vpack.c.bf16 %v3967_v20, %v3951_v19  ;;  %v9146_v0 = vld [vmem:[#allocation7 + $0x3a4] ss:$16 sps:$4 sm:$0xff]   ;;  %v9144_v2 = vld [vmem:[#allocation7 + $0x3a0] ss:$16 sps:$4 sm:$0xff]   ;;  %v9147_v4 = vld [vmem:[#allocation7 + $0x3a8] ss:$16 sps:$4 sm:$0xff]  }
 0x2aa   :  { %v9152_v5 = vld [vmem:[#allocation7 + $0x3c4] ss:$16 sps:$4 sm:$0xff]   ;;  %v9155_v59 = vld [vmem:[#allocation7 + $0x3cc] ss:$16 sps:$4 sm:$0xff]   ;;  %v9150_v6 = vld [vmem:[#allocation7 + $0x3c0] ss:$16 sps:$4 sm:$0xff]  }
 0x2ab   :  { %7140 = vmatpush1.bf16.msra.mxu0 %v9108_v18  ;;  %v9153_v7 = vld [vmem:[#allocation7 + $0x3c8] ss:$16 sps:$4 sm:$0xff]   ;;  %v9158_v8 = vld [vmem:[#allocation7 + $0x3e4] ss:$16 sps:$4 sm:$0xff]   ;;  %v9161_v9 = vld [vmem:[#allocation7 + $0x3ec] ss:$16 sps:$4 sm:$0xff]  }
 0x2ac   :  { %7484 = vmatpush1.bf16.msra.mxu1 %v9111_v21  ;;  %7141 = vmatprep.subr.bf16.mxu0 %v9116_v23  ;;  %v9156_v10 = vld [vmem:[#allocation7 + $0x3e0] ss:$16 sps:$4 sm:$0xff]   ;;  %v9159_v24 = vld [vmem:[#allocation7 + $0x3e8] ss:$16 sps:$4 sm:$0xff]   ;;  %v9164_v29 = vld [vmem:[#allocation7 + $0x404] ss:$16 sps:$4 sm:$0xff]  }
 0x2ad   :  { %7485 = vmatprep.subr.bf16.mxu1 %v9119_v26  ;;  %v9167_v11 = vld [vmem:[#allocation7 + $0x40c] ss:$16 sps:$4 sm:$0xff]   ;;  %v9162_v12 = vld [vmem:[#allocation7 + $0x400] ss:$16 sps:$4 sm:$0xff]   ;;  %v9165_v13 = vld [vmem:[#allocation7 + $0x408] ss:$16 sps:$4 sm:$0xff]  }
 0x2ae   :  { %v9170_v62 = vld [vmem:[#allocation7 + $0x424] ss:$16 sps:$4 sm:$0xff]   ;;  %v9173_v14 = vld [vmem:[#allocation7 + $0x42c] ss:$16 sps:$4 sm:$0xff]   ;;  %v9168_v15 = vld [vmem:[#allocation7 + $0x420] ss:$16 sps:$4 sm:$0xff]  }
 0x2af   :  { %7142 = vmatpush1.bf16.msra.mxu0 %v9114_v32  ;;  %v9171_v16 = vld [vmem:[#allocation7 + $0x428] ss:$16 sps:$4 sm:$0xff]   ;;  %v9176_v17 = vld [vmem:[#allocation7 + $0x444] ss:$16 sps:$4 sm:$0xff]   ;;  %v9179_v18 = vld [vmem:[#allocation7 + $0x44c] ss:$16 sps:$4 sm:$0xff]  }
 0x2b0   :  { %7486 = vmatpush1.bf16.msra.mxu1 %v9117_v3  ;;  %7143 = vmatprep.subr.bf16.mxu0 %v9122_v35  ;;  %v9174_v19 = vld [vmem:[#allocation7 + $0x440] ss:$16 sps:$4 sm:$0xff]   ;;  %v9177_v20 = vld [vmem:[#allocation7 + $0x448] ss:$16 sps:$4 sm:$0xff]   ;;  %v9182_v21 = vld [vmem:[#allocation7 + $0x464] ss:$16 sps:$4 sm:$0xff]  }
 0x2b1   :  { %7487 = vmatprep.subr.bf16.mxu1 %v9125_v39  ;;  %v9180_v23 = vld [vmem:[#allocation7 + $0x460] ss:$16 sps:$4 sm:$0xff]   ;;  %v9183_v26 = vld [vmem:[#allocation7 + $0x468] ss:$16 sps:$4 sm:$0xff]   ;;  %v9188_v32 = vld [vmem:[#allocation7 + $0x484] ss:$16 sps:$4 sm:$0xff]  }
 0x2b2   :  { %v9191_v3 = vld [vmem:[#allocation7 + $0x48c] ss:$16 sps:$4 sm:$0xff]   ;;  %v9189_v35 = vld [vmem:[#allocation7 + $0x488] ss:$16 sps:$4 sm:$0xff]   ;;  %v9194_v39 = vld [vmem:[#allocation7 + $0x4a4] ss:$16 sps:$4 sm:$0xff]  }
 0x2b3   :  { %7144 = vmatpush1.bf16.msra.mxu0 %v9120_v40  ;;  %v9197_v40 = vld [vmem:[#allocation7 + $0x4ac] ss:$16 sps:$4 sm:$0xff]  }
 0x2b4   :  { %7488 = vmatpush1.bf16.msra.mxu1 %v9123_v41  ;;  %7145 = vmatprep.subr.bf16.mxu0 %v9128_v43  ;;  %v9192_v41 = vld [vmem:[#allocation7 + $0x4a0] ss:$16 sps:$4 sm:$0xff]   ;;  %v9195_v43 = vld [vmem:[#allocation7 + $0x4a8] ss:$16 sps:$4 sm:$0xff]  }
 0x2b5   :  { %7489 = vmatprep.subr.bf16.mxu1 %v9131_v44  ;;  %v9200_v44 = vld [vmem:[#allocation7 + $0x4c4] ss:$16 sps:$4 sm:$0xff]  }
 0x2b7   :  { %7146 = vmatpush1.bf16.msra.mxu0 %v9126_v56  ;;  %v9203_v56 = vld [vmem:[#allocation7 + $0x4cc] ss:$16 sps:$4 sm:$0xff]  }
 0x2b8   :  { %7490 = vmatpush1.bf16.msra.mxu1 %v9129_v45  ;;  %7147 = vmatprep.subr.bf16.mxu0 %v9134_v46  ;;  %v9198_v45 = vld [vmem:[#allocation7 + $0x4c0] ss:$16 sps:$4 sm:$0xff]   ;;  %v9201_v46 = vld [vmem:[#allocation7 + $0x4c8] ss:$16 sps:$4 sm:$0xff]  }
 0x2b9   :  { %7491 = vmatprep.subr.bf16.mxu1 %v9137_v48  ;;  %v9206_v48 = vld [vmem:[#allocation7 + $0x4e4] ss:$16 sps:$4 sm:$0xff]  }
 0x2bb   :  { %7148 = vmatpush1.bf16.msra.mxu0 %v9132_v49  ;;  %v9209_v49 = vld [vmem:[#allocation7 + $0x4ec] ss:$16 sps:$4 sm:$0xff]  }
 0x2bc   :  { %7492 = vmatpush1.bf16.msra.mxu1 %v9135_v50  ;;  %7149 = vmatprep.subr.bf16.mxu0 %v9140_v51  ;;  %v9204_v50 = vld [vmem:[#allocation7 + $0x4e0] ss:$16 sps:$4 sm:$0xff]   ;;  %v9207_v51 = vld [vmem:[#allocation7 + $0x4e8] ss:$16 sps:$4 sm:$0xff]  }
 0x2bd   :  { %7493 = vmatprep.subr.bf16.mxu1 %v9143_v52  ;;  %v9212_v52 = vld [vmem:[#allocation7 + $0x504] ss:$16 sps:$4 sm:$0xff]  }
 0x2bf   :  { %7150 = vmatpush1.bf16.msra.mxu0 %v9138_v55  ;;  %v9215_v55 = vld [vmem:[#allocation7 + $0x50c] ss:$16 sps:$4 sm:$0xff]  }
 0x2c0   :  { %7494 = vmatpush1.bf16.msra.mxu1 %v9141_v57  ;;  %7151 = vmatprep.subr.bf16.mxu0 %v9146_v0  ;;  %v9210_v57 = vld [vmem:[#allocation7 + $0x500] ss:$16 sps:$4 sm:$0xff]   ;;  %v9213_v0 = vld [vmem:[#allocation7 + $0x508] ss:$16 sps:$4 sm:$0xff]  }
 0x2c1   :  { %7495 = vmatprep.subr.bf16.mxu1 %v9149_v1  ;;  %v9218_v1 = vld [vmem:[#allocation7 + $0x524] ss:$16 sps:$4 sm:$0xff]  }
 0x2c3   :  { %7152 = vmatpush1.bf16.msra.mxu0 %v9144_v2  ;;  %v9221_v2 = vld [vmem:[#allocation7 + $0x52c] ss:$16 sps:$4 sm:$0xff]  }
 0x2c4   :  { %7496 = vmatpush1.bf16.msra.mxu1 %v9147_v4  ;;  %7153 = vmatprep.subr.bf16.mxu0 %v9152_v5  ;;  %v9216_v4 = vld [vmem:[#allocation7 + $0x520] ss:$16 sps:$4 sm:$0xff]   ;;  %v9219_v5 = vld [vmem:[#allocation7 + $0x528] ss:$16 sps:$4 sm:$0xff]  }
 0x2c5   :  { %7497 = vmatprep.subr.bf16.mxu1 %v9155_v59  ;;  %v9224_v59 = vld [vmem:[#allocation7 + $0x544] ss:$16 sps:$4 sm:$0xff]  }
 0x2c7   :  { %7154 = vmatpush1.bf16.msra.mxu0 %v9150_v6  ;;  %v9227_v6 = vld [vmem:[#allocation7 + $0x54c] ss:$16 sps:$4 sm:$0xff]  }
 0x2c8   :  { %7498 = vmatpush1.bf16.msra.mxu1 %v9153_v7  ;;  %7155 = vmatprep.subr.bf16.mxu0 %v9158_v8  ;;  %v9222_v7 = vld [vmem:[#allocation7 + $0x540] ss:$16 sps:$4 sm:$0xff]   ;;  %v9225_v8 = vld [vmem:[#allocation7 + $0x548] ss:$16 sps:$4 sm:$0xff]  }
 0x2c9   :  { %7499 = vmatprep.subr.bf16.mxu1 %v9161_v9  ;;  %v9230_v9 = vld [vmem:[#allocation7 + $0x564] ss:$16 sps:$4 sm:$0xff]  }
 0x2cb   :  { %7156 = vmatpush1.bf16.msra.mxu0 %v9156_v10  ;;  %v9233_v10 = vld [vmem:[#allocation7 + $0x56c] ss:$16 sps:$4 sm:$0xff]  }
 0x2cc   :  { %7500 = vmatpush1.bf16.msra.mxu1 %v9159_v24  ;;  %7168 = vmatprep.subr.bf16.mxu0 %v9164_v29  ;;  %v9228_v24 = vld [vmem:[#allocation7 + $0x560] ss:$16 sps:$4 sm:$0xff]   ;;  %v9231_v29 = vld [vmem:[#allocation7 + $0x568] ss:$16 sps:$4 sm:$0xff]  }
 0x2cd   :  { %7512 = vmatprep.subr.bf16.mxu1 %v9167_v11  ;;  %v9236_v11 = vld [vmem:[#allocation7 + $0x584] ss:$16 sps:$4 sm:$0xff]  }
 0x2ce   :  { %7158 = vmatmul.mubr.bf16.vlgmr.msra.gmra.mrb[16].mxu0 %v10030_v58 }
 0x2cf   :  { %7502 = vmatmul.mubr.bf16.vlgmr.msra.gmra.mrb[16].mxu1 %v10030_v58  ;;  %7169 = vmatpush1.bf16.msra.mxu0 %v9162_v12  ;;  %v9185_v58 = vld [vmem:[#allocation7 + $0x46c] ss:$16 sps:$4 sm:$0xff]  }
 0x2d0   :  { %7200 = vmatprep.mubr.bf16.mxu0 %v10070_v38  ;;  %7513 = vmatpush1.bf16.msra.mxu1 %v9165_v13  ;;  %v9239_v12 = vld [vmem:[#allocation7 + $0x58c] ss:$16 sps:$4 sm:$0xff]   ;;  %v9234_v13 = vld [vmem:[#allocation7 + $0x580] ss:$16 sps:$4 sm:$0xff]  }
 0x2d1   :  { %7544 = vmatprep.mubr.bf16.mxu1 %v10070_v38  ;;  %7170 = vmatprep.subr.bf16.mxu0 %v9170_v62  ;;  %v9186_v38 = vld [vmem:[#allocation7 + $0x480] ss:$16 sps:$4 sm:$0xff]   ;;  %v9237_v62 = vld [vmem:[#allocation7 + $0x588] ss:$16 sps:$4 sm:$0xff]  }
 0x2d2   :  { %7514 = vmatprep.subr.bf16.mxu1 %v9173_v14  ;;  %v9242_v14 = vld [vmem:[#allocation7 + $0x5a4] ss:$16 sps:$4 sm:$0xff]  }
 0x2d3   :  { %7171 = vmatpush1.bf16.msra.mxu0 %v9168_v15  ;;  %v9245_v15 = vld [vmem:[#allocation7 + $0x5ac] ss:$16 sps:$4 sm:$0xff]  }
 0x2d4   :  { %7515 = vmatpush1.bf16.msra.mxu1 %v9171_v16  ;;  %7172 = vmatprep.subr.bf16.mxu0 %v9176_v17  ;;  %v9240_v16 = vld [vmem:[#allocation7 + $0x5a0] ss:$16 sps:$4 sm:$0xff]   ;;  %v9243_v17 = vld [vmem:[#allocation7 + $0x5a8] ss:$16 sps:$4 sm:$0xff]  }
 0x2d5   :  { %7516 = vmatprep.subr.bf16.mxu1 %v9179_v18  ;;  %v9248_v18 = vld [vmem:[#allocation7 + $0x5c4] ss:$16 sps:$4 sm:$0xff]  }
 0x2d7   :  { %7173 = vmatpush1.bf16.msra.mxu0 %v9174_v19  ;;  %v9251_v19 = vld [vmem:[#allocation7 + $0x5cc] ss:$16 sps:$4 sm:$0xff]  }
 0x2d8   :  { %7517 = vmatpush1.bf16.msra.mxu1 %v9177_v20  ;;  %7174 = vmatprep.subr.bf16.mxu0 %v9182_v21  ;;  %v9246_v20 = vld [vmem:[#allocation7 + $0x5c0] ss:$16 sps:$4 sm:$0xff]   ;;  %v9249_v21 = vld [vmem:[#allocation7 + $0x5c8] ss:$16 sps:$4 sm:$0xff]  }
 0x2d9   :  { %7518 = vmatprep.subr.bf16.mxu1 %v9185_v58  ;;  %v9254_v58 = vld [vmem:[#allocation7 + $0x5e4] ss:$16 sps:$4 sm:$0xff]  }
 0x2db   :  { %7175 = vmatpush1.bf16.msra.mxu0 %v9180_v23  ;;  %v9257_v23 = vld [vmem:[#allocation7 + $0x5ec] ss:$16 sps:$4 sm:$0xff]  }
 0x2dc   :  { %7519 = vmatpush1.bf16.msra.mxu1 %v9183_v26  ;;  %7176 = vmatprep.subr.bf16.mxu0 %v9188_v32  ;;  %v9252_v26 = vld [vmem:[#allocation7 + $0x5e0] ss:$16 sps:$4 sm:$0xff]   ;;  %v9255_v32 = vld [vmem:[#allocation7 + $0x5e8] ss:$16 sps:$4 sm:$0xff]  }
 0x2dd   :  { %7520 = vmatprep.subr.bf16.mxu1 %v9191_v3  ;;  %v9260_v3 = vld [vmem:[#allocation7 + $0x604] ss:$16 sps:$4 sm:$0xff]  }
 0x2df   :  { %7177 = vmatpush1.bf16.msra.mxu0 %v9186_v38  ;;  %v9263_v38 = vld [vmem:[#allocation7 + $0x60c] ss:$16 sps:$4 sm:$0xff]  }
 0x2e0   :  { %7521 = vmatpush1.bf16.msra.mxu1 %v9189_v35  ;;  %7178 = vmatprep.subr.bf16.mxu0 %v9194_v39  ;;  %v9258_v35 = vld [vmem:[#allocation7 + $0x600] ss:$16 sps:$4 sm:$0xff]   ;;  %v9261_v39 = vld [vmem:[#allocation7 + $0x608] ss:$16 sps:$4 sm:$0xff]  }
 0x2e1   :  { %7522 = vmatprep.subr.bf16.mxu1 %v9197_v40  ;;  %v9266_v40 = vld [vmem:[#allocation7 + $0x624] ss:$16 sps:$4 sm:$0xff]  }
 0x2e3   :  { %7179 = vmatpush1.bf16.msra.mxu0 %v9192_v41  ;;  %v9269_v41 = vld [vmem:[#allocation7 + $0x62c] ss:$16 sps:$4 sm:$0xff]  }
 0x2e4   :  { %7523 = vmatpush1.bf16.msra.mxu1 %v9195_v43  ;;  %7180 = vmatprep.subr.bf16.mxu0 %v9200_v44  ;;  %v9264_v43 = vld [vmem:[#allocation7 + $0x620] ss:$16 sps:$4 sm:$0xff]   ;;  %v9267_v44 = vld [vmem:[#allocation7 + $0x628] ss:$16 sps:$4 sm:$0xff]  }
 0x2e5   :  { %7524 = vmatprep.subr.bf16.mxu1 %v9203_v56  ;;  %v9272_v56 = vld [vmem:[#allocation7 + $0x644] ss:$16 sps:$4 sm:$0xff]  }
 0x2e7   :  { %7181 = vmatpush1.bf16.msra.mxu0 %v9198_v45  ;;  %v9275_v45 = vld [vmem:[#allocation7 + $0x64c] ss:$16 sps:$4 sm:$0xff]  }
 0x2e8   :  { %7525 = vmatpush1.bf16.msra.mxu1 %v9201_v46  ;;  %7182 = vmatprep.subr.bf16.mxu0 %v9206_v48  ;;  %v9270_v46 = vld [vmem:[#allocation7 + $0x640] ss:$16 sps:$4 sm:$0xff]   ;;  %v9273_v48 = vld [vmem:[#allocation7 + $0x648] ss:$16 sps:$4 sm:$0xff]  }
 0x2e9   :  { %7526 = vmatprep.subr.bf16.mxu1 %v9209_v49  ;;  %v9278_v49 = vld [vmem:[#allocation7 + $0x664] ss:$16 sps:$4 sm:$0xff]  }
 0x2eb   :  { %7183 = vmatpush1.bf16.msra.mxu0 %v9204_v50  ;;  %v9276_v50 = vld [vmem:[#allocation7 + $0x660] ss:$16 sps:$4 sm:$0xff]  }
 0x2ec   :  { %7527 = vmatpush1.bf16.msra.mxu1 %v9207_v51  ;;  %7184 = vmatprep.subr.bf16.mxu0 %v9212_v52  ;;  %v9279_v51 = vld [vmem:[#allocation7 + $0x668] ss:$16 sps:$4 sm:$0xff]   ;;  %v9284_v52 = vld [vmem:[#allocation7 + $0x684] ss:$16 sps:$4 sm:$0xff]  }
 0x2ed   :  { %7528 = vmatprep.subr.bf16.mxu1 %v9215_v55  ;;  %v9287_v55 = vld [vmem:[#allocation7 + $0x68c] ss:$16 sps:$4 sm:$0xff]  }
 0x2ef   :  { %7185 = vmatpush1.bf16.msra.mxu0 %v9210_v57  ;;  %v9285_v57 = vld [vmem:[#allocation7 + $0x688] ss:$16 sps:$4 sm:$0xff]  }
 0x2f0   :  { %7529 = vmatpush1.bf16.msra.mxu1 %v9213_v0  ;;  %7186 = vmatprep.subr.bf16.mxu0 %v9218_v1  ;;  %v9290_v0 = vld [vmem:[#allocation7 + $0x6a4] ss:$16 sps:$4 sm:$0xff]   ;;  %v9293_v1 = vld [vmem:[#allocation7 + $0x6ac] ss:$16 sps:$4 sm:$0xff]  }
 0x2f1   :  { %7530 = vmatprep.subr.bf16.mxu1 %v9221_v2  ;;  %v643_v2 = vrot.slane %v10082_v34, %v610_v22  ;;  %v9299_v22 = vld [vmem:[#allocation7 + $0x6cc] ss:$16 sps:$4 sm:$0xff]  }
 0x2f3   :  { %7187 = vmatpush1.bf16.msra.mxu0 %v9216_v4  ;;  %v651_v4 = vrot.slane %v10082_v34, %v618_v27 }
 0x2f4   :  { %7531 = vmatpush1.bf16.msra.mxu1 %v9219_v5  ;;  %7188 = vmatprep.subr.bf16.mxu0 %v9224_v59  ;;  %v647_v5 = vrot.slane %v10082_v34, %v614_v28  ;;  %v9288_v59 = vld [vmem:[#allocation7 + $0x6a0] ss:$16 sps:$4 sm:$0xff]  }
 0x2f5   :  { %7532 = vmatprep.subr.bf16.mxu1 %v9227_v6  ;;  %v655_v6 = vrot.slane %v10082_v34, %v622_v31  ;;  %v9294_v28 = vld [vmem:[#allocation7 + $0x6c0] ss:$16 sps:$4 sm:$0xff]   ;;  %v9297_v34 = vld [vmem:[#allocation7 + $0x6c8] ss:$16 sps:$4 sm:$0xff]  }
 0x2f7   :  { %7189 = vmatpush1.bf16.msra.mxu0 %v9222_v7  ;;  %v9291_v7 = vld [vmem:[#allocation7 + $0x6a8] ss:$16 sps:$4 sm:$0xff]  }
 0x2f8   :  { %7533 = vmatpush1.bf16.msra.mxu1 %v9225_v8  ;;  %7190 = vmatprep.subr.bf16.mxu0 %v9230_v9  ;;  %v9296_v8 = vld [vmem:[#allocation7 + $0x6c4] ss:$16 sps:$4 sm:$0xff]  }
 0x2f9   :  { %7534 = vmatprep.subr.bf16.mxu1 %v9233_v10 }
 0x2fb   :  { %7191 = vmatpush1.bf16.msra.mxu0 %v9228_v24 }
 0x2fc   :  { %7535 = vmatpush1.bf16.msra.mxu1 %v9231_v29  ;;  %7192 = vmatprep.subr.bf16.mxu0 %v9236_v11 }
 0x2fd   :  { %7536 = vmatprep.subr.bf16.mxu1 %v9239_v12 }
 0x2ff   :  { %7193 = vmatpush1.bf16.msra.mxu0 %v9234_v13 }
 0x300   :  { %7537 = vmatpush1.bf16.msra.mxu1 %v9237_v62  ;;  %7194 = vmatprep.subr.bf16.mxu0 %v9242_v14 }
 0x301   :  { %7538 = vmatprep.subr.bf16.mxu1 %v9245_v15  ;;  %v9302_v15 = vld [vmem:[#allocation7 + $0x6e4] ss:$16 sps:$4 sm:$0xff]  }
 0x303   :  { %7195 = vmatpush1.bf16.msra.mxu0 %v9240_v16 }
 0x304   :  { %7539 = vmatpush1.bf16.msra.mxu1 %v9243_v17  ;;  %7196 = vmatprep.subr.bf16.mxu0 %v9248_v18 }
 0x305   :  { %7540 = vmatprep.subr.bf16.mxu1 %v9251_v19  ;;  %v9305_v19 = vld [vmem:[#allocation7 + $0x6ec] ss:$16 sps:$4 sm:$0xff]  }
 0x307   :  { %7197 = vmatpush1.bf16.msra.mxu0 %v9246_v20 }
 0x308   :  { %7541 = vmatpush1.bf16.msra.mxu1 %v9249_v21  ;;  %7198 = vmatprep.subr.bf16.mxu0 %v9254_v58 }
 0x309   :  { %7542 = vmatprep.subr.bf16.mxu1 %v9257_v23 }
 0x30b   :  { %7199 = vmatpush1.bf16.msra.mxu0 %v9252_v26 }
 0x30c   :  { %7543 = vmatpush1.bf16.msra.mxu1 %v9255_v32  ;;  %7211 = vmatprep.subr.bf16.mxu0 %v9260_v3 }
 0x30d   :  { %7555 = vmatprep.subr.bf16.mxu1 %v9263_v38  ;;  %v9300_v38 = vld [vmem:[#allocation7 + $0x6e0] ss:$16 sps:$4 sm:$0xff]  }
 0x30e   :  { %7201 = vmatmul.mubr.bf16.vlgmr.msra.gmra.mrb[16].mxu0 %v10066_v33 }
 0x30f   :  { %7545 = vmatmul.mubr.bf16.vlgmr.msra.gmra.mrb[16].mxu1 %v10066_v33  ;;  %7212 = vmatpush1.bf16.msra.mxu0 %v9258_v35  ;;  %v9281_v33 = vld [vmem:[#allocation7 + $0x66c] ss:$16 sps:$4 sm:$0xff]  }
 0x310   :  { %7243 = vmatprep.mubr.bf16.mxu0 %v10072_v42  ;;  %7556 = vmatpush1.bf16.msra.mxu1 %v9261_v39 }
 0x311   :  { %7587 = vmatprep.mubr.bf16.mxu1 %v10072_v42  ;;  %7213 = vmatprep.subr.bf16.mxu0 %v9266_v40  ;;  %v9282_v42 = vld [vmem:[#allocation7 + $0x680] ss:$16 sps:$4 sm:$0xff]  }
 0x312   :  { %7557 = vmatprep.subr.bf16.mxu1 %v9269_v41  ;;  %v9303_v41 = vld [vmem:[#allocation7 + $0x6e8] ss:$16 sps:$4 sm:$0xff]  }
 0x313   :  { %7214 = vmatpush1.bf16.msra.mxu0 %v9264_v43  ;;  %v9308_v43 = vld [vmem:[#allocation7 + $0x704] ss:$16 sps:$4 sm:$0xff]  }
 0x314   :  { %7558 = vmatpush1.bf16.msra.mxu1 %v9267_v44  ;;  %7215 = vmatprep.subr.bf16.mxu0 %v9272_v56 }
 0x315   :  { %7559 = vmatprep.subr.bf16.mxu1 %v9275_v45  ;;  %v9311_v45 = vld [vmem:[#allocation7 + $0x70c] ss:$16 sps:$4 sm:$0xff]  }
 0x317   :  { %7216 = vmatpush1.bf16.msra.mxu0 %v9270_v46 }
 0x318   :  { %7560 = vmatpush1.bf16.msra.mxu1 %v9273_v48  ;;  %7217 = vmatprep.subr.bf16.mxu0 %v9278_v49  ;;  %v9306_v48 = vld [vmem:[#allocation7 + $0x700] ss:$16 sps:$4 sm:$0xff]   ;;  %v9309_v49 = vld [vmem:[#allocation7 + $0x708] ss:$16 sps:$4 sm:$0xff]  }
 0x319   :  { %7561 = vmatprep.subr.bf16.mxu1 %v9281_v33  ;;  %v9314_v33 = vld [vmem:[#allocation7 + $0x724] ss:$16 sps:$4 sm:$0xff]  }
 0x31b   :  { %7218 = vmatpush1.bf16.msra.mxu0 %v9276_v50  ;;  %v9317_v50 = vld [vmem:[#allocation7 + $0x72c] ss:$16 sps:$4 sm:$0xff]  }
 0x31c   :  { %7562 = vmatpush1.bf16.msra.mxu1 %v9279_v51  ;;  %7219 = vmatprep.subr.bf16.mxu0 %v9284_v52  ;;  %v9312_v51 = vld [vmem:[#allocation7 + $0x720] ss:$16 sps:$4 sm:$0xff]   ;;  %v9315_v52 = vld [vmem:[#allocation7 + $0x728] ss:$16 sps:$4 sm:$0xff]  }
 0x31d   :  { %7563 = vmatprep.subr.bf16.mxu1 %v9287_v55  ;;  %v9320_v55 = vld [vmem:[#allocation7 + $0x744] ss:$16 sps:$4 sm:$0xff]  }
 0x31f   :  { %7220 = vmatpush1.bf16.msra.mxu0 %v9282_v42  ;;  %v9323_v42 = vld [vmem:[#allocation7 + $0x74c] ss:$16 sps:$4 sm:$0xff]  }
 0x320   :  { %7564 = vmatpush1.bf16.msra.mxu1 %v9285_v57  ;;  %7221 = vmatprep.subr.bf16.mxu0 %v9290_v0  ;;  %v9318_v57 = vld [vmem:[#allocation7 + $0x740] ss:$16 sps:$4 sm:$0xff]   ;;  %v9321_v0 = vld [vmem:[#allocation7 + $0x748] ss:$16 sps:$4 sm:$0xff]  }
 0x321   :  { %v3845_v9 = vpop.f32.mrb[12].mxu0  ;;  %7565 = vmatprep.subr.bf16.mxu1 %v9293_v1  ;;  %v3931_v24 = vpop.f32.mrb[12].mxu1  ;;  %v9326_v1 = vld [vmem:[#allocation7 + $0x764] ss:$16 sps:$4 sm:$0xff]  }
 0x322   :  { %v8849_v10 = vadd.f32 %v3845_v9, %v643_v2  ;;  %v3847_v29 = vpop.f32.mrb[13].mxu0  ;;  %v8853_v27 = vadd.f32 %v3931_v24, %v651_v4  ;;  %v3933_v12 = vpop.f32.mrb[13].mxu1  ;;  %v9338_v9 = vld [vmem:[#allocation7 + $0x7a4] ss:$16 sps:$4 sm:$0xff]   ;;  %v9339_v24 = vld [vmem:[#allocation7 + $0x7a8] ss:$16 sps:$4 sm:$0xff]  }
 0x323   :  { %v8850_v11 = vadd.f32 %v3847_v29, %v647_v5  ;;  %v3849_v13 = vpop.f32.mrb[14].mxu0  ;;  %7222 = vmatpush1.bf16.msra.mxu0 %v9288_v59  ;;  %v8854_v62 = vadd.f32 %v3933_v12, %v655_v6  ;;  %v3935_v47 = vpop.f32.mrb[14].mxu1  ;;  %v9332_v59 = vld [vmem:[#allocation7 + $0x784] ss:$16 sps:$4 sm:$0xff]   ;;  %v9345_v12 = vld [vmem:[#allocation7 + $0x7c8] ss:$16 sps:$4 sm:$0xff]  }
 0x324   :  { %v8851_v14 = vadd.f32 %v3849_v13, %v643_v2  ;;  %7566 = vmatpush1.bf16.msra.mxu1 %v9291_v7  ;;  %v3851_v31 = vpop.f32.mrb[15].mxu0  ;;  %7223 = vmatprep.subr.bf16.mxu0 %v9296_v8  ;;  %v8855_v16 = vadd.f32 %v3935_v47, %v651_v4  ;;  %v3937_v18 = vpop.f32.mrb[15].mxu1  ;;  %v3952_v20 = vmax.f32 %v8849_v10, 0.0  ;;  %v3954_v23 = vmax.f32 %v8853_v27, 0.0  ;;  %v9329_v2 = vld [vmem:[#allocation7 + $0x76c] ss:$16 sps:$4 sm:$0xff]  }
 0x325   :  { %v8852_v17 = vadd.f32 %v3851_v31, %v647_v5  ;;  %7567 = vmatprep.subr.bf16.mxu1 %v9299_v22  ;;  %v8856_v58 = vadd.f32 %v3937_v18, %v655_v6  ;;  %v3953_v26 = vmax.f32 %v8850_v11, 0.0  ;;  %v3955_v35 = vmax.f32 %v8854_v62, 0.0  ;;  %v9324_v4 = vld [vmem:[#allocation7 + $0x760] ss:$16 sps:$4 sm:$0xff]   ;;  %v9327_v5 = vld [vmem:[#allocation7 + $0x768] ss:$16 sps:$4 sm:$0xff]  }
 0x326   :  { %v3968_v21 = vmax.f32 %v8851_v14, 0.0  ;;  %v3970_v32 = vmax.f32 %v8855_v16, 0.0  ;;  %v9335_v6 = vld [vmem:[#allocation7 + $0x78c] ss:$16 sps:$4 sm:$0xff]   ;;  %v9330_v7 = vld [vmem:[#allocation7 + $0x780] ss:$16 sps:$4 sm:$0xff]  }
 0x327   :  { %v3969_v3 = vmax.f32 %v8852_v17, 0.0  ;;  %7224 = vmatpush1.bf16.msra.mxu0 %v9294_v28  ;;  %v3971_v40 = vmax.f32 %v8856_v58, 0.0  ;;  %v9333_v8 = vld [vmem:[#allocation7 + $0x788] ss:$16 sps:$4 sm:$0xff]   ;;  %v9341_v22 = vld [vmem:[#allocation7 + $0x7ac] ss:$16 sps:$4 sm:$0xff]  }
 0x328   :  { %v10120_v39 = vpack.c.bf16 %v3968_v21, %v3952_v20  ;;  %7568 = vmatpush1.bf16.msra.mxu1 %v9297_v34  ;;  %7225 = vmatprep.subr.bf16.mxu0 %v9302_v15  ;;  %v10122_v44 = vpack.c.bf16 %v3970_v32, %v3954_v23  ;;  %v9336_v10 = vld [vmem:[#allocation7 + $0x7a0] ss:$16 sps:$4 sm:$0xff]   ;;  %v9344_v29 = vld [vmem:[#allocation7 + $0x7c4] ss:$16 sps:$4 sm:$0xff]   ;;  %v9347_v27 = vld [vmem:[#allocation7 + $0x7cc] ss:$16 sps:$4 sm:$0xff]  }
 0x329   :  { %v10124_v56 = vpack.c.bf16 %v3969_v3, %v3953_v26  ;;  %7569 = vmatprep.subr.bf16.mxu1 %v9305_v19  ;;  %v10126_v46 = vpack.c.bf16 %v3971_v40, %v3955_v35  ;;  %v9342_v11 = vld [vmem:[#allocation7 + $0x7c0] ss:$16 sps:$4 sm:$0xff]   ;;  %v9350_v13 = vld [vmem:[#allocation7 + $0x7e4] ss:$16 sps:$4 sm:$0xff]   ;;  %v9353_v28 = vld [vmem:[#allocation7 + $0x7ec] ss:$16 sps:$4 sm:$0xff]  }
 0x32a   :  { %v9348_v62 = vld [vmem:[#allocation7 + $0x7e0] ss:$16 sps:$4 sm:$0xff]   ;;  %v9351_v14 = vld [vmem:[#allocation7 + $0x7e8] ss:$16 sps:$4 sm:$0xff]   ;;  %v9356_v47 = vld [vmem:[#allocation7 + $0x804] ss:$16 sps:$4 sm:$0xff]  }
 0x32b   :  { %7226 = vmatpush1.bf16.msra.mxu0 %v9300_v38  ;;  %v9359_v31 = vld [vmem:[#allocation7 + $0x80c] ss:$16 sps:$4 sm:$0xff]   ;;  %v9354_v34 = vld [vmem:[#allocation7 + $0x800] ss:$16 sps:$4 sm:$0xff]   ;;  %v9357_v15 = vld [vmem:[#allocation7 + $0x808] ss:$16 sps:$4 sm:$0xff]  }
 0x32c   :  { %7570 = vmatpush1.bf16.msra.mxu1 %v9303_v41  ;;  %7227 = vmatprep.subr.bf16.mxu0 %v9308_v43  ;;  %v9362_v16 = vld [vmem:[#allocation7 + $0x824] ss:$16 sps:$4 sm:$0xff]   ;;  %v9365_v17 = vld [vmem:[#allocation7 + $0x82c] ss:$16 sps:$4 sm:$0xff]   ;;  %v9360_v18 = vld [vmem:[#allocation7 + $0x820] ss:$16 sps:$4 sm:$0xff]  }
 0x32d   :  { %7571 = vmatprep.subr.bf16.mxu1 %v9311_v45  ;;  %v9363_v19 = vld [vmem:[#allocation7 + $0x828] ss:$16 sps:$4 sm:$0xff]   ;;  %v9368_v20 = vld [vmem:[#allocation7 + $0x844] ss:$16 sps:$4 sm:$0xff]   ;;  %v9371_v21 = vld [vmem:[#allocation7 + $0x84c] ss:$16 sps:$4 sm:$0xff]  }
 0x32e   :  { %v9366_v58 = vld [vmem:[#allocation7 + $0x840] ss:$16 sps:$4 sm:$0xff]   ;;  %v9369_v23 = vld [vmem:[#allocation7 + $0x848] ss:$16 sps:$4 sm:$0xff]   ;;  %v9374_v26 = vld [vmem:[#allocation7 + $0x864] ss:$16 sps:$4 sm:$0xff]  }
 0x32f   :  { %7228 = vmatpush1.bf16.msra.mxu0 %v9306_v48  ;;  %v9372_v32 = vld [vmem:[#allocation7 + $0x860] ss:$16 sps:$4 sm:$0xff]   ;;  %v9375_v3 = vld [vmem:[#allocation7 + $0x868] ss:$16 sps:$4 sm:$0xff]   ;;  %v9380_v38 = vld [vmem:[#allocation7 + $0x884] ss:$16 sps:$4 sm:$0xff]  }
 0x330   :  { %7572 = vmatpush1.bf16.msra.mxu1 %v9309_v49  ;;  %7229 = vmatprep.subr.bf16.mxu0 %v9314_v33  ;;  %v9383_v35 = vld [vmem:[#allocation7 + $0x88c] ss:$16 sps:$4 sm:$0xff]   ;;  %v9381_v40 = vld [vmem:[#allocation7 + $0x888] ss:$16 sps:$4 sm:$0xff]   ;;  %v9386_v41 = vld [vmem:[#allocation7 + $0x8a4] ss:$16 sps:$4 sm:$0xff]  }
 0x331   :  { %7573 = vmatprep.subr.bf16.mxu1 %v9317_v50  ;;  %v9389_v43 = vld [vmem:[#allocation7 + $0x8ac] ss:$16 sps:$4 sm:$0xff]   ;;  %v9384_v45 = vld [vmem:[#allocation7 + $0x8a0] ss:$16 sps:$4 sm:$0xff]   ;;  %v9387_v48 = vld [vmem:[#allocation7 + $0x8a8] ss:$16 sps:$4 sm:$0xff]  }
 0x332   :  { %v9392_v49 = vld [vmem:[#allocation7 + $0x8c4] ss:$16 sps:$4 sm:$0xff]   ;;  %v9395_v33 = vld [vmem:[#allocation7 + $0x8cc] ss:$16 sps:$4 sm:$0xff]   ;;  %v9390_v50 = vld [vmem:[#allocation7 + $0x8c0] ss:$16 sps:$4 sm:$0xff]  }
 0x333   :  { %7230 = vmatpush1.bf16.msra.mxu0 %v9312_v51  ;;  %v9393_v51 = vld [vmem:[#allocation7 + $0x8c8] ss:$16 sps:$4 sm:$0xff]  }
 0x334   :  { %7574 = vmatpush1.bf16.msra.mxu1 %v9315_v52  ;;  %7231 = vmatprep.subr.bf16.mxu0 %v9320_v55  ;;  %v9398_v52 = vld [vmem:[#allocation7 + $0x8e4] ss:$16 sps:$4 sm:$0xff]   ;;  %v9401_v55 = vld [vmem:[#allocation7 + $0x8ec] ss:$16 sps:$4 sm:$0xff]  }
 0x335   :  { %7575 = vmatprep.subr.bf16.mxu1 %v9323_v42  ;;  %v9396_v42 = vld [vmem:[#allocation7 + $0x8e0] ss:$16 sps:$4 sm:$0xff]  }
 0x337   :  { %7232 = vmatpush1.bf16.msra.mxu0 %v9318_v57  ;;  %v9399_v57 = vld [vmem:[#allocation7 + $0x8e8] ss:$16 sps:$4 sm:$0xff]  }
 0x338   :  { %7576 = vmatpush1.bf16.msra.mxu1 %v9321_v0  ;;  %7233 = vmatprep.subr.bf16.mxu0 %v9326_v1  ;;  %v9404_v0 = vld [vmem:[#allocation7 + $0x904] ss:$16 sps:$4 sm:$0xff]   ;;  %v9407_v1 = vld [vmem:[#allocation7 + $0x90c] ss:$16 sps:$4 sm:$0xff]  }
 0x339   :  { %7577 = vmatprep.subr.bf16.mxu1 %v9329_v2  ;;  %v9402_v2 = vld [vmem:[#allocation7 + $0x900] ss:$16 sps:$4 sm:$0xff]  }
 0x33b   :  { %7234 = vmatpush1.bf16.msra.mxu0 %v9324_v4  ;;  %v9405_v4 = vld [vmem:[#allocation7 + $0x908] ss:$16 sps:$4 sm:$0xff]  }
 0x33c   :  { %7578 = vmatpush1.bf16.msra.mxu1 %v9327_v5  ;;  %7235 = vmatprep.subr.bf16.mxu0 %v9332_v59  ;;  %v9410_v5 = vld [vmem:[#allocation7 + $0x924] ss:$16 sps:$4 sm:$0xff]   ;;  %v9413_v59 = vld [vmem:[#allocation7 + $0x92c] ss:$16 sps:$4 sm:$0xff]  }
 0x33d   :  { %7579 = vmatprep.subr.bf16.mxu1 %v9335_v6  ;;  %v9408_v6 = vld [vmem:[#allocation7 + $0x920] ss:$16 sps:$4 sm:$0xff]  }
 0x33f   :  { %7236 = vmatpush1.bf16.msra.mxu0 %v9330_v7  ;;  %v9411_v7 = vld [vmem:[#allocation7 + $0x928] ss:$16 sps:$4 sm:$0xff]  }
 0x340   :  { %7580 = vmatpush1.bf16.msra.mxu1 %v9333_v8  ;;  %7237 = vmatprep.subr.bf16.mxu0 %v9338_v9  ;;  %v9416_v8 = vld [vmem:[#allocation7 + $0x944] ss:$16 sps:$4 sm:$0xff]   ;;  %v9419_v9 = vld [vmem:[#allocation7 + $0x94c] ss:$16 sps:$4 sm:$0xff]  }
 0x341   :  { %7581 = vmatprep.subr.bf16.mxu1 %v9341_v22  ;;  %v9414_v22 = vld [vmem:[#allocation7 + $0x940] ss:$16 sps:$4 sm:$0xff]  }
 0x343   :  { %7238 = vmatpush1.bf16.msra.mxu0 %v9336_v10  ;;  %v9417_v10 = vld [vmem:[#allocation7 + $0x948] ss:$16 sps:$4 sm:$0xff]  }
 0x344   :  { %7582 = vmatpush1.bf16.msra.mxu1 %v9339_v24  ;;  %7239 = vmatprep.subr.bf16.mxu0 %v9344_v29  ;;  %v9422_v24 = vld [vmem:[#allocation7 + $0x964] ss:$16 sps:$4 sm:$0xff]   ;;  %v9425_v29 = vld [vmem:[#allocation7 + $0x96c] ss:$16 sps:$4 sm:$0xff]  }
 0x345   :  { %7583 = vmatprep.subr.bf16.mxu1 %v9347_v27  ;;  %v9420_v27 = vld [vmem:[#allocation7 + $0x960] ss:$16 sps:$4 sm:$0xff]  }
 0x347   :  { %7240 = vmatpush1.bf16.msra.mxu0 %v9342_v11  ;;  %v9423_v11 = vld [vmem:[#allocation7 + $0x968] ss:$16 sps:$4 sm:$0xff]  }
 0x348   :  { %7584 = vmatpush1.bf16.msra.mxu1 %v9345_v12  ;;  %7241 = vmatprep.subr.bf16.mxu0 %v9350_v13  ;;  %v9428_v12 = vld [vmem:[#allocation7 + $0x984] ss:$16 sps:$4 sm:$0xff]   ;;  %v9431_v13 = vld [vmem:[#allocation7 + $0x98c] ss:$16 sps:$4 sm:$0xff]  }
 0x349   :  { %7585 = vmatprep.subr.bf16.mxu1 %v9353_v28  ;;  %v9426_v28 = vld [vmem:[#allocation7 + $0x980] ss:$16 sps:$4 sm:$0xff]  }
 0x34b   :  { %7242 = vmatpush1.bf16.msra.mxu0 %v9348_v62  ;;  %v9429_v62 = vld [vmem:[#allocation7 + $0x988] ss:$16 sps:$4 sm:$0xff]  }
 0x34c   :  { %7586 = vmatpush1.bf16.msra.mxu1 %v9351_v14  ;;  %7254 = vmatprep.subr.bf16.mxu0 %v9356_v47  ;;  %v9434_v14 = vld [vmem:[#allocation7 + $0x9a4] ss:$16 sps:$4 sm:$0xff]   ;;  %v9437_v47 = vld [vmem:[#allocation7 + $0x9ac] ss:$16 sps:$4 sm:$0xff]  }
 0x34d   :  { %7598 = vmatprep.subr.bf16.mxu1 %v9359_v31  ;;  %v9432_v31 = vld [vmem:[#allocation7 + $0x9a0] ss:$16 sps:$4 sm:$0xff]  }
 0x34e   :  { %7244 = vmatmul.mubr.bf16.vlgmr.msra.gmra.mrb[16].mxu0 %v10068_v37 }
 0x34f   :  { %7588 = vmatmul.mubr.bf16.vlgmr.msra.gmra.mrb[16].mxu1 %v10068_v37  ;;  %7255 = vmatpush1.bf16.msra.mxu0 %v9354_v34  ;;  %v9377_v37 = vld [vmem:[#allocation7 + $0x86c] ss:$16 sps:$4 sm:$0xff]   ;;  %v9435_v34 = vld [vmem:[#allocation7 + $0x9a8] ss:$16 sps:$4 sm:$0xff]  }
 0x350   :  { %7286 = vmatprep.mubr.bf16.mxu0 %v10096_v25  ;;  %7599 = vmatpush1.bf16.msra.mxu1 %v9357_v15  ;;  %v9440_v15 = vld [vmem:[#allocation7 + $0x9c4] ss:$16 sps:$4 sm:$0xff]  }
 0x351   :  { %7630 = vmatprep.mubr.bf16.mxu1 %v10096_v25  ;;  %7256 = vmatprep.subr.bf16.mxu0 %v9362_v16  ;;  %v9378_v25 = vld [vmem:[#allocation7 + $0x880] ss:$16 sps:$4 sm:$0xff]   ;;  %v9443_v16 = vld [vmem:[#allocation7 + $0x9cc] ss:$16 sps:$4 sm:$0xff]  }
 0x352   :  { %7600 = vmatprep.subr.bf16.mxu1 %v9365_v17  ;;  %v9438_v17 = vld [vmem:[#allocation7 + $0x9c0] ss:$16 sps:$4 sm:$0xff]  }
 0x353   :  { %7257 = vmatpush1.bf16.msra.mxu0 %v9360_v18  ;;  %v9441_v18 = vld [vmem:[#allocation7 + $0x9c8] ss:$16 sps:$4 sm:$0xff]  }
 0x354   :  { %7601 = vmatpush1.bf16.msra.mxu1 %v9363_v19  ;;  %7258 = vmatprep.subr.bf16.mxu0 %v9368_v20  ;;  %v9446_v19 = vld [vmem:[#allocation7 + $0x9e4] ss:$16 sps:$4 sm:$0xff]   ;;  %v9449_v20 = vld [vmem:[#allocation7 + $0x9ec] ss:$16 sps:$4 sm:$0xff]  }
 0x355   :  { %7602 = vmatprep.subr.bf16.mxu1 %v9371_v21  ;;  %v9444_v21 = vld [vmem:[#allocation7 + $0x9e0] ss:$16 sps:$4 sm:$0xff]  }
 0x357   :  { %7259 = vmatpush1.bf16.msra.mxu0 %v9366_v58  ;;  %v9447_v58 = vld [vmem:[#allocation7 + $0x9e8] ss:$16 sps:$4 sm:$0xff]  }
 0x358   :  { %7603 = vmatpush1.bf16.msra.mxu1 %v9369_v23  ;;  %7260 = vmatprep.subr.bf16.mxu0 %v9374_v26  ;;  %v9452_v23 = vld [vmem:[#allocation7 + $0xa04] ss:$16 sps:$4 sm:$0xff]   ;;  %v9455_v26 = vld [vmem:[#allocation7 + $0xa0c] ss:$16 sps:$4 sm:$0xff]  }
 0x359   :  { %7604 = vmatprep.subr.bf16.mxu1 %v9377_v37  ;;  %v9450_v37 = vld [vmem:[#allocation7 + $0xa00] ss:$16 sps:$4 sm:$0xff]  }
 0x35b   :  { %7261 = vmatpush1.bf16.msra.mxu0 %v9372_v32  ;;  %v9453_v32 = vld [vmem:[#allocation7 + $0xa08] ss:$16 sps:$4 sm:$0xff]  }
 0x35c   :  { %7605 = vmatpush1.bf16.msra.mxu1 %v9375_v3  ;;  %7262 = vmatprep.subr.bf16.mxu0 %v9380_v38  ;;  %v9458_v3 = vld [vmem:[#allocation7 + $0xa24] ss:$16 sps:$4 sm:$0xff]   ;;  %v9461_v38 = vld [vmem:[#allocation7 + $0xa2c] ss:$16 sps:$4 sm:$0xff]  }
 0x35d   :  { %7606 = vmatprep.subr.bf16.mxu1 %v9383_v35  ;;  %v9456_v35 = vld [vmem:[#allocation7 + $0xa20] ss:$16 sps:$4 sm:$0xff]  }
 0x35f   :  { %7263 = vmatpush1.bf16.msra.mxu0 %v9378_v25  ;;  %v9459_v25 = vld [vmem:[#allocation7 + $0xa28] ss:$16 sps:$4 sm:$0xff]  }
 0x360   :  { %7607 = vmatpush1.bf16.msra.mxu1 %v9381_v40  ;;  %7264 = vmatprep.subr.bf16.mxu0 %v9386_v41  ;;  %v9464_v40 = vld [vmem:[#allocation7 + $0xa44] ss:$16 sps:$4 sm:$0xff]   ;;  %v9467_v41 = vld [vmem:[#allocation7 + $0xa4c] ss:$16 sps:$4 sm:$0xff]  }
 0x361   :  { %7608 = vmatprep.subr.bf16.mxu1 %v9389_v43  ;;  %v9462_v43 = vld [vmem:[#allocation7 + $0xa40] ss:$16 sps:$4 sm:$0xff]  }
 0x363   :  { %7265 = vmatpush1.bf16.msra.mxu0 %v9384_v45  ;;  %v9465_v45 = vld [vmem:[#allocation7 + $0xa48] ss:$16 sps:$4 sm:$0xff]  }
 0x364   :  { %7609 = vmatpush1.bf16.msra.mxu1 %v9387_v48  ;;  %7266 = vmatprep.subr.bf16.mxu0 %v9392_v49  ;;  %v9470_v48 = vld [vmem:[#allocation7 + $0xa64] ss:$16 sps:$4 sm:$0xff]   ;;  %v9468_v49 = vld [vmem:[#allocation7 + $0xa60] ss:$16 sps:$4 sm:$0xff]  }
 0x365   :  { %7610 = vmatprep.subr.bf16.mxu1 %v9395_v33  ;;  %v9471_v33 = vld [vmem:[#allocation7 + $0xa68] ss:$16 sps:$4 sm:$0xff]  }
 0x367   :  { %7267 = vmatpush1.bf16.msra.mxu0 %v9390_v50  ;;  %v9476_v50 = vld [vmem:[#allocation7 + $0xa84] ss:$16 sps:$4 sm:$0xff]  }
 0x368   :  { %7611 = vmatpush1.bf16.msra.mxu1 %v9393_v51  ;;  %7268 = vmatprep.subr.bf16.mxu0 %v9398_v52  ;;  %v9479_v51 = vld [vmem:[#allocation7 + $0xa8c] ss:$16 sps:$4 sm:$0xff]   ;;  %v9477_v52 = vld [vmem:[#allocation7 + $0xa88] ss:$16 sps:$4 sm:$0xff]  }
 0x369   :  { %7612 = vmatprep.subr.bf16.mxu1 %v9401_v55  ;;  %v9482_v55 = vld [vmem:[#allocation7 + $0xaa4] ss:$16 sps:$4 sm:$0xff]  }
 0x36b   :  { %7269 = vmatpush1.bf16.msra.mxu0 %v9396_v42  ;;  %v9485_v42 = vld [vmem:[#allocation7 + $0xaac] ss:$16 sps:$4 sm:$0xff]  }
 0x36c   :  { %7613 = vmatpush1.bf16.msra.mxu1 %v9399_v57  ;;  %7270 = vmatprep.subr.bf16.mxu0 %v9404_v0  ;;  %v9480_v57 = vld [vmem:[#allocation7 + $0xaa0] ss:$16 sps:$4 sm:$0xff]   ;;  %v9483_v0 = vld [vmem:[#allocation7 + $0xaa8] ss:$16 sps:$4 sm:$0xff]  }
 0x36d   :  { %7614 = vmatprep.subr.bf16.mxu1 %v9407_v1  ;;  %v9488_v1 = vld [vmem:[#allocation7 + $0xac4] ss:$16 sps:$4 sm:$0xff]  }
 0x36f   :  { %7271 = vmatpush1.bf16.msra.mxu0 %v9402_v2  ;;  %v9491_v2 = vld [vmem:[#allocation7 + $0xacc] ss:$16 sps:$4 sm:$0xff]  }
 0x370   :  { %7615 = vmatpush1.bf16.msra.mxu1 %v9405_v4  ;;  %7272 = vmatprep.subr.bf16.mxu0 %v9410_v5  ;;  %v9486_v4 = vld [vmem:[#allocation7 + $0xac0] ss:$16 sps:$4 sm:$0xff]   ;;  %v9489_v5 = vld [vmem:[#allocation7 + $0xac8] ss:$16 sps:$4 sm:$0xff]  }
 0x371   :  { %7616 = vmatprep.subr.bf16.mxu1 %v9413_v59  ;;  %v9494_v59 = vld [vmem:[#allocation7 + $0xae4] ss:$16 sps:$4 sm:$0xff]  }
 0x373   :  { %7273 = vmatpush1.bf16.msra.mxu0 %v9408_v6  ;;  %v9497_v6 = vld [vmem:[#allocation7 + $0xaec] ss:$16 sps:$4 sm:$0xff]  }
 0x374   :  { %7617 = vmatpush1.bf16.msra.mxu1 %v9411_v7  ;;  %7274 = vmatprep.subr.bf16.mxu0 %v9416_v8  ;;  %v9492_v7 = vld [vmem:[#allocation7 + $0xae0] ss:$16 sps:$4 sm:$0xff]   ;;  %v9495_v8 = vld [vmem:[#allocation7 + $0xae8] ss:$16 sps:$4 sm:$0xff]  }
 0x375   :  { %7618 = vmatprep.subr.bf16.mxu1 %v9419_v9  ;;  %v9500_v9 = vld [vmem:[#allocation7 + $0xb04] ss:$16 sps:$4 sm:$0xff]  }
 0x377   :  { %7275 = vmatpush1.bf16.msra.mxu0 %v9414_v22  ;;  %v9503_v22 = vld [vmem:[#allocation7 + $0xb0c] ss:$16 sps:$4 sm:$0xff]  }
 0x378   :  { %7619 = vmatpush1.bf16.msra.mxu1 %v9417_v10  ;;  %7276 = vmatprep.subr.bf16.mxu0 %v9422_v24  ;;  %v9498_v10 = vld [vmem:[#allocation7 + $0xb00] ss:$16 sps:$4 sm:$0xff]   ;;  %v9501_v24 = vld [vmem:[#allocation7 + $0xb08] ss:$16 sps:$4 sm:$0xff]  }
 0x379   :  { %7620 = vmatprep.subr.bf16.mxu1 %v9425_v29  ;;  %v9506_v29 = vld [vmem:[#allocation7 + $0xb24] ss:$16 sps:$4 sm:$0xff]  }
 0x37b   :  { %7277 = vmatpush1.bf16.msra.mxu0 %v9420_v27  ;;  %v9509_v27 = vld [vmem:[#allocation7 + $0xb2c] ss:$16 sps:$4 sm:$0xff]  }
 0x37c   :  { %7621 = vmatpush1.bf16.msra.mxu1 %v9423_v11  ;;  %7278 = vmatprep.subr.bf16.mxu0 %v9428_v12  ;;  %v9504_v11 = vld [vmem:[#allocation7 + $0xb20] ss:$16 sps:$4 sm:$0xff]   ;;  %v9507_v12 = vld [vmem:[#allocation7 + $0xb28] ss:$16 sps:$4 sm:$0xff]  }
 0x37d   :  { %7622 = vmatprep.subr.bf16.mxu1 %v9431_v13  ;;  %v9512_v13 = vld [vmem:[#allocation7 + $0xb44] ss:$16 sps:$4 sm:$0xff]  }
 0x37f   :  { %7279 = vmatpush1.bf16.msra.mxu0 %v9426_v28  ;;  %v9515_v28 = vld [vmem:[#allocation7 + $0xb4c] ss:$16 sps:$4 sm:$0xff]  }
 0x380   :  { %7623 = vmatpush1.bf16.msra.mxu1 %v9429_v62  ;;  %7280 = vmatprep.subr.bf16.mxu0 %v9434_v14  ;;  %v9510_v62 = vld [vmem:[#allocation7 + $0xb40] ss:$16 sps:$4 sm:$0xff]   ;;  %v9513_v14 = vld [vmem:[#allocation7 + $0xb48] ss:$16 sps:$4 sm:$0xff]  }
 0x381   :  { %7624 = vmatprep.subr.bf16.mxu1 %v9437_v47  ;;  %v9518_v47 = vld [vmem:[#allocation7 + $0xb64] ss:$16 sps:$4 sm:$0xff]  }
 0x383   :  { %7281 = vmatpush1.bf16.msra.mxu0 %v9432_v31  ;;  %v9521_v31 = vld [vmem:[#allocation7 + $0xb6c] ss:$16 sps:$4 sm:$0xff]  }
 0x384   :  { %7625 = vmatpush1.bf16.msra.mxu1 %v9435_v34  ;;  %7282 = vmatprep.subr.bf16.mxu0 %v9440_v15  ;;  %v9516_v34 = vld [vmem:[#allocation7 + $0xb60] ss:$16 sps:$4 sm:$0xff]   ;;  %v9519_v15 = vld [vmem:[#allocation7 + $0xb68] ss:$16 sps:$4 sm:$0xff]  }
 0x385   :  { %7626 = vmatprep.subr.bf16.mxu1 %v9443_v16  ;;  %v9524_v16 = vld [vmem:[#allocation7 + $0xb84] ss:$16 sps:$4 sm:$0xff]  }
 0x387   :  { %7283 = vmatpush1.bf16.msra.mxu0 %v9438_v17  ;;  %v9527_v17 = vld [vmem:[#allocation7 + $0xb8c] ss:$16 sps:$4 sm:$0xff]  }
 0x388   :  { %7627 = vmatpush1.bf16.msra.mxu1 %v9441_v18  ;;  %7284 = vmatprep.subr.bf16.mxu0 %v9446_v19  ;;  %v9522_v18 = vld [vmem:[#allocation7 + $0xb80] ss:$16 sps:$4 sm:$0xff]   ;;  %v9525_v19 = vld [vmem:[#allocation7 + $0xb88] ss:$16 sps:$4 sm:$0xff]  }
 0x389   :  { %7628 = vmatprep.subr.bf16.mxu1 %v9449_v20  ;;  %v9530_v20 = vld [vmem:[#allocation7 + $0xba4] ss:$16 sps:$4 sm:$0xff]  }
 0x38b   :  { %7285 = vmatpush1.bf16.msra.mxu0 %v9444_v21  ;;  %v9533_v21 = vld [vmem:[#allocation7 + $0xbac] ss:$16 sps:$4 sm:$0xff]  }
 0x38c   :  { %7629 = vmatpush1.bf16.msra.mxu1 %v9447_v58  ;;  %7297 = vmatprep.subr.bf16.mxu0 %v9452_v23  ;;  %v9528_v58 = vld [vmem:[#allocation7 + $0xba0] ss:$16 sps:$4 sm:$0xff]   ;;  %v9531_v23 = vld [vmem:[#allocation7 + $0xba8] ss:$16 sps:$4 sm:$0xff]  }
 0x38d   :  { %7641 = vmatprep.subr.bf16.mxu1 %v9455_v26  ;;  %v9536_v26 = vld [vmem:[#allocation7 + $0xbc4] ss:$16 sps:$4 sm:$0xff]  }
 0x38e   :  { %7287 = vmatmul.mubr.bf16.vlgmr.msra.gmra.mrb[16].mxu0 %v10092_v36 }
 0x38f   :  { %7631 = vmatmul.mubr.bf16.vlgmr.msra.gmra.mrb[16].mxu1 %v10092_v36  ;;  %7298 = vmatpush1.bf16.msra.mxu0 %v9450_v37  ;;  %v9473_v36 = vld [vmem:[#allocation7 + $0xa6c] ss:$16 sps:$4 sm:$0xff]  }
 0x390   :  { %7329 = vmatprep.mubr.bf16.mxu0 %v10098_v30  ;;  %7642 = vmatpush1.bf16.msra.mxu1 %v9453_v32  ;;  %v9539_v37 = vld [vmem:[#allocation7 + $0xbcc] ss:$16 sps:$4 sm:$0xff]   ;;  %v9534_v32 = vld [vmem:[#allocation7 + $0xbc0] ss:$16 sps:$4 sm:$0xff]  }
 0x391   :  { %7673 = vmatprep.mubr.bf16.mxu1 %v10098_v30  ;;  %7299 = vmatprep.subr.bf16.mxu0 %v9458_v3  ;;  %v9474_v30 = vld [vmem:[#allocation7 + $0xa80] ss:$16 sps:$4 sm:$0xff]   ;;  %v9537_v3 = vld [vmem:[#allocation7 + $0xbc8] ss:$16 sps:$4 sm:$0xff]  }
 0x392   :  { %7643 = vmatprep.subr.bf16.mxu1 %v9461_v38  ;;  %v9542_v38 = vld [vmem:[#allocation7 + $0xbe4] ss:$16 sps:$4 sm:$0xff]  }
 0x393   :  { %7300 = vmatpush1.bf16.msra.mxu0 %v9456_v35  ;;  %v9545_v35 = vld [vmem:[#allocation7 + $0xbec] ss:$16 sps:$4 sm:$0xff]  }
 0x394   :  { %7644 = vmatpush1.bf16.msra.mxu1 %v9459_v25  ;;  %7301 = vmatprep.subr.bf16.mxu0 %v9464_v40  ;;  %v9540_v25 = vld [vmem:[#allocation7 + $0xbe0] ss:$16 sps:$4 sm:$0xff]   ;;  %v9543_v40 = vld [vmem:[#allocation7 + $0xbe8] ss:$16 sps:$4 sm:$0xff]  }
 0x395   :  { %7645 = vmatprep.subr.bf16.mxu1 %v9467_v41  ;;  %v9548_v41 = vld [vmem:[#allocation7 + $0xc04] ss:$16 sps:$4 sm:$0xff]  }
 0x397   :  { %7302 = vmatpush1.bf16.msra.mxu0 %v9462_v43  ;;  %v9551_v43 = vld [vmem:[#allocation7 + $0xc0c] ss:$16 sps:$4 sm:$0xff]  }
 0x398   :  { %7646 = vmatpush1.bf16.msra.mxu1 %v9465_v45  ;;  %7303 = vmatprep.subr.bf16.mxu0 %v9470_v48  ;;  %v9546_v45 = vld [vmem:[#allocation7 + $0xc00] ss:$16 sps:$4 sm:$0xff]   ;;  %v9549_v48 = vld [vmem:[#allocation7 + $0xc08] ss:$16 sps:$4 sm:$0xff]  }
 0x399   :  { %7647 = vmatprep.subr.bf16.mxu1 %v9473_v36  ;;  %v9554_v36 = vld [vmem:[#allocation7 + $0xc24] ss:$16 sps:$4 sm:$0xff]  }
 0x39b   :  { %7304 = vmatpush1.bf16.msra.mxu0 %v9468_v49  ;;  %v9557_v49 = vld [vmem:[#allocation7 + $0xc2c] ss:$16 sps:$4 sm:$0xff]  }
 0x39c   :  { %7648 = vmatpush1.bf16.msra.mxu1 %v9471_v33  ;;  %7305 = vmatprep.subr.bf16.mxu0 %v9476_v50  ;;  %v9552_v33 = vld [vmem:[#allocation7 + $0xc20] ss:$16 sps:$4 sm:$0xff]   ;;  %v9555_v50 = vld [vmem:[#allocation7 + $0xc28] ss:$16 sps:$4 sm:$0xff]  }
 0x39d   :  { %7649 = vmatprep.subr.bf16.mxu1 %v9479_v51  ;;  %v9560_v51 = vld [vmem:[#allocation7 + $0xc44] ss:$16 sps:$4 sm:$0xff]  }
 0x39f   :  { %7306 = vmatpush1.bf16.msra.mxu0 %v9474_v30  ;;  %v9563_v30 = vld [vmem:[#allocation7 + $0xc4c] ss:$16 sps:$4 sm:$0xff]  }
 0x3a0   :  { %7650 = vmatpush1.bf16.msra.mxu1 %v9477_v52  ;;  %7307 = vmatprep.subr.bf16.mxu0 %v9482_v55  ;;  %v9558_v52 = vld [vmem:[#allocation7 + $0xc40] ss:$16 sps:$4 sm:$0xff]   ;;  %v9561_v55 = vld [vmem:[#allocation7 + $0xc48] ss:$16 sps:$4 sm:$0xff]  }
 0x3a1   :  { %7651 = vmatprep.subr.bf16.mxu1 %v9485_v42  ;;  %v9566_v42 = vld [vmem:[#allocation7 + $0xc64] ss:$16 sps:$4 sm:$0xff]  }
 0x3a3   :  { %7308 = vmatpush1.bf16.msra.mxu0 %v9480_v57  ;;  %v9564_v57 = vld [vmem:[#allocation7 + $0xc60] ss:$16 sps:$4 sm:$0xff]  }
 0x3a4   :  { %7652 = vmatpush1.bf16.msra.mxu1 %v9483_v0  ;;  %7309 = vmatprep.subr.bf16.mxu0 %v9488_v1  ;;  %v9567_v0 = vld [vmem:[#allocation7 + $0xc68] ss:$16 sps:$4 sm:$0xff]   ;;  %v9572_v1 = vld [vmem:[#allocation7 + $0xc84] ss:$16 sps:$4 sm:$0xff]  }
 0x3a5   :  { %7653 = vmatprep.subr.bf16.mxu1 %v9491_v2  ;;  %v9575_v2 = vld [vmem:[#allocation7 + $0xc8c] ss:$16 sps:$4 sm:$0xff]  }
 0x3a7   :  { %7310 = vmatpush1.bf16.msra.mxu0 %v9486_v4  ;;  %v9573_v4 = vld [vmem:[#allocation7 + $0xc88] ss:$16 sps:$4 sm:$0xff]  }
 0x3a8   :  { %7654 = vmatpush1.bf16.msra.mxu1 %v9489_v5  ;;  %7311 = vmatprep.subr.bf16.mxu0 %v9494_v59  ;;  %v9578_v5 = vld [vmem:[#allocation7 + $0xca4] ss:$16 sps:$4 sm:$0xff]   ;;  %v9581_v59 = vld [vmem:[#allocation7 + $0xcac] ss:$16 sps:$4 sm:$0xff]  }
 0x3a9   :  { %7655 = vmatprep.subr.bf16.mxu1 %v9497_v6  ;;  %v9576_v6 = vld [vmem:[#allocation7 + $0xca0] ss:$16 sps:$4 sm:$0xff]  }
 0x3ab   :  { %7312 = vmatpush1.bf16.msra.mxu0 %v9492_v7  ;;  %v9579_v7 = vld [vmem:[#allocation7 + $0xca8] ss:$16 sps:$4 sm:$0xff]  }
 0x3ac   :  { %7656 = vmatpush1.bf16.msra.mxu1 %v9495_v8  ;;  %7313 = vmatprep.subr.bf16.mxu0 %v9500_v9  ;;  %v9584_v8 = vld [vmem:[#allocation7 + $0xcc4] ss:$16 sps:$4 sm:$0xff]   ;;  %v9587_v9 = vld [vmem:[#allocation7 + $0xccc] ss:$16 sps:$4 sm:$0xff]  }
 0x3ad   :  { %7657 = vmatprep.subr.bf16.mxu1 %v9503_v22  ;;  %v9582_v22 = vld [vmem:[#allocation7 + $0xcc0] ss:$16 sps:$4 sm:$0xff]  }
 0x3af   :  { %7314 = vmatpush1.bf16.msra.mxu0 %v9498_v10  ;;  %v9585_v10 = vld [vmem:[#allocation7 + $0xcc8] ss:$16 sps:$4 sm:$0xff]  }
 0x3b0   :  { %7658 = vmatpush1.bf16.msra.mxu1 %v9501_v24  ;;  %7315 = vmatprep.subr.bf16.mxu0 %v9506_v29  ;;  %v9590_v24 = vld [vmem:[#allocation7 + $0xce4] ss:$16 sps:$4 sm:$0xff]   ;;  %v9593_v29 = vld [vmem:[#allocation7 + $0xcec] ss:$16 sps:$4 sm:$0xff]  }
 0x3b1   :  { %7659 = vmatprep.subr.bf16.mxu1 %v9509_v27  ;;  %v9588_v27 = vld [vmem:[#allocation7 + $0xce0] ss:$16 sps:$4 sm:$0xff]  }
 0x3b3   :  { %7316 = vmatpush1.bf16.msra.mxu0 %v9504_v11  ;;  %v9591_v11 = vld [vmem:[#allocation7 + $0xce8] ss:$16 sps:$4 sm:$0xff]  }
 0x3b4   :  { %7660 = vmatpush1.bf16.msra.mxu1 %v9507_v12  ;;  %7317 = vmatprep.subr.bf16.mxu0 %v9512_v13  ;;  %v9596_v12 = vld [vmem:[#allocation7 + $0xd04] ss:$16 sps:$4 sm:$0xff]   ;;  %v9599_v13 = vld [vmem:[#allocation7 + $0xd0c] ss:$16 sps:$4 sm:$0xff]  }
 0x3b5   :  { %7661 = vmatprep.subr.bf16.mxu1 %v9515_v28  ;;  %v9594_v28 = vld [vmem:[#allocation7 + $0xd00] ss:$16 sps:$4 sm:$0xff]  }
 0x3b7   :  { %7318 = vmatpush1.bf16.msra.mxu0 %v9510_v62  ;;  %v9597_v62 = vld [vmem:[#allocation7 + $0xd08] ss:$16 sps:$4 sm:$0xff]  }
 0x3b8   :  { %7662 = vmatpush1.bf16.msra.mxu1 %v9513_v14  ;;  %7319 = vmatprep.subr.bf16.mxu0 %v9518_v47  ;;  %v9602_v14 = vld [vmem:[#allocation7 + $0xd24] ss:$16 sps:$4 sm:$0xff]   ;;  %v9605_v47 = vld [vmem:[#allocation7 + $0xd2c] ss:$16 sps:$4 sm:$0xff]  }
 0x3b9   :  { %7663 = vmatprep.subr.bf16.mxu1 %v9521_v31  ;;  %v9600_v31 = vld [vmem:[#allocation7 + $0xd20] ss:$16 sps:$4 sm:$0xff]  }
 0x3bb   :  { %7320 = vmatpush1.bf16.msra.mxu0 %v9516_v34  ;;  %v9603_v34 = vld [vmem:[#allocation7 + $0xd28] ss:$16 sps:$4 sm:$0xff]  }
 0x3bc   :  { %7664 = vmatpush1.bf16.msra.mxu1 %v9519_v15  ;;  %7321 = vmatprep.subr.bf16.mxu0 %v9524_v16  ;;  %v9608_v15 = vld [vmem:[#allocation7 + $0xd44] ss:$16 sps:$4 sm:$0xff]   ;;  %v9611_v16 = vld [vmem:[#allocation7 + $0xd4c] ss:$16 sps:$4 sm:$0xff]  }
 0x3bd   :  { %7665 = vmatprep.subr.bf16.mxu1 %v9527_v17  ;;  %v9606_v17 = vld [vmem:[#allocation7 + $0xd40] ss:$16 sps:$4 sm:$0xff]  }
 0x3bf   :  { %7322 = vmatpush1.bf16.msra.mxu0 %v9522_v18  ;;  %v9609_v18 = vld [vmem:[#allocation7 + $0xd48] ss:$16 sps:$4 sm:$0xff]  }
 0x3c0   :  { %7666 = vmatpush1.bf16.msra.mxu1 %v9525_v19  ;;  %7323 = vmatprep.subr.bf16.mxu0 %v9530_v20  ;;  %v9614_v19 = vld [vmem:[#allocation7 + $0xd64] ss:$16 sps:$4 sm:$0xff]   ;;  %v9617_v20 = vld [vmem:[#allocation7 + $0xd6c] ss:$16 sps:$4 sm:$0xff]  }
 0x3c1   :  { %7667 = vmatprep.subr.bf16.mxu1 %v9533_v21  ;;  %v9612_v21 = vld [vmem:[#allocation7 + $0xd60] ss:$16 sps:$4 sm:$0xff]  }
 0x3c3   :  { %7324 = vmatpush1.bf16.msra.mxu0 %v9528_v58  ;;  %v9615_v58 = vld [vmem:[#allocation7 + $0xd68] ss:$16 sps:$4 sm:$0xff]  }
 0x3c4   :  { %7668 = vmatpush1.bf16.msra.mxu1 %v9531_v23  ;;  %7325 = vmatprep.subr.bf16.mxu0 %v9536_v26  ;;  %v9620_v23 = vld [vmem:[#allocation7 + $0xd84] ss:$16 sps:$4 sm:$0xff]   ;;  %v9623_v26 = vld [vmem:[#allocation7 + $0xd8c] ss:$16 sps:$4 sm:$0xff]  }
 0x3c5   :  { %7669 = vmatprep.subr.bf16.mxu1 %v9539_v37  ;;  %v9618_v37 = vld [vmem:[#allocation7 + $0xd80] ss:$16 sps:$4 sm:$0xff]  }
 0x3c7   :  { %7326 = vmatpush1.bf16.msra.mxu0 %v9534_v32  ;;  %v9621_v32 = vld [vmem:[#allocation7 + $0xd88] ss:$16 sps:$4 sm:$0xff]  }
 0x3c8   :  { %7670 = vmatpush1.bf16.msra.mxu1 %v9537_v3  ;;  %7327 = vmatprep.subr.bf16.mxu0 %v9542_v38  ;;  %v9626_v3 = vld [vmem:[#allocation7 + $0xda4] ss:$16 sps:$4 sm:$0xff]   ;;  %v9629_v38 = vld [vmem:[#allocation7 + $0xdac] ss:$16 sps:$4 sm:$0xff]  }
 0x3c9   :  { %7671 = vmatprep.subr.bf16.mxu1 %v9545_v35  ;;  %v9624_v35 = vld [vmem:[#allocation7 + $0xda0] ss:$16 sps:$4 sm:$0xff]  }
 0x3cb   :  { %7328 = vmatpush1.bf16.msra.mxu0 %v9540_v25  ;;  %v9627_v25 = vld [vmem:[#allocation7 + $0xda8] ss:$16 sps:$4 sm:$0xff]  }
 0x3cc   :  { %7672 = vmatpush1.bf16.msra.mxu1 %v9543_v40  ;;  %7340 = vmatprep.subr.bf16.mxu0 %v9548_v41  ;;  %v9632_v40 = vld [vmem:[#allocation7 + $0xdc4] ss:$16 sps:$4 sm:$0xff]   ;;  %v9635_v41 = vld [vmem:[#allocation7 + $0xdcc] ss:$16 sps:$4 sm:$0xff]  }
 0x3cd   :  { %7684 = vmatprep.subr.bf16.mxu1 %v9551_v43  ;;  %v9630_v43 = vld [vmem:[#allocation7 + $0xdc0] ss:$16 sps:$4 sm:$0xff]  }
 0x3ce   :  { %7330 = vmatmul.mubr.bf16.vlgmr.msra.gmra.mrb[16].mxu0 %v10094_v53 }
 0x3cf   :  { %7674 = vmatmul.mubr.bf16.vlgmr.msra.gmra.mrb[16].mxu1 %v10094_v53  ;;  %7341 = vmatpush1.bf16.msra.mxu0 %v9546_v45  ;;  %v9569_v53 = vld [vmem:[#allocation7 + $0xc6c] ss:$16 sps:$4 sm:$0xff]   ;;  %v9633_v45 = vld [vmem:[#allocation7 + $0xdc8] ss:$16 sps:$4 sm:$0xff]  }
 0x3d0   :  { %7372 = vmatprep.mubr.bf16.mxu0 %v10124_v56  ;;  %7685 = vmatpush1.bf16.msra.mxu1 %v9549_v48  ;;  %v9638_v48 = vld [vmem:[#allocation7 + $0xde4] ss:$16 sps:$4 sm:$0xff]  }
 0x3d1   :  { %7716 = vmatprep.mubr.bf16.mxu1 %v10124_v56  ;;  %7342 = vmatprep.subr.bf16.mxu0 %v9554_v36  ;;  %v9570_v56 = vld [vmem:[#allocation7 + $0xc80] ss:$16 sps:$4 sm:$0xff]   ;;  %v9641_v36 = vld [vmem:[#allocation7 + $0xdec] ss:$16 sps:$4 sm:$0xff]  }
 0x3d2   :  { %7686 = vmatprep.subr.bf16.mxu1 %v9557_v49  ;;  %v9636_v49 = vld [vmem:[#allocation7 + $0xde0] ss:$16 sps:$4 sm:$0xff]  }
 0x3d3   :  { %7343 = vmatpush1.bf16.msra.mxu0 %v9552_v33  ;;  %v9639_v33 = vld [vmem:[#allocation7 + $0xde8] ss:$16 sps:$4 sm:$0xff]  }
 0x3d4   :  { %7687 = vmatpush1.bf16.msra.mxu1 %v9555_v50  ;;  %7344 = vmatprep.subr.bf16.mxu0 %v9560_v51  ;;  %v9644_v50 = vld [vmem:[#allocation7 + $0xe04] ss:$16 sps:$4 sm:$0xff]   ;;  %v9647_v51 = vld [vmem:[#allocation7 + $0xe0c] ss:$16 sps:$4 sm:$0xff]  }
 0x3d5   :  { %7688 = vmatprep.subr.bf16.mxu1 %v9563_v30  ;;  %v9642_v30 = vld [vmem:[#allocation7 + $0xe00] ss:$16 sps:$4 sm:$0xff]  }
 0x3d7   :  { %7345 = vmatpush1.bf16.msra.mxu0 %v9558_v52  ;;  %v9645_v52 = vld [vmem:[#allocation7 + $0xe08] ss:$16 sps:$4 sm:$0xff]  }
 0x3d8   :  { %7689 = vmatpush1.bf16.msra.mxu1 %v9561_v55  ;;  %7346 = vmatprep.subr.bf16.mxu0 %v9566_v42  ;;  %v9650_v55 = vld [vmem:[#allocation7 + $0xe24] ss:$16 sps:$4 sm:$0xff]   ;;  %v9653_v42 = vld [vmem:[#allocation7 + $0xe2c] ss:$16 sps:$4 sm:$0xff]  }
 0x3d9   :  { %7690 = vmatprep.subr.bf16.mxu1 %v9569_v53  ;;  %v9648_v53 = vld [vmem:[#allocation7 + $0xe20] ss:$16 sps:$4 sm:$0xff]  }
 0x3db   :  { %7347 = vmatpush1.bf16.msra.mxu0 %v9564_v57  ;;  %v9651_v57 = vld [vmem:[#allocation7 + $0xe28] ss:$16 sps:$4 sm:$0xff]  }
 0x3dc   :  { %7691 = vmatpush1.bf16.msra.mxu1 %v9567_v0  ;;  %7348 = vmatprep.subr.bf16.mxu0 %v9572_v1  ;;  %v9656_v0 = vld [vmem:[#allocation7 + $0xe44] ss:$16 sps:$4 sm:$0xff]   ;;  %v9659_v1 = vld [vmem:[#allocation7 + $0xe4c] ss:$16 sps:$4 sm:$0xff]  }
 0x3dd   :  { %7692 = vmatprep.subr.bf16.mxu1 %v9575_v2  ;;  %v9654_v2 = vld [vmem:[#allocation7 + $0xe40] ss:$16 sps:$4 sm:$0xff]  }
 0x3df   :  { %7349 = vmatpush1.bf16.msra.mxu0 %v9570_v56  ;;  %v9657_v56 = vld [vmem:[#allocation7 + $0xe48] ss:$16 sps:$4 sm:$0xff]  }
 0x3e0   :  { %7693 = vmatpush1.bf16.msra.mxu1 %v9573_v4  ;;  %7350 = vmatprep.subr.bf16.mxu0 %v9578_v5  ;;  %v9662_v4 = vld [vmem:[#allocation7 + $0xe64] ss:$16 sps:$4 sm:$0xff]   ;;  %v9660_v5 = vld [vmem:[#allocation7 + $0xe60] ss:$16 sps:$4 sm:$0xff]  }
 0x3e1   :  { %7694 = vmatprep.subr.bf16.mxu1 %v9581_v59  ;;  %v9663_v59 = vld [vmem:[#allocation7 + $0xe68] ss:$16 sps:$4 sm:$0xff]  }
 0x3e3   :  { %7351 = vmatpush1.bf16.msra.mxu0 %v9576_v6  ;;  %v9668_v6 = vld [vmem:[#allocation7 + $0xe84] ss:$16 sps:$4 sm:$0xff]  }
 0x3e4   :  { %7695 = vmatpush1.bf16.msra.mxu1 %v9579_v7  ;;  %7352 = vmatprep.subr.bf16.mxu0 %v9584_v8  ;;  %v9671_v7 = vld [vmem:[#allocation7 + $0xe8c] ss:$16 sps:$4 sm:$0xff]   ;;  %v9669_v8 = vld [vmem:[#allocation7 + $0xe88] ss:$16 sps:$4 sm:$0xff]  }
 0x3e5   :  { %7696 = vmatprep.subr.bf16.mxu1 %v9587_v9  ;;  %v9674_v9 = vld [vmem:[#allocation7 + $0xea4] ss:$16 sps:$4 sm:$0xff]  }
 0x3e7   :  { %7353 = vmatpush1.bf16.msra.mxu0 %v9582_v22  ;;  %v9677_v22 = vld [vmem:[#allocation7 + $0xeac] ss:$16 sps:$4 sm:$0xff]  }
 0x3e8   :  { %7697 = vmatpush1.bf16.msra.mxu1 %v9585_v10  ;;  %7354 = vmatprep.subr.bf16.mxu0 %v9590_v24  ;;  %v9672_v10 = vld [vmem:[#allocation7 + $0xea0] ss:$16 sps:$4 sm:$0xff]   ;;  %v9675_v24 = vld [vmem:[#allocation7 + $0xea8] ss:$16 sps:$4 sm:$0xff]  }
 0x3e9   :  { %7698 = vmatprep.subr.bf16.mxu1 %v9593_v29  ;;  %v9680_v29 = vld [vmem:[#allocation7 + $0xec4] ss:$16 sps:$4 sm:$0xff]  }
 0x3eb   :  { %7355 = vmatpush1.bf16.msra.mxu0 %v9588_v27  ;;  %v9683_v27 = vld [vmem:[#allocation7 + $0xecc] ss:$16 sps:$4 sm:$0xff]  }
 0x3ec   :  { %7699 = vmatpush1.bf16.msra.mxu1 %v9591_v11  ;;  %7356 = vmatprep.subr.bf16.mxu0 %v9596_v12  ;;  %v9678_v11 = vld [vmem:[#allocation7 + $0xec0] ss:$16 sps:$4 sm:$0xff]   ;;  %v9681_v12 = vld [vmem:[#allocation7 + $0xec8] ss:$16 sps:$4 sm:$0xff]  }
 0x3ed   :  { %7700 = vmatprep.subr.bf16.mxu1 %v9599_v13  ;;  %v9686_v13 = vld [vmem:[#allocation7 + $0xee4] ss:$16 sps:$4 sm:$0xff]  }
 0x3ef   :  { %7357 = vmatpush1.bf16.msra.mxu0 %v9594_v28  ;;  %v9689_v28 = vld [vmem:[#allocation7 + $0xeec] ss:$16 sps:$4 sm:$0xff]  }
 0x3f0   :  { %7701 = vmatpush1.bf16.msra.mxu1 %v9597_v62  ;;  %7358 = vmatprep.subr.bf16.mxu0 %v9602_v14  ;;  %v9684_v62 = vld [vmem:[#allocation7 + $0xee0] ss:$16 sps:$4 sm:$0xff]   ;;  %v9687_v14 = vld [vmem:[#allocation7 + $0xee8] ss:$16 sps:$4 sm:$0xff]  }
 0x3f1   :  { %7702 = vmatprep.subr.bf16.mxu1 %v9605_v47  ;;  %v9692_v47 = vld [vmem:[#allocation7 + $0xf04] ss:$16 sps:$4 sm:$0xff]  }
 0x3f3   :  { %7359 = vmatpush1.bf16.msra.mxu0 %v9600_v31  ;;  %v9695_v31 = vld [vmem:[#allocation7 + $0xf0c] ss:$16 sps:$4 sm:$0xff]  }
 0x3f4   :  { %7703 = vmatpush1.bf16.msra.mxu1 %v9603_v34  ;;  %7360 = vmatprep.subr.bf16.mxu0 %v9608_v15  ;;  %v9690_v34 = vld [vmem:[#allocation7 + $0xf00] ss:$16 sps:$4 sm:$0xff]   ;;  %v9693_v15 = vld [vmem:[#allocation7 + $0xf08] ss:$16 sps:$4 sm:$0xff]  }
 0x3f5   :  { %7704 = vmatprep.subr.bf16.mxu1 %v9611_v16  ;;  %v9698_v16 = vld [vmem:[#allocation7 + $0xf24] ss:$16 sps:$4 sm:$0xff]  }
 0x3f7   :  { %7361 = vmatpush1.bf16.msra.mxu0 %v9606_v17  ;;  %v9701_v17 = vld [vmem:[#allocation7 + $0xf2c] ss:$16 sps:$4 sm:$0xff]  }
 0x3f8   :  { %7705 = vmatpush1.bf16.msra.mxu1 %v9609_v18  ;;  %7362 = vmatprep.subr.bf16.mxu0 %v9614_v19  ;;  %v9696_v18 = vld [vmem:[#allocation7 + $0xf20] ss:$16 sps:$4 sm:$0xff]   ;;  %v9699_v19 = vld [vmem:[#allocation7 + $0xf28] ss:$16 sps:$4 sm:$0xff]  }
 0x3f9   :  { %7706 = vmatprep.subr.bf16.mxu1 %v9617_v20  ;;  %v9704_v20 = vld [vmem:[#allocation7 + $0xf44] ss:$16 sps:$4 sm:$0xff]  }
 0x3fb   :  { %7363 = vmatpush1.bf16.msra.mxu0 %v9612_v21  ;;  %v9707_v21 = vld [vmem:[#allocation7 + $0xf4c] ss:$16 sps:$4 sm:$0xff]  }
 0x3fc   :  { %7707 = vmatpush1.bf16.msra.mxu1 %v9615_v58  ;;  %7364 = vmatprep.subr.bf16.mxu0 %v9620_v23  ;;  %v9702_v58 = vld [vmem:[#allocation7 + $0xf40] ss:$16 sps:$4 sm:$0xff]   ;;  %v9705_v23 = vld [vmem:[#allocation7 + $0xf48] ss:$16 sps:$4 sm:$0xff]  }
 0x3fd   :  { %7708 = vmatprep.subr.bf16.mxu1 %v9623_v26  ;;  %v9710_v26 = vld [vmem:[#allocation7 + $0xf64] ss:$16 sps:$4 sm:$0xff]  }
 0x3ff   :  { %7365 = vmatpush1.bf16.msra.mxu0 %v9618_v37  ;;  %v9713_v37 = vld [vmem:[#allocation7 + $0xf6c] ss:$16 sps:$4 sm:$0xff]  }
 0x400   :  { %7709 = vmatpush1.bf16.msra.mxu1 %v9621_v32  ;;  %7366 = vmatprep.subr.bf16.mxu0 %v9626_v3  ;;  %v9708_v32 = vld [vmem:[#allocation7 + $0xf60] ss:$16 sps:$4 sm:$0xff]   ;;  %v9711_v3 = vld [vmem:[#allocation7 + $0xf68] ss:$16 sps:$4 sm:$0xff]  }
 0x401   :  { %7710 = vmatprep.subr.bf16.mxu1 %v9629_v38  ;;  %v9716_v38 = vld [vmem:[#allocation7 + $0xf84] ss:$16 sps:$4 sm:$0xff]  }
 0x403   :  { %7367 = vmatpush1.bf16.msra.mxu0 %v9624_v35  ;;  %v9719_v35 = vld [vmem:[#allocation7 + $0xf8c] ss:$16 sps:$4 sm:$0xff]  }
 0x404   :  { %7711 = vmatpush1.bf16.msra.mxu1 %v9627_v25  ;;  %7368 = vmatprep.subr.bf16.mxu0 %v9632_v40  ;;  %v9714_v25 = vld [vmem:[#allocation7 + $0xf80] ss:$16 sps:$4 sm:$0xff]   ;;  %v9717_v40 = vld [vmem:[#allocation7 + $0xf88] ss:$16 sps:$4 sm:$0xff]  }
 0x405   :  { %7712 = vmatprep.subr.bf16.mxu1 %v9635_v41  ;;  %v9722_v41 = vld [vmem:[#allocation7 + $0xfa4] ss:$16 sps:$4 sm:$0xff]  }
 0x407   :  { %7369 = vmatpush1.bf16.msra.mxu0 %v9630_v43  ;;  %v9725_v43 = vld [vmem:[#allocation7 + $0xfac] ss:$16 sps:$4 sm:$0xff]  }
 0x408   :  { %7713 = vmatpush1.bf16.msra.mxu1 %v9633_v45  ;;  %7370 = vmatprep.subr.bf16.mxu0 %v9638_v48  ;;  %v9720_v45 = vld [vmem:[#allocation7 + $0xfa0] ss:$16 sps:$4 sm:$0xff]   ;;  %v9723_v48 = vld [vmem:[#allocation7 + $0xfa8] ss:$16 sps:$4 sm:$0xff]  }
 0x409   :  { %7714 = vmatprep.subr.bf16.mxu1 %v9641_v36  ;;  %v9728_v36 = vld [vmem:[#allocation7 + $0xfc4] ss:$16 sps:$4 sm:$0xff]  }
 0x40b   :  { %7371 = vmatpush1.bf16.msra.mxu0 %v9636_v49  ;;  %v9731_v49 = vld [vmem:[#allocation7 + $0xfcc] ss:$16 sps:$4 sm:$0xff]  }
 0x40c   :  { %7715 = vmatpush1.bf16.msra.mxu1 %v9639_v33  ;;  %7383 = vmatprep.subr.bf16.mxu0 %v9644_v50  ;;  %v9726_v33 = vld [vmem:[#allocation7 + $0xfc0] ss:$16 sps:$4 sm:$0xff]   ;;  %v9729_v50 = vld [vmem:[#allocation7 + $0xfc8] ss:$16 sps:$4 sm:$0xff]  }
 0x40d   :  { %7727 = vmatprep.subr.bf16.mxu1 %v9647_v51  ;;  %v9734_v51 = vld [vmem:[#allocation7 + $0xfe4] ss:$16 sps:$4 sm:$0xff]  }
 0x40e   :  { %7373 = vmatmul.mubr.bf16.vlgmr.msra.gmra.mrb[16].mxu0 %v10120_v39 }
 0x40f   :  { %7717 = vmatmul.mubr.bf16.vlgmr.msra.gmra.mrb[16].mxu1 %v10120_v39  ;;  %7384 = vmatpush1.bf16.msra.mxu0 %v9642_v30  ;;  %v9665_v39 = vld [vmem:[#allocation7 + $0xe6c] ss:$16 sps:$4 sm:$0xff]  }
 0x410   :  { %7415 = vmatprep.mubr.bf16.mxu0 %v10126_v46  ;;  %7728 = vmatpush1.bf16.msra.mxu1 %v9645_v52  ;;  %v9737_v30 = vld [vmem:[#allocation7 + $0xfec] ss:$16 sps:$4 sm:$0xff]   ;;  %v9732_v52 = vld [vmem:[#allocation7 + $0xfe0] ss:$16 sps:$4 sm:$0xff]  }
 0x411   :  { %7759 = vmatprep.mubr.bf16.mxu1 %v10126_v46  ;;  %7385 = vmatprep.subr.bf16.mxu0 %v9650_v55  ;;  %v9666_v46 = vld [vmem:[#allocation7 + $0xe80] ss:$16 sps:$4 sm:$0xff]   ;;  %v9735_v55 = vld [vmem:[#allocation7 + $0xfe8] ss:$16 sps:$4 sm:$0xff]  }
 0x412   :  { %7729 = vmatprep.subr.bf16.mxu1 %v9653_v42  ;;  %v4500_v42 = vld [vmem:[#allocation8] sm:$0xf] }
 0x413   :  { %7386 = vmatpush1.bf16.msra.mxu0 %v9648_v53  ;;  %v4505_v53 = vrot.slane %v4500_v42, %v10007_v54 }
 0x414   :  { %7730 = vmatpush1.bf16.msra.mxu1 %v9651_v57  ;;  %7387 = vmatprep.subr.bf16.mxu0 %v9656_v0  ;;  %v4513_v57 = vrot.slane %v4500_v42, %v10012_v60  ;;  %v4509_v0 = vrot.slane %v4500_v42, %v10015_v61 }
 0x415   :  { %7731 = vmatprep.subr.bf16.mxu1 %v9659_v1  ;;  %v4517_v1 = vrot.slane %v4500_v42, %v10018_v63 }
 0x417   :  { %7388 = vmatpush1.bf16.msra.mxu0 %v9654_v2 }
 0x418   :  { %7732 = vmatpush1.bf16.msra.mxu1 %v9657_v56  ;;  %7389 = vmatprep.subr.bf16.mxu0 %v9662_v4 }
 0x419   :  { %7733 = vmatprep.subr.bf16.mxu1 %v9665_v39 }
 0x41b   :  { %7390 = vmatpush1.bf16.msra.mxu0 %v9660_v5 }
 0x41c   :  { %7734 = vmatpush1.bf16.msra.mxu1 %v9663_v59  ;;  %7391 = vmatprep.subr.bf16.mxu0 %v9668_v6 }
 0x41d   :  { %7735 = vmatprep.subr.bf16.mxu1 %v9671_v7 }
 0x41f   :  { %7392 = vmatpush1.bf16.msra.mxu0 %v9666_v46 }
 0x420   :  { %7736 = vmatpush1.bf16.msra.mxu1 %v9669_v8  ;;  %7393 = vmatprep.subr.bf16.mxu0 %v9674_v9 }
 0x421   :  { %7737 = vmatprep.subr.bf16.mxu1 %v9677_v22 }
 0x423   :  { %7394 = vmatpush1.bf16.msra.mxu0 %v9672_v10 }
 0x424   :  { %7738 = vmatpush1.bf16.msra.mxu1 %v9675_v24  ;;  %7395 = vmatprep.subr.bf16.mxu0 %v9680_v29 }
 0x425   :  { %7739 = vmatprep.subr.bf16.mxu1 %v9683_v27 }
 0x427   :  { %7396 = vmatpush1.bf16.msra.mxu0 %v9678_v11 }
 0x428   :  { %7740 = vmatpush1.bf16.msra.mxu1 %v9681_v12  ;;  %7397 = vmatprep.subr.bf16.mxu0 %v9686_v13 }
 0x429   :  { %7741 = vmatprep.subr.bf16.mxu1 %v9689_v28 }
 0x42b   :  { %7398 = vmatpush1.bf16.msra.mxu0 %v9684_v62 }
 0x42c   :  { %7742 = vmatpush1.bf16.msra.mxu1 %v9687_v14  ;;  %7399 = vmatprep.subr.bf16.mxu0 %v9692_v47 }
 0x42d   :  { %7743 = vmatprep.subr.bf16.mxu1 %v9695_v31 }
 0x42f   :  { %7400 = vmatpush1.bf16.msra.mxu0 %v9690_v34 }
 0x430   :  { %7744 = vmatpush1.bf16.msra.mxu1 %v9693_v15  ;;  %7401 = vmatprep.subr.bf16.mxu0 %v9698_v16 }
 0x431   :  { %7745 = vmatprep.subr.bf16.mxu1 %v9701_v17 }
 0x433   :  { %7402 = vmatpush1.bf16.msra.mxu0 %v9696_v18 }
 0x434   :  { %7746 = vmatpush1.bf16.msra.mxu1 %v9699_v19  ;;  %7403 = vmatprep.subr.bf16.mxu0 %v9704_v20 }
 0x435   :  { %7747 = vmatprep.subr.bf16.mxu1 %v9707_v21 }
 0x437   :  { %7404 = vmatpush1.bf16.msra.mxu0 %v9702_v58 }
 0x438   :  { %7748 = vmatpush1.bf16.msra.mxu1 %v9705_v23  ;;  %7405 = vmatprep.subr.bf16.mxu0 %v9710_v26 }
 0x439   :  { %7749 = vmatprep.subr.bf16.mxu1 %v9713_v37 }
 0x43b   :  { %7406 = vmatpush1.bf16.msra.mxu0 %v9708_v32 }
 0x43c   :  { %7750 = vmatpush1.bf16.msra.mxu1 %v9711_v3  ;;  %7407 = vmatprep.subr.bf16.mxu0 %v9716_v38 }
 0x43d   :  { %7751 = vmatprep.subr.bf16.mxu1 %v9719_v35 }
 0x43f   :  { %7408 = vmatpush1.bf16.msra.mxu0 %v9714_v25 }
 0x440   :  { %7752 = vmatpush1.bf16.msra.mxu1 %v9717_v40  ;;  %7409 = vmatprep.subr.bf16.mxu0 %v9722_v41 }
 0x441   :  { %7753 = vmatprep.subr.bf16.mxu1 %v9725_v43 }
 0x443   :  { %7410 = vmatpush1.bf16.msra.mxu0 %v9720_v45 }
 0x444   :  { %7754 = vmatpush1.bf16.msra.mxu1 %v9723_v48  ;;  %7411 = vmatprep.subr.bf16.mxu0 %v9728_v36 }
 0x445   :  { %7755 = vmatprep.subr.bf16.mxu1 %v9731_v49 }
 0x447   :  { %7412 = vmatpush1.bf16.msra.mxu0 %v9726_v33 }
 0x448   :  { %7756 = vmatpush1.bf16.msra.mxu1 %v9729_v50  ;;  %7413 = vmatprep.subr.bf16.mxu0 %v9734_v51 }
 0x449   :  { %7757 = vmatprep.subr.bf16.mxu1 %v9737_v30 }
 0x44b   :  { %7414 = vmatpush1.bf16.msra.mxu0 %v9732_v52 }
 0x44c   :  { %7758 = vmatpush1.bf16.msra.mxu1 %v9735_v55 }
 0x44e   :  { %7416 = vmatmul.mubr.bf16.vlgmr.msra.gmra.mrb[16].mxu0 %v10122_v44 }
 0x44f   :  { %7760 = vmatmul.mubr.bf16.vlgmr.msra.gmra.mrb[16].mxu1 %v10122_v44 }
 0x521   :  { %v7417_v2 = vpop.f32.mrb[16].mxu0 }
 0x522   :  { %v8857_v56 = vadd.f32 %v7417_v2, %v4505_v53  ;;  %v7761_v4 = vpop.f32.mrb[16].mxu1  ;;  %v7419_v39 = vpop.f32.mrb[17].mxu0 }
 0x523   :  { %v8861_v5 = vadd.f32 %v7761_v4, %v4513_v57  ;;  %v8858_v59 = vadd.f32 %v7419_v39, %v4509_v0  ;;  %v7763_v6 = vpop.f32.mrb[17].mxu1  ;;  %v7421_v7 = vpop.f32.mrb[18].mxu0 }
 0x524   :  { %7770 = vst [vmem:[#allocation10] sm:$0xff] %v8857_v56  ;;  %v8862_v44 = vadd.f32 %v7763_v6, %v4517_v1  ;;  %v8859_v46 = vadd.f32 %v7421_v7, %v4505_v53  ;;  %v7765_v54 = vpop.f32.mrb[18].mxu1  ;;  %v7423_v8 = vpop.f32.mrb[19].mxu0 }
 0x525   :  { %7772 = vst [vmem:[#allocation10 + $0x10] sm:$0xff] %v8861_v5  ;;  %7771 = vst [vmem:[#allocation10 + $0x8] sm:$0xff] %v8858_v59  ;;  %v8863_v60 = vadd.f32 %v7765_v54, %v4513_v57  ;;  %v8860_v61 = vadd.f32 %v7423_v8, %v4509_v0  ;;  %v7767_v63 = vpop.f32.mrb[19].mxu1 }
 0x526   :  { %7773 = vst [vmem:[#allocation10 + $0x18] sm:$0xff] %v8862_v44  ;;  %7774 = vst [vmem:[#allocation10 + $0x20] sm:$0xff] %v8859_v46  ;;  %v8864_v9 = vadd.f32 %v7767_v63, %v4517_v1 }
 0x527   :  { %7776 = vst [vmem:[#allocation10 + $0x30] sm:$0xff] %v8863_v60  ;;  %7775 = vst [vmem:[#allocation10 + $0x28] sm:$0xff] %v8860_v61 }
 0x528   :  { %7777 = vst [vmem:[#allocation10 + $0x38] sm:$0xff] %v8864_v9 }
 0x529   :  { %9845 = shalt.err (!%p9842_p8)
}
 0x52a   :  { %s9846_s15 = scalar_lea.hbm %s10167_s5, 1024 }
 0x52b   :  { %p9847_p9 = scmp.ne.s32.totalorder %s10167_s5, %s9846_s15  ;;  %p9850_p10 = scmp.lt.u32.totalorder %s9846_s15, %s10167_s5 }
 0x52d   :  { %p9852_p11 = pnand %p9850_p10, %p9847_p9 }
 0x52f   :  { %9855 = shalt.err (!%p9852_p11)
}
 0x530   :  { %s9873_s19 = smov 512   ;;  %s9874_s20 = smov 32  }
 0x531   :  { %7789 = dma.vmem_to_hbm [thread:$0]  %s7784_s13, 1024, %s10167_s5, [#allocation4], %s9873_s19, %s9873_s19, %s9874_s20  }
 0x532   :  { %9862 = dma.done.wait [#allocation4], 1024  }
 0x533   :  { %9863 = vsyncadd [#allocation4], 4294966272 }
 0x534   :  { %7793 = vsyncpa [#allocation3], 1 }
 0x535   :  { %7794 = vsyncpa [#allocation6], 1 }
 0x536   :  { %7795 = vsyncpa [#allocation9], 1 }
 0x537   :  { %7796 = vsyncpa [#allocation4], 1 }

</bundles_post_ra>
